<compile_context>
chip_gen: v5e
topology: v5e:2x2
jax: 0.10.0
libtpu: 0.0.40
codegen_flags: <defaults>
</compile_context>

<pallas_src>
import jax
import jax.numpy as jnp
from jax.experimental import pallas as pl
from jax.experimental.pallas import tpu as pltpu


TILE_M = 256   # node-row tile   (multiple of 256 keeps the v6e/v7x 256x256 MXU fed)
TILE_K = 256   # neighbor-column (reduction) tile
VMEM_LIMIT_BYTES = 32 * 1024 * 1024   # explicit; per-call tile footprint is ~1 MiB


def _round_up(x, m):
    return ((x + m - 1) // m) * m


# ---------------------------------------------------------------------------
# Kernels
# ---------------------------------------------------------------------------

def _prologue_kernel(x_ref, px_ref, aggw_ref, aggb_ref, w0t_ref, w0b_ref, z_ref):
    """z0[rows] = x @ W0_top + (pre_x @ W_agg + b_agg) @ W0_bot (split-concat matmul)."""
    f32, bf16 = jnp.float32, jnp.bfloat16
    pre = jnp.dot(px_ref[...], aggw_ref[...], preferred_element_type=f32) + aggb_ref[...]
    z = jnp.dot(x_ref[...], w0t_ref[...], preferred_element_type=f32)
    z = z + jnp.dot(pre.astype(bf16), w0b_ref[...], preferred_element_type=f32)
    z_ref[...] = z.astype(z_ref.dtype)


def _agg_mid_kernel(a_ref, z_ref, b_ref, w_ref, zn_ref, acc_ref):
    """Row tile r of: z_next = relu(A_hat @ z + b) @ W_next.

    grid = (row_tiles [parallel], neighbor_tiles [arbitrary reduction]).
    A tile is streamed int8 -> widened to bf16; z is whole-resident, sliced by k.
    """
    k = pl.program_id(1)

    @pl.when(k == 0)
    def _():
        acc_ref[...] = jnp.zeros_like(acc_ref)

    ks = pl.multiple_of(k * TILE_K, TILE_K)
    a = a_ref[...].astype(jnp.float32).astype(jnp.bfloat16)   # 0/1, exact
    acc_ref[...] += jnp.dot(a, z_ref[pl.ds(ks, TILE_K), :],
                            preferred_element_type=jnp.float32)

    @pl.when(k == pl.num_programs(1) - 1)
    def _():
        h = jnp.maximum(acc_ref[...] + b_ref[...], 0.0)        # bias + ReLU in f32
        zn_ref[...] = jnp.dot(h.astype(jnp.bfloat16), w_ref[...],
                              preferred_element_type=jnp.float32).astype(zn_ref.dtype)


def _agg_pool_kernel(a_ref, z_ref, b_ref, sel_ref, pool_ref, acc_ref):
    """Last conv (no ReLU) with global_add_pool fused per row tile:
    pool[r] = sel[:, rows_r] @ (A_hat[rows_r, :] @ z + b)."""
    k = pl.program_id(1)

    @pl.when(k == 0)
    def _():
        acc_ref[...] = jnp.zeros_like(acc_ref)

    ks = pl.multiple_of(k * TILE_K, TILE_K)
    a = a_ref[...].astype(jnp.float32).astype(jnp.bfloat16)
    acc_ref[...] += jnp.dot(a, z_ref[pl.ds(ks, TILE_K), :],
                            preferred_element_type=jnp.float32)

    @pl.when(k == pl.num_programs(1) - 1)
    def _():
        h = acc_ref[...] + b_ref[...]
        pool_ref[0] = jnp.dot(sel_ref[...], h.astype(jnp.bfloat16),
                              preferred_element_type=jnp.float32)


# ---------------------------------------------------------------------------
# pallas_call wrappers
# ---------------------------------------------------------------------------

def _prologue_call(x_p, pre_x_p, agg_w, agg_b, w0_top, w0_bot, hid):
    n_pad, in_ch = x_p.shape
    r = n_pad // TILE_M
    flops = 2 * n_pad * (256 * 128 + in_ch * hid + 128 * hid)
    bytes_acc = (x_p.size * 2 + pre_x_p.size * 2 + agg_w.size * 2 + agg_b.size * 4
                 + w0_top.size * 2 + w0_bot.size * 2 + n_pad * hid * 2)
    return pl.pallas_call(
        _prologue_kernel,
        out_shape=jax.ShapeDtypeStruct((n_pad, hid), jnp.bfloat16),
        grid=(r,),
        in_specs=[
            pl.BlockSpec((TILE_M, in_ch), lambda i: (i, 0)),
            pl.BlockSpec((TILE_M, 256), lambda i: (i, 0)),
            pl.BlockSpec((256, 128), lambda i: (0, 0)),
            pl.BlockSpec((1, 128), lambda i: (0, 0)),
            pl.BlockSpec((in_ch, hid), lambda i: (0, 0)),
            pl.BlockSpec((128, hid), lambda i: (0, 0)),
        ],
        out_specs=pl.BlockSpec((TILE_M, hid), lambda i: (i, 0)),
        compiler_params=pltpu.CompilerParams(
            dimension_semantics=("parallel",),
            vmem_limit_bytes=VMEM_LIMIT_BYTES),
        cost_estimate=pl.CostEstimate(flops=flops, transcendentals=0,
                                      bytes_accessed=bytes_acc),
    )(x_p, pre_x_p, agg_w, agg_b, w0_top, w0_bot)


def _agg_mid_call(a_p, z, b, w_next):
    n_pad = a_p.shape[0]
    r, kk = n_pad // TILE_M, n_pad // TILE_K
    c_in = z.shape[1]
    c_out = w_next.shape[1]
    flops = 2 * n_pad * n_pad * c_in + 2 * n_pad * c_in * c_out
    bytes_acc = a_p.size + z.size * 2 + b.size * 4 + w_next.size * 2 + n_pad * c_out * 2
    return pl.pallas_call(
        _agg_mid_kernel,
        out_shape=jax.ShapeDtypeStruct((n_pad, c_out), jnp.bfloat16),
        grid=(r, kk),
        in_specs=[
            pl.BlockSpec((TILE_M, TILE_K), lambda i, k: (i, k)),   # streamed int8 A tiles
            pl.BlockSpec((n_pad, c_in), lambda i, k: (0, 0)),      # z whole-resident
            pl.BlockSpec((1, c_in), lambda i, k: (0, 0)),
            pl.BlockSpec((c_in, c_out), lambda i, k: (0, 0)),
        ],
        out_specs=pl.BlockSpec((TILE_M, c_out), lambda i, k: (i, 0)),
        scratch_shapes=[pltpu.VMEM((TILE_M, c_in), jnp.float32)],
        compiler_params=pltpu.CompilerParams(
            dimension_semantics=("parallel", "arbitrary"),
            vmem_limit_bytes=VMEM_LIMIT_BYTES),
        cost_estimate=pl.CostEstimate(flops=flops, transcendentals=0,
                                      bytes_accessed=bytes_acc),
    )(a_p, z, b, w_next)


def _agg_pool_call(a_p, z, b, sel_p):
    n_pad = a_p.shape[0]
    r, kk = n_pad // TILE_M, n_pad // TILE_K
    c_out = z.shape[1]
    g = sel_p.shape[0]
    flops = 2 * n_pad * n_pad * c_out + 2 * g * n_pad * c_out
    bytes_acc = a_p.size + z.size * 2 + b.size * 4 + sel_p.size * 2 + r * g * c_out * 4
    partial = pl.pallas_call(
        _agg_pool_kernel,
        out_shape=jax.ShapeDtypeStruct((r, g, c_out), jnp.float32),
        grid=(r, kk),
        in_specs=[
            pl.BlockSpec((TILE_M, TILE_K), lambda i, k: (i, k)),
            pl.BlockSpec((n_pad, c_out), lambda i, k: (0, 0)),
            pl.BlockSpec((1, c_out), lambda i, k: (0, 0)),
            pl.BlockSpec((g, TILE_M), lambda i, k: (0, i)),
        ],
        out_specs=pl.BlockSpec((1, g, c_out), lambda i, k: (i, 0, 0)),
        scratch_shapes=[pltpu.VMEM((TILE_M, c_out), jnp.float32)],
        compiler_params=pltpu.CompilerParams(
            dimension_semantics=("parallel", "arbitrary"),
            vmem_limit_bytes=VMEM_LIMIT_BYTES),
        cost_estimate=pl.CostEstimate(flops=flops, transcendentals=0,
                                      bytes_accessed=bytes_acc),
    )(a_p, z, b, sel_p)
    # tiny (row_tiles, G, C) reduction; per-row-tile partials keep the row axis
    # megacore-safe on v7x (no cross-core accumulation into one block).
    return jnp.sum(partial, axis=0)


def basic_gnn_forward(params, x_p, pre_x_p, a_p, sel_p):
    """BasicGNN forward on pre-padded inputs (padding/int8 A built once outside)."""
    num_layers = len(params["conv_w"])
    in_ch = x_p.shape[1]
    bf16, f32 = jnp.bfloat16, jnp.float32

    w0 = params["conv_w"][0]
    z = _prologue_call(
        x_p, pre_x_p,
        params["atom_agg_w"].astype(bf16),
        params["atom_agg_b"].reshape(1, -1).astype(f32),
        w0[:in_ch].astype(bf16),      # acts on the raw node features
        w0[in_ch:].astype(bf16),      # acts on the atom_agg features
        w0.shape[1])

    # intermediate conv layers: z <- relu(A_hat @ z + b_i) @ W_{i+1}
    for i in range(num_layers - 1):
        z = _agg_mid_call(
            a_p, z,
            params["conv_b"][i].reshape(1, -1).astype(f32),
            params["conv_w"][i + 1].astype(bf16))

    # last conv layer (no ReLU) + global_add_pool fused per row tile
    return _agg_pool_call(
        a_p, z,
        params["conv_b"][num_layers - 1].reshape(1, -1).astype(f32),
        sel_p)


# ---------------------------------------------------------------------------
# Parameters, pure-f32 reference, demo
# ---------------------------------------------------------------------------

def make_params(key, in_channels, hidden_channels, out_channels, num_layers):
    keys = jax.random.split(key, 2 + 2 * num_layers)
    params = {
        "atom_agg_w": 0.05 * jax.random.normal(keys[0], (256, 128), jnp.float32),
        "atom_agg_b": 0.05 * jax.random.normal(keys[1], (128,), jnp.float32),
        "conv_w": [],
        "conv_b": [],
    }
    dims_in = [in_channels + 128] + [hidden_channels] * (num_layers - 1)
    dims_out = [hidden_channels] * (num_layers - 1) + [out_channels]
    for i in range(num_layers):
        params["conv_w"].append(
            0.05 * jax.random.normal(keys[2 + 2 * i], (dims_in[i], dims_out[i]), jnp.float32))
        params["conv_b"].append(
            0.05 * jax.random.normal(keys[3 + 2 * i], (dims_out[i],), jnp.float32))
    return params


def _reference_forward(params, x, pre_x, a_hat, sel):
    """Pure-f32 reference of the same forward (unpadded)."""
    pre = pre_x @ params["atom_agg_w"] + params["atom_agg_b"]
    h = jnp.concatenate([x, pre], axis=1)
    nl = len(params["conv_w"])
    for i in range(nl):
        h = a_hat @ (h @ params["conv_w"][i]) + params["conv_b"][i]
        if i < nl - 1:
            h = jnp.maximum(h, 0.0)
    return sel @ h


if __name__ == "__main__":
    N = 16            # total nodes (2 graphs x 8-node rings)
    G = 2             # graphs in the batch
    IN_CH = 16        # raw node feature channels
    HID = 128         # lane-dense hidden width (128 fills MXU columns / vregs)
    OUT = 32
    NUM_LAYERS = 3

    key = jax.random.PRNGKey(0)
    k_x, k_pre, k_p = jax.random.split(key, 3)

    x = jax.random.normal(k_x, (N, IN_CH), jnp.float32)
    pre_x = jax.random.normal(k_pre, (N, 256), jnp.float32)
    batch = jnp.concatenate([jnp.zeros(8, jnp.int32), jnp.ones(8, jnp.int32)])

    # ---- one-time input preparation (kept OUT of the per-forward path) ------
    n_pad = _round_up(N, max(TILE_M, TILE_K))
    pad = n_pad - N

    # adjacency (+ self loops) built directly at padded size in int8; padded
    # nodes have all-zero rows/cols and zero sel columns -> never reach the pool.
    nodes = jnp.arange(N)
    ring_dst = (nodes % 8 + 1) % 8 + (nodes // 8) * 8       # ring edges per graph
    a_p = jnp.zeros((n_pad, n_pad), jnp.int8)
    a_p = a_p.at[nodes, ring_dst].set(1)
    a_p = a_p.at[ring_dst, nodes].set(1)
    a_p = a_p.at[nodes, nodes].set(1)                       # self loops (A + I)

    batch_p = jnp.pad(batch, (0, pad), constant_values=-1)  # padded nodes in no graph
    sel_p = (batch_p[None, :] ==
             jnp.arange(G, dtype=jnp.int32)[:, None]).astype(jnp.bfloat16)

    x_p = jnp.pad(x, ((0, pad), (0, 0))).astype(jnp.bfloat16)
    pre_x_p = jnp.pad(pre_x, ((0, pad), (0, 0))).astype(jnp.bfloat16)

    params = make_params(k_p, IN_CH, HID, OUT, NUM_LAYERS)

    out = jax.jit(basic_gnn_forward)(params, x_p, pre_x_p, a_p, sel_p)
    jax.block_until_ready(out)
    assert out.shape == (G, OUT)
    assert bool(jnp.all(jnp.isfinite(out)))

    # validate against a pure-f32 unpadded reference (also guards against
    # padded-row leakage into the pooled output); bf16 MXU -> loose tolerance.
    a_hat_f32 = a_p[:N, :N].astype(jnp.float32)
    sel_f32 = sel_p[:, :N].astype(jnp.float32)
    ref = _reference_forward(params, x, pre_x, a_hat_f32, sel_f32)
    err = float(jnp.max(jnp.abs(out - ref)))
    tol = 0.1 * (1.0 + float(jnp.max(jnp.abs(ref))))
    assert err < tol, f"max|out-ref|={err} exceeds tol={tol}"

    print("KERNEL_OK")
</pallas_src>

<mosaic_0001>
module attributes {stable_mosaic.version = 11 : i64} {
  func.func @_prologue_kernel(%arg0: i32, %arg1: memref<256x16xbf16, #tpu.memory_space<vmem>>, %arg2: memref<256x256xbf16, #tpu.memory_space<vmem>>, %arg3: memref<256x128xbf16, #tpu.memory_space<vmem>>, %arg4: memref<1x128xf32, #tpu.memory_space<vmem>>, %arg5: memref<16x128xbf16, #tpu.memory_space<vmem>>, %arg6: memref<128x128xbf16, #tpu.memory_space<vmem>>, %arg7: memref<256x128xbf16, #tpu.memory_space<vmem>>) attributes {dimension_semantics = [#tpu.dimension_semantics<parallel>], iteration_bounds = array<i64: 1>, scalar_prefetch = 0 : i64, scratch_operands = 0 : i64, tpu.core_type = #tpu.core_type<tc>, window_params = [{transform_indices = @transform_0, window_bounds = array<i64: 256, 16>}, {transform_indices = @transform_1, window_bounds = array<i64: 256, 256>}, {pipeline_mode = #tpu.pipeline_mode<synchronous>, transform_indices = @transform_2, window_bounds = array<i64: 256, 128>}, {pipeline_mode = #tpu.pipeline_mode<synchronous>, transform_indices = @transform_3, window_bounds = array<i64: 1, 128>}, {pipeline_mode = #tpu.pipeline_mode<synchronous>, transform_indices = @transform_4, window_bounds = array<i64: 16, 128>}, {pipeline_mode = #tpu.pipeline_mode<synchronous>, transform_indices = @transform_5, window_bounds = array<i64: 128, 128>}, {transform_indices = @transform_6, window_bounds = array<i64: 256, 128>}]} {
    %c0 = arith.constant 0 : index
    %c0_0 = arith.constant 0 : index
    %0 = vector.load %arg2[%c0, %c0_0] : memref<256x256xbf16, #tpu.memory_space<vmem>>, vector<256x256xbf16>
    %c0_1 = arith.constant 0 : index
    %c0_2 = arith.constant 0 : index
    %1 = vector.load %arg3[%c0_1, %c0_2] : memref<256x128xbf16, #tpu.memory_space<vmem>>, vector<256x128xbf16>
    %cst = arith.constant dense<0.000000e+00> : vector<256x128xf32>
    %2 = tpu.matmul %0, %1, %cst {dimension_numbers = #tpu.dot_dimension_numbers<[1], [0], [0], [1], [0, 0, 1, 1], [], []>} : vector<256x256xbf16>, vector<256x128xbf16>, vector<256x128xf32> -> vector<256x128xf32>
    %c0_3 = arith.constant 0 : index
    %c0_4 = arith.constant 0 : index
    %3 = vector.load %arg4[%c0_3, %c0_4] : memref<1x128xf32, #tpu.memory_space<vmem>>, vector<1x128xf32>
    %4 = vector.broadcast %3 : vector<1x128xf32> to vector<256x128xf32>
    %5 = arith.addf %2, %4 : vector<256x128xf32>
    %c0_5 = arith.constant 0 : index
    %c0_6 = arith.constant 0 : index
    %6 = vector.load %arg1[%c0_5, %c0_6] : memref<256x16xbf16, #tpu.memory_space<vmem>>, vector<256x16xbf16>
    %c0_7 = arith.constant 0 : index
    %c0_8 = arith.constant 0 : index
    %7 = vector.load %arg5[%c0_7, %c0_8] : memref<16x128xbf16, #tpu.memory_space<vmem>>, vector<16x128xbf16>
    %cst_9 = arith.constant dense<0.000000e+00> : vector<256x128xf32>
    %8 = tpu.matmul %6, %7, %cst_9 {dimension_numbers = #tpu.dot_dimension_numbers<[1], [0], [0], [1], [0, 0, 1, 1], [], []>} : vector<256x16xbf16>, vector<16x128xbf16>, vector<256x128xf32> -> vector<256x128xf32>
    %9 = arith.truncf %5 : vector<256x128xf32> to vector<256x128xbf16>
    %c0_10 = arith.constant 0 : index
    %c0_11 = arith.constant 0 : index
    %10 = vector.load %arg6[%c0_10, %c0_11] : memref<128x128xbf16, #tpu.memory_space<vmem>>, vector<128x128xbf16>
    %cst_12 = arith.constant dense<0.000000e+00> : vector<256x128xf32>
    %11 = tpu.matmul %9, %10, %cst_12 {dimension_numbers = #tpu.dot_dimension_numbers<[1], [0], [0], [1], [0, 0, 1, 1], [], []>} : vector<256x128xbf16>, vector<128x128xbf16>, vector<256x128xf32> -> vector<256x128xf32>
    %12 = arith.addf %8, %11 : vector<256x128xf32>
    %13 = arith.truncf %12 : vector<256x128xf32> to vector<256x128xbf16>
    %c0_13 = arith.constant 0 : index
    %c0_14 = arith.constant 0 : index
    %14 = vector.load %arg7[%c0_13, %c0_14] : memref<256x128xbf16, #tpu.memory_space<vmem>>, vector<256x128xbf16>
    tpu.vector_store %arg7[%c0_13, %c0_14], %13 {strides = array<i32>} : memref<256x128xbf16, #tpu.memory_space<vmem>>, vector<256x128xbf16>,
    return
  }
  func.func @transform_0(%arg0: i32) -> (i32, i32) {
    %c0_i32 = arith.constant 0 : i32
    %c0_i32_0 = arith.constant 0 : i32
    return %arg0, %c0_i32 : i32, i32
  }
  func.func @transform_1(%arg0: i32) -> (i32, i32) {
    %c0_i32 = arith.constant 0 : i32
    %c0_i32_0 = arith.constant 0 : i32
    return %arg0, %c0_i32 : i32, i32
  }
  func.func @transform_2(%arg0: i32) -> (i32, i32) {
    %c0_i32 = arith.constant 0 : i32
    %c0_i32_0 = arith.constant 0 : i32
    %c0_i32_1 = arith.constant 0 : i32
    return %c0_i32, %c0_i32_0 : i32, i32
  }
  func.func @transform_3(%arg0: i32) -> (i32, i32) {
    %c0_i32 = arith.constant 0 : i32
    %c0_i32_0 = arith.constant 0 : i32
    %c0_i32_1 = arith.constant 0 : i32
    return %c0_i32, %c0_i32_0 : i32, i32
  }
  func.func @transform_4(%arg0: i32) -> (i32, i32) {
    %c0_i32 = arith.constant 0 : i32
    %c0_i32_0 = arith.constant 0 : i32
    %c0_i32_1 = arith.constant 0 : i32
    return %c0_i32, %c0_i32_0 : i32, i32
  }
  func.func @transform_5(%arg0: i32) -> (i32, i32) {
    %c0_i32 = arith.constant 0 : i32
    %c0_i32_0 = arith.constant 0 : i32
    %c0_i32_1 = arith.constant 0 : i32
    return %c0_i32, %c0_i32_0 : i32, i32
  }
  func.func @transform_6(%arg0: i32) -> (i32, i32) {
    %c0_i32 = arith.constant 0 : i32
    %c0_i32_0 = arith.constant 0 : i32
    return %arg0, %c0_i32 : i32, i32
  }
}

module attributes {stable_mosaic.version = 11 : i64} {
  func.func @_agg_pool_kernel(%arg0: i32, %arg1: i32, %arg2: memref<256x256xi8, #tpu.memory_space<vmem>>, %arg3: memref<256x32xbf16, #tpu.memory_space<vmem>>, %arg4: memref<1x32xf32, #tpu.memory_space<vmem>>, %arg5: memref<2x256xbf16, #tpu.memory_space<vmem>>, %arg6: memref<1x2x32xf32, #tpu.memory_space<vmem>>, %arg7: memref<256x32xf32, #tpu.memory_space<vmem>>) attributes {dimension_semantics = [#tpu.dimension_semantics<parallel>, #tpu.dimension_semantics<arbitrary>], iteration_bounds = array<i64: 1, 1>, scalar_prefetch = 0 : i64, scratch_operands = 1 : i64, tpu.core_type = #tpu.core_type<tc>, window_params = [{transform_indices = @transform_0, window_bounds = array<i64: 256, 256>}, {pipeline_mode = #tpu.pipeline_mode<synchronous>, transform_indices = @transform_1, window_bounds = array<i64: 256, 32>}, {pipeline_mode = #tpu.pipeline_mode<synchronous>, transform_indices = @transform_2, window_bounds = array<i64: 1, 32>}, {transform_indices = @transform_3, window_bounds = array<i64: 2, 256>}, {transform_indices = @transform_4, window_bounds = array<i64: 1, 2, 32>}]} {
    %c0_i32 = arith.constant 0 : i32
    %0 = arith.cmpi eq, %arg1, %c0_i32 : i32
    %1 = arith.extui %0 : i1 to i32
    %c0_i32_0 = arith.constant 0 : i32
    %2 = arith.cmpi ne, %1, %c0_i32_0 : i32
    scf.if %2 {
      %cst_9 = arith.constant 0.000000e+00 : f32
      %17 = vector.broadcast %cst_9 : f32 to vector<256x32xf32>
      %c0_10 = arith.constant 0 : index
      %c0_11 = arith.constant 0 : index
      %18 = vector.load %arg7[%c0_10, %c0_11] : memref<256x32xf32, #tpu.memory_space<vmem>>, vector<256x32xf32>
      tpu.vector_store %arg7[%c0_10, %c0_11], %17 {strides = array<i32>} : memref<256x32xf32, #tpu.memory_space<vmem>>, vector<256x32xf32>,
    } else {
    }
    %c256_i32 = arith.constant 256 : i32
    %3 = arith.muli %arg1, %c256_i32 : i32
    %4 = tpu.assume_multiple %3, 256 : i32
    %c0 = arith.constant 0 : index
    %c0_1 = arith.constant 0 : index
    %5 = vector.load %arg2[%c0, %c0_1] : memref<256x256xi8, #tpu.memory_space<vmem>>, vector<256x256xi8>
    %6 = arith.sitofp %5 : vector<256x256xi8> to vector<256x256xf32>
    %7 = arith.truncf %6 : vector<256x256xf32> to vector<256x256xbf16>
    %c0_2 = arith.constant 0 : index
    %c0_3 = arith.constant 0 : index
    %8 = vector.load %arg7[%c0_2, %c0_3] : memref<256x32xf32, #tpu.memory_space<vmem>>, vector<256x32xf32>
    %9 = arith.index_cast %4 : i32 to index
    %c0_4 = arith.constant 0 : index
    %10 = vector.load %arg3[%9, %c0_4] : memref<256x32xbf16, #tpu.memory_space<vmem>>, vector<256x32xbf16>
    %cst = arith.constant dense<0.000000e+00> : vector<256x32xf32>
    %11 = tpu.matmul %7, %10, %cst {dimension_numbers = #tpu.dot_dimension_numbers<[1], [0], [0], [1], [0, 0, 1, 1], [], []>} : vector<256x256xbf16>, vector<256x32xbf16>, vector<256x32xf32> -> vector<256x32xf32>
    %12 = arith.addf %8, %11 : vector<256x32xf32>
    %c0_5 = arith.constant 0 : index
    %c0_6 = arith.constant 0 : index
    %13 = vector.load %arg7[%c0_5, %c0_6] : memref<256x32xf32, #tpu.memory_space<vmem>>, vector<256x32xf32>
    tpu.vector_store %arg7[%c0_5, %c0_6], %12 {strides = array<i32>} : memref<256x32xf32, #tpu.memory_space<vmem>>, vector<256x32xf32>,
    %c0_i32_7 = arith.constant 0 : i32
    %14 = arith.cmpi eq, %arg1, %c0_i32_7 : i32
    %15 = arith.extui %14 : i1 to i32
    %c0_i32_8 = arith.constant 0 : i32
    %16 = arith.cmpi ne, %15, %c0_i32_8 : i32
    scf.if %16 {
      %c0_9 = arith.constant 0 : index
      %c0_10 = arith.constant 0 : index
      %17 = vector.load %arg7[%c0_9, %c0_10] : memref<256x32xf32, #tpu.memory_space<vmem>>, vector<256x32xf32>
      %c0_11 = arith.constant 0 : index
      %c0_12 = arith.constant 0 : index
      %18 = vector.load %arg4[%c0_11, %c0_12] : memref<1x32xf32, #tpu.memory_space<vmem>>, vector<1x32xf32>
      %19 = vector.broadcast %18 : vector<1x32xf32> to vector<256x32xf32>
      %20 = arith.addf %17, %19 : vector<256x32xf32>
      %c0_13 = arith.constant 0 : index
      %c0_14 = arith.constant 0 : index
      %21 = vector.load %arg5[%c0_13, %c0_14] : memref<2x256xbf16, #tpu.memory_space<vmem>>, vector<2x256xbf16>
      %22 = arith.truncf %20 : vector<256x32xf32> to vector<256x32xbf16>
      %cst_15 = arith.constant dense<0.000000e+00> : vector<2x32xf32>
      %23 = tpu.matmul %21, %22, %cst_15 {dimension_numbers = #tpu.dot_dimension_numbers<[1], [0], [0], [1], [0, 0, 1, 1], [], []>} : vector<2x256xbf16>, vector<256x32xbf16>, vector<2x32xf32> -> vector<2x32xf32>
      %c0_16 = arith.constant 0 : index
      %c0_17 = arith.constant 0 : index
      %c0_18 = arith.constant 0 : index
      %24 = vector.load %arg6[%c0_16, %c0_17, %c0_18] : memref<1x2x32xf32, #tpu.memory_space<vmem>>, vector<1x2x32xf32>
      %25 = vector.shape_cast %24 : vector<1x2x32xf32> to vector<2x32xf32>
      %26 = vector.shape_cast %23 : vector<2x32xf32> to vector<1x2x32xf32>
      tpu.vector_store %arg6[%c0_16, %c0_17, %c0_18], %26 {strides = array<i32>} : memref<1x2x32xf32, #tpu.memory_space<vmem>>, vector<1x2x32xf32>,
    } else {
    }
    return
  }
  func.func @transform_0(%arg0: i32, %arg1: i32) -> (i32, i32) {
    %c0_i32 = arith.constant 0 : i32
    return %arg0, %arg1 : i32, i32
  }
  func.func @transform_1(%arg0: i32, %arg1: i32) -> (i32, i32) {
    %c0_i32 = arith.constant 0 : i32
    %c0_i32_0 = arith.constant 0 : i32
    %c0_i32_1 = arith.constant 0 : i32
    return %c0_i32, %c0_i32_0 : i32, i32
  }
  func.func @transform_2(%arg0: i32, %arg1: i32) -> (i32, i32) {
    %c0_i32 = arith.constant 0 : i32
    %c0_i32_0 = arith.constant 0 : i32
    %c0_i32_1 = arith.constant 0 : i32
    return %c0_i32, %c0_i32_0 : i32, i32
  }
  func.func @transform_3(%arg0: i32, %arg1: i32) -> (i32, i32) {
    %c0_i32 = arith.constant 0 : i32
    %c0_i32_0 = arith.constant 0 : i32
    return %c0_i32, %arg0 : i32, i32
  }
  func.func @transform_4(%arg0: i32, %arg1: i32) -> (i32, i32, i32) {
    %c0_i32 = arith.constant 0 : i32
    %c0_i32_0 = arith.constant 0 : i32
    %c0_i32_1 = arith.constant 0 : i32
    return %arg0, %c0_i32, %c0_i32_0 : i32, i32, i32
  }
}

module attributes {stable_mosaic.version = 11 : i64} {
  func.func @_agg_mid_kernel(%arg0: i32, %arg1: i32, %arg2: memref<256x256xi8, #tpu.memory_space<vmem>>, %arg3: memref<256x128xbf16, #tpu.memory_space<vmem>>, %arg4: memref<1x128xf32, #tpu.memory_space<vmem>>, %arg5: memref<128x128xbf16, #tpu.memory_space<vmem>>, %arg6: memref<256x128xbf16, #tpu.memory_space<vmem>>, %arg7: memref<256x128xf32, #tpu.memory_space<vmem>>) attributes {dimension_semantics = [#tpu.dimension_semantics<parallel>, #tpu.dimension_semantics<arbitrary>], iteration_bounds = array<i64: 1, 1>, scalar_prefetch = 0 : i64, scratch_operands = 1 : i64, tpu.core_type = #tpu.core_type<tc>, window_params = [{transform_indices = @transform_0, window_bounds = array<i64: 256, 256>}, {pipeline_mode = #tpu.pipeline_mode<synchronous>, transform_indices = @transform_1, window_bounds = array<i64: 256, 128>}, {pipeline_mode = #tpu.pipeline_mode<synchronous>, transform_indices = @transform_2, window_bounds = array<i64: 1, 128>}, {pipeline_mode = #tpu.pipeline_mode<synchronous>, transform_indices = @transform_3, window_bounds = array<i64: 128, 128>}, {transform_indices = @transform_4, window_bounds = array<i64: 256, 128>}]} {
    %c0_i32 = arith.constant 0 : i32
    %0 = arith.cmpi eq, %arg1, %c0_i32 : i32
    %1 = arith.extui %0 : i1 to i32
    %c0_i32_0 = arith.constant 0 : i32
    %2 = arith.cmpi ne, %1, %c0_i32_0 : i32
    scf.if %2 {
      %cst_9 = arith.constant 0.000000e+00 : f32
      %17 = vector.broadcast %cst_9 : f32 to vector<256x128xf32>
      %c0_10 = arith.constant 0 : index
      %c0_11 = arith.constant 0 : index
      %18 = vector.load %arg7[%c0_10, %c0_11] : memref<256x128xf32, #tpu.memory_space<vmem>>, vector<256x128xf32>
      tpu.vector_store %arg7[%c0_10, %c0_11], %17 {strides = array<i32>} : memref<256x128xf32, #tpu.memory_space<vmem>>, vector<256x128xf32>,
    } else {
    }
    %c256_i32 = arith.constant 256 : i32
    %3 = arith.muli %arg1, %c256_i32 : i32
    %4 = tpu.assume_multiple %3, 256 : i32
    %c0 = arith.constant 0 : index
    %c0_1 = arith.constant 0 : index
    %5 = vector.load %arg2[%c0, %c0_1] : memref<256x256xi8, #tpu.memory_space<vmem>>, vector<256x256xi8>
    %6 = arith.sitofp %5 : vector<256x256xi8> to vector<256x256xf32>
    %7 = arith.truncf %6 : vector<256x256xf32> to vector<256x256xbf16>
    %c0_2 = arith.constant 0 : index
    %c0_3 = arith.constant 0 : index
    %8 = vector.load %arg7[%c0_2, %c0_3] : memref<256x128xf32, #tpu.memory_space<vmem>>, vector<256x128xf32>
    %9 = arith.index_cast %4 : i32 to index
    %c0_4 = arith.constant 0 : index
    %10 = vector.load %arg3[%9, %c0_4] : memref<256x128xbf16, #tpu.memory_space<vmem>>, vector<256x128xbf16>
    %cst = arith.constant dense<0.000000e+00> : vector<256x128xf32>
    %11 = tpu.matmul %7, %10, %cst {dimension_numbers = #tpu.dot_dimension_numbers<[1], [0], [0], [1], [0, 0, 1, 1], [], []>} : vector<256x256xbf16>, vector<256x128xbf16>, vector<256x128xf32> -> vector<256x128xf32>
    %12 = arith.addf %8, %11 : vector<256x128xf32>
    %c0_5 = arith.constant 0 : index
    %c0_6 = arith.constant 0 : index
    %13 = vector.load %arg7[%c0_5, %c0_6] : memref<256x128xf32, #tpu.memory_space<vmem>>, vector<256x128xf32>
    tpu.vector_store %arg7[%c0_5, %c0_6], %12 {strides = array<i32>} : memref<256x128xf32, #tpu.memory_space<vmem>>, vector<256x128xf32>,
    %c0_i32_7 = arith.constant 0 : i32
    %14 = arith.cmpi eq, %arg1, %c0_i32_7 : i32
    %15 = arith.extui %14 : i1 to i32
    %c0_i32_8 = arith.constant 0 : i32
    %16 = arith.cmpi ne, %15, %c0_i32_8 : i32
    scf.if %16 {
      %c0_9 = arith.constant 0 : index
      %c0_10 = arith.constant 0 : index
      %17 = vector.load %arg7[%c0_9, %c0_10] : memref<256x128xf32, #tpu.memory_space<vmem>>, vector<256x128xf32>
      %c0_11 = arith.constant 0 : index
      %c0_12 = arith.constant 0 : index
      %18 = vector.load %arg4[%c0_11, %c0_12] : memref<1x128xf32, #tpu.memory_space<vmem>>, vector<1x128xf32>
      %19 = vector.broadcast %18 : vector<1x128xf32> to vector<256x128xf32>
      %20 = arith.addf %17, %19 : vector<256x128xf32>
      %cst_13 = arith.constant 0.000000e+00 : f32
      %21 = vector.broadcast %cst_13 : f32 to vector<256x128xf32>
      %22 = arith.maximumf %20, %21 : vector<256x128xf32>
      %23 = arith.truncf %22 : vector<256x128xf32> to vector<256x128xbf16>
      %c0_14 = arith.constant 0 : index
      %c0_15 = arith.constant 0 : index
      %24 = vector.load %arg5[%c0_14, %c0_15] : memref<128x128xbf16, #tpu.memory_space<vmem>>, vector<128x128xbf16>
      %cst_16 = arith.constant dense<0.000000e+00> : vector<256x128xf32>
      %25 = tpu.matmul %23, %24, %cst_16 {dimension_numbers = #tpu.dot_dimension_numbers<[1], [0], [0], [1], [0, 0, 1, 1], [], []>} : vector<256x128xbf16>, vector<128x128xbf16>, vector<256x128xf32> -> vector<256x128xf32>
      %26 = arith.truncf %25 : vector<256x128xf32> to vector<256x128xbf16>
      %c0_17 = arith.constant 0 : index
      %c0_18 = arith.constant 0 : index
      %27 = vector.load %arg6[%c0_17, %c0_18] : memref<256x128xbf16, #tpu.memory_space<vmem>>, vector<256x128xbf16>
      tpu.vector_store %arg6[%c0_17, %c0_18], %26 {strides = array<i32>} : memref<256x128xbf16, #tpu.memory_space<vmem>>, vector<256x128xbf16>,
    } else {
    }
    return
  }
  func.func @transform_0(%arg0: i32, %arg1: i32) -> (i32, i32) {
    %c0_i32 = arith.constant 0 : i32
    return %arg0, %arg1 : i32, i32
  }
  func.func @transform_1(%arg0: i32, %arg1: i32) -> (i32, i32) {
    %c0_i32 = arith.constant 0 : i32
    %c0_i32_0 = arith.constant 0 : i32
    %c0_i32_1 = arith.constant 0 : i32
    return %c0_i32, %c0_i32_0 : i32, i32
  }
  func.func @transform_2(%arg0: i32, %arg1: i32) -> (i32, i32) {
    %c0_i32 = arith.constant 0 : i32
    %c0_i32_0 = arith.constant 0 : i32
    %c0_i32_1 = arith.constant 0 : i32
    return %c0_i32, %c0_i32_0 : i32, i32
  }
  func.func @transform_3(%arg0: i32, %arg1: i32) -> (i32, i32) {
    %c0_i32 = arith.constant 0 : i32
    %c0_i32_0 = arith.constant 0 : i32
    %c0_i32_1 = arith.constant 0 : i32
    return %c0_i32, %c0_i32_0 : i32, i32
  }
  func.func @transform_4(%arg0: i32, %arg1: i32) -> (i32, i32) {
    %c0_i32 = arith.constant 0 : i32
    %c0_i32_0 = arith.constant 0 : i32
    return %arg0, %c0_i32 : i32, i32
  }
}

module attributes {stable_mosaic.version = 11 : i64} {
  func.func @_agg_mid_kernel(%arg0: i32, %arg1: i32, %arg2: memref<256x256xi8, #tpu.memory_space<vmem>>, %arg3: memref<256x128xbf16, #tpu.memory_space<vmem>>, %arg4: memref<1x128xf32, #tpu.memory_space<vmem>>, %arg5: memref<128x32xbf16, #tpu.memory_space<vmem>>, %arg6: memref<256x32xbf16, #tpu.memory_space<vmem>>, %arg7: memref<256x128xf32, #tpu.memory_space<vmem>>) attributes {dimension_semantics = [#tpu.dimension_semantics<parallel>, #tpu.dimension_semantics<arbitrary>], iteration_bounds = array<i64: 1, 1>, scalar_prefetch = 0 : i64, scratch_operands = 1 : i64, tpu.core_type = #tpu.core_type<tc>, window_params = [{transform_indices = @transform_0, window_bounds = array<i64: 256, 256>}, {pipeline_mode = #tpu.pipeline_mode<synchronous>, transform_indices = @transform_1, window_bounds = array<i64: 256, 128>}, {pipeline_mode = #tpu.pipeline_mode<synchronous>, transform_indices = @transform_2, window_bounds = array<i64: 1, 128>}, {pipeline_mode = #tpu.pipeline_mode<synchronous>, transform_indices = @transform_3, window_bounds = array<i64: 128, 32>}, {transform_indices = @transform_4, window_bounds = array<i64: 256, 32>}]} {
    %c0_i32 = arith.constant 0 : i32
    %0 = arith.cmpi eq, %arg1, %c0_i32 : i32
    %1 = arith.extui %0 : i1 to i32
    %c0_i32_0 = arith.constant 0 : i32
    %2 = arith.cmpi ne, %1, %c0_i32_0 : i32
    scf.if %2 {
      %cst_9 = arith.constant 0.000000e+00 : f32
      %17 = vector.broadcast %cst_9 : f32 to vector<256x128xf32>
      %c0_10 = arith.constant 0 : index
      %c0_11 = arith.constant 0 : index
      %18 = vector.load %arg7[%c0_10, %c0_11] : memref<256x128xf32, #tpu.memory_space<vmem>>, vector<256x128xf32>
      tpu.vector_store %arg7[%c0_10, %c0_11], %17 {strides = array<i32>} : memref<256x128xf32, #tpu.memory_space<vmem>>, vector<256x128xf32>,
    } else {
    }
    %c256_i32 = arith.constant 256 : i32
    %3 = arith.muli %arg1, %c256_i32 : i32
    %4 = tpu.assume_multiple %3, 256 : i32
    %c0 = arith.constant 0 : index
    %c0_1 = arith.constant 0 : index
    %5 = vector.load %arg2[%c0, %c0_1] : memref<256x256xi8, #tpu.memory_space<vmem>>, vector<256x256xi8>
    %6 = arith.sitofp %5 : vector<256x256xi8> to vector<256x256xf32>
    %7 = arith.truncf %6 : vector<256x256xf32> to vector<256x256xbf16>
    %c0_2 = arith.constant 0 : index
    %c0_3 = arith.constant 0 : index
    %8 = vector.load %arg7[%c0_2, %c0_3] : memref<256x128xf32, #tpu.memory_space<vmem>>, vector<256x128xf32>
    %9 = arith.index_cast %4 : i32 to index
    %c0_4 = arith.constant 0 : index
    %10 = vector.load %arg3[%9, %c0_4] : memref<256x128xbf16, #tpu.memory_space<vmem>>, vector<256x128xbf16>
    %cst = arith.constant dense<0.000000e+00> : vector<256x128xf32>
    %11 = tpu.matmul %7, %10, %cst {dimension_numbers = #tpu.dot_dimension_numbers<[1], [0], [0], [1], [0, 0, 1, 1], [], []>} : vector<256x256xbf16>, vector<256x128xbf16>, vector<256x128xf32> -> vector<256x128xf32>
    %12 = arith.addf %8, %11 : vector<256x128xf32>
    %c0_5 = arith.constant 0 : index
    %c0_6 = arith.constant 0 : index
    %13 = vector.load %arg7[%c0_5, %c0_6] : memref<256x128xf32, #tpu.memory_space<vmem>>, vector<256x128xf32>
    tpu.vector_store %arg7[%c0_5, %c0_6], %12 {strides = array<i32>} : memref<256x128xf32, #tpu.memory_space<vmem>>, vector<256x128xf32>,
    %c0_i32_7 = arith.constant 0 : i32
    %14 = arith.cmpi eq, %arg1, %c0_i32_7 : i32
    %15 = arith.extui %14 : i1 to i32
    %c0_i32_8 = arith.constant 0 : i32
    %16 = arith.cmpi ne, %15, %c0_i32_8 : i32
    scf.if %16 {
      %c0_9 = arith.constant 0 : index
      %c0_10 = arith.constant 0 : index
      %17 = vector.load %arg7[%c0_9, %c0_10] : memref<256x128xf32, #tpu.memory_space<vmem>>, vector<256x128xf32>
      %c0_11 = arith.constant 0 : index
      %c0_12 = arith.constant 0 : index
      %18 = vector.load %arg4[%c0_11, %c0_12] : memref<1x128xf32, #tpu.memory_space<vmem>>, vector<1x128xf32>
      %19 = vector.broadcast %18 : vector<1x128xf32> to vector<256x128xf32>
      %20 = arith.addf %17, %19 : vector<256x128xf32>
      %cst_13 = arith.constant 0.000000e+00 : f32
      %21 = vector.broadcast %cst_13 : f32 to vector<256x128xf32>
      %22 = arith.maximumf %20, %21 : vector<256x128xf32>
      %23 = arith.truncf %22 : vector<256x128xf32> to vector<256x128xbf16>
      %c0_14 = arith.constant 0 : index
      %c0_15 = arith.constant 0 : index
      %24 = vector.load %arg5[%c0_14, %c0_15] : memref<128x32xbf16, #tpu.memory_space<vmem>>, vector<128x32xbf16>
      %cst_16 = arith.constant dense<0.000000e+00> : vector<256x32xf32>
      %25 = tpu.matmul %23, %24, %cst_16 {dimension_numbers = #tpu.dot_dimension_numbers<[1], [0], [0], [1], [0, 0, 1, 1], [], []>} : vector<256x128xbf16>, vector<128x32xbf16>, vector<256x32xf32> -> vector<256x32xf32>
      %26 = arith.truncf %25 : vector<256x32xf32> to vector<256x32xbf16>
      %c0_17 = arith.constant 0 : index
      %c0_18 = arith.constant 0 : index
      %27 = vector.load %arg6[%c0_17, %c0_18] : memref<256x32xbf16, #tpu.memory_space<vmem>>, vector<256x32xbf16>
      tpu.vector_store %arg6[%c0_17, %c0_18], %26 {strides = array<i32>} : memref<256x32xbf16, #tpu.memory_space<vmem>>, vector<256x32xbf16>,
    } else {
    }
    return
  }
  func.func @transform_0(%arg0: i32, %arg1: i32) -> (i32, i32) {
    %c0_i32 = arith.constant 0 : i32
    return %arg0, %arg1 : i32, i32
  }
  func.func @transform_1(%arg0: i32, %arg1: i32) -> (i32, i32) {
    %c0_i32 = arith.constant 0 : i32
    %c0_i32_0 = arith.constant 0 : i32
    %c0_i32_1 = arith.constant 0 : i32
    return %c0_i32, %c0_i32_0 : i32, i32
  }
  func.func @transform_2(%arg0: i32, %arg1: i32) -> (i32, i32) {
    %c0_i32 = arith.constant 0 : i32
    %c0_i32_0 = arith.constant 0 : i32
    %c0_i32_1 = arith.constant 0 : i32
    return %c0_i32, %c0_i32_0 : i32, i32
  }
  func.func @transform_3(%arg0: i32, %arg1: i32) -> (i32, i32) {
    %c0_i32 = arith.constant 0 : i32
    %c0_i32_0 = arith.constant 0 : i32
    %c0_i32_1 = arith.constant 0 : i32
    return %c0_i32, %c0_i32_0 : i32, i32
  }
  func.func @transform_4(%arg0: i32, %arg1: i32) -> (i32, i32) {
    %c0_i32 = arith.constant 0 : i32
    %c0_i32_0 = arith.constant 0 : i32
    return %arg0, %c0_i32 : i32, i32
  }
}

</mosaic_0001>

<bundles_post_ra>
// kernel: basic_gnn_forward.7
= control target key start
LH: loop header
LB: loop body
LE: loop exit
PB: predicated region body
PF: predicated region fallthrough
CT: control target
= control target key end

     0   :  { %s1146_s0 = inlined_call_operand.vmem [shape: s8[256,256], index: 0, kind: input, shape index: {}]   ;;  %s1147_s1 = inlined_call_operand.vmem [shape: bf16[256,32], index: 1, kind: input, shape index: {}]   ;;  %s1148_s2 = inlined_call_operand.vmem [shape: f32[1,32], index: 2, kind: input, shape index: {}]   ;;  %s1149_s3 = inlined_call_operand.vmem [shape: bf16[2,256], index: 3, kind: input, shape index: {}]   ;;  %s1150_s4 = inlined_call_operand.hbm [shape: f32[1,2,32], index: 4, kind: output, shape index: {}]  }
   0x1   :  { %v850_v0 = vld [vmem:[%s1147_s1 + $0x38] sm:$0xff]  ;;  %v849_v2 = vld [vmem:[%s1147_s1 + $0x30] sm:$0xff]  ;;  %v848_v4 = vld [vmem:[%s1147_s1 + $0x28] sm:$0xff] }
   0x2   :  { %v858_v1 = vld [vmem:[%s1147_s1 + $0x78] sm:$0xff]  ;;  %396 = vmatpush.bf16.msra.mxu0 %v850_v0  ;;  %859 = vmatpush.bf16.msra.mxu2 %v850_v0  ;;  %v857_v3 = vld [vmem:[%s1147_s1 + $0x70] sm:$0xff]  ;;  %v856_v5 = vld [vmem:[%s1147_s1 + $0x68] sm:$0xff] }
   0x3   :  { %485 = vmatpush.bf16.msra.mxu1 %v858_v1  ;;  %867 = vmatpush.bf16.msra.mxu3 %v858_v1 }
   0x6   :  { %397 = vmatpush.bf16.msra.mxu0 %v849_v2  ;;  %860 = vmatpush.bf16.msra.mxu2 %v849_v2 }
   0x7   :  { %486 = vmatpush.bf16.msra.mxu1 %v857_v3  ;;  %868 = vmatpush.bf16.msra.mxu3 %v857_v3 }
   0x8   :  { %9 = vsyncpa [#allocation4], 0  ;;  %v847_v6 = vld [vmem:[%s1147_s1 + $0x20] sm:$0xff]  ;;  %v846_v8 = vld [vmem:[%s1147_s1 + $0x18] sm:$0xff]  ;;  %vm22_vm0 = vcmask 261120   ;;  %s768_s5 = sshll.u32 %s1150_s4, 4  ;;  %s769_s5 = int_to_ptr.hbm [resolvable:$true] %s768_s5 }
   0x9   :  { %v855_v7 = vld [vmem:[%s1147_s1 + $0x60] sm:$0xff]  ;;  %v854_v9 = vld [vmem:[%s1147_s1 + $0x58] sm:$0xff]  ;;  %v845_v10 = vld [vmem:[%s1147_s1 + $0x10] sm:$0xff]  ;;  %vm759_vm1 = vcmask 254976  }
   0xa   :  { %398 = vmatpush.bf16.msra.mxu0 %v848_v4  ;;  %861 = vmatpush.bf16.msra.mxu2 %v848_v4  ;;  %v56_v11 = vld [vmem:[%s1146_s0] sm:$0xff]  ;;  %v853_v13 = vld [vmem:[%s1147_s1 + $0x50] sm:$0xff]  ;;  %v57_v14 = vld [vmem:[%s1146_s0 + $0x8] sm:$0xff] }
   0xb   :  { %487 = vmatpush.bf16.msra.mxu1 %v856_v5  ;;  %869 = vmatpush.bf16.msra.mxu3 %v856_v5  ;;  %v970_v12 = vld [vmem:[%s1146_s0 + $0x40] sm:$0xff]  ;;  %v981_v15 = vld [vmem:[%s1146_s0 + $0x48] sm:$0xff]  ;;  %v72_v16 = vunpack.c.0.s8 %v56_v11  ;;  %v74_v17 = vunpack.c.1.s8 %v56_v11  ;;  %v73_v21 = vunpack.c.0.s8 %v57_v14  ;;  %v75_v22 = vunpack.c.1.s8 %v57_v14  ;;  %v66_v40 = vld [vmem:[%s1146_s0 + $0x50] sm:$0xff] }
   0xc   :  { %v108_v18 = vunpack.c.2.s8 %v970_v12  ;;  %v110_v19 = vunpack.c.3.s8 %v970_v12  ;;  %v844_v20 = vld [vmem:[%s1147_s1 + $0x8] sm:$0xff]  ;;  %v109_v23 = vunpack.c.2.s8 %v981_v15  ;;  %v111_v24 = vunpack.c.3.s8 %v981_v15  ;;  %v843_v30 = vld [vmem:[%s1147_s1] sm:$0xff]  ;;  %v67_v41 = vld [vmem:[%s1146_s0 + $0x58] sm:$0xff] }
   0xd   :  { %v852_v25 = vld [vmem:[%s1147_s1 + $0x48] sm:$0xff]  ;;  %v136_v26 = vcvt.s32.f32 %v72_v16  ;;  %v138_v27 = vcvt.s32.f32 %v74_v17  ;;  %v137_v31 = vcvt.s32.f32 %v73_v21  ;;  %v139_v32 = vcvt.s32.f32 %v75_v22  ;;  %v851_v35 = vld [vmem:[%s1147_s1 + $0x40] sm:$0xff]  ;;  %v58_v62 = vld [vmem:[%s1146_s0 + $0x10] sm:$0xff] }
   0xe   :  { %399 = vmatpush.bf16.msra.mxu0 %v847_v6  ;;  %862 = vmatpush.bf16.msra.mxu2 %v847_v6  ;;  %v172_v28 = vcvt.s32.f32 %v108_v18  ;;  %v174_v29 = vcvt.s32.f32 %v110_v19  ;;  %v173_v33 = vcvt.s32.f32 %v109_v23  ;;  %v175_v34 = vcvt.s32.f32 %v111_v24  ;;  %v59_v63 = vld [vmem:[%s1146_s0 + $0x18] sm:$0xff]  ;;  %v68_v22 = vld [vmem:[%s1146_s0 + $0x60] sm:$0xff]  ;;  %v69_v23 = vld [vmem:[%s1146_s0 + $0x68] sm:$0xff] }
   0xf   :  { %488 = vmatpush.bf16.msra.mxu1 %v855_v7  ;;  %870 = vmatpush.bf16.msra.mxu3 %v855_v7  ;;  %v200_v36 = vpack.c.bf16 %v138_v27, %v136_v26  ;;  %v201_v38 = vpack.c.bf16 %v139_v32, %v137_v31  ;;  %v76_v42 = vunpack.c.2.s8 %v56_v11  ;;  %v78_v43 = vunpack.c.3.s8 %v56_v11 }
  0x10   :  { %v218_v37 = vpack.c.bf16 %v174_v29, %v172_v28  ;;  %v219_v39 = vpack.c.bf16 %v175_v34, %v173_v33  ;;  %v112_v44 = vunpack.c.0.s8 %v66_v40  ;;  %v114_v45 = vunpack.c.1.s8 %v66_v40 }
  0x11   :  { %v77_v46 = vunpack.c.2.s8 %v57_v14  ;;  %v79_v47 = vunpack.c.3.s8 %v57_v14  ;;  %v113_v48 = vunpack.c.0.s8 %v67_v41  ;;  %v115_v49 = vunpack.c.1.s8 %v67_v41 }
  0x12   :  { %400 = vmatpush.bf16.msra.mxu0 %v846_v8  ;;  %863 = vmatpush.bf16.msra.mxu2 %v846_v8  ;;  %v140_v50 = vcvt.s32.f32 %v76_v42  ;;  %v142_v51 = vcvt.s32.f32 %v78_v43  ;;  %v176_v52 = vcvt.s32.f32 %v112_v44  ;;  %v178_v53 = vcvt.s32.f32 %v114_v45  ;;  %v60_v44 = vld [vmem:[%s1146_s0 + $0x20] sm:$0xff]  ;;  %v61_v45 = vld [vmem:[%s1146_s0 + $0x28] sm:$0xff] }
  0x13   :  { %489 = vmatpush.bf16.msra.mxu1 %v854_v9  ;;  %871 = vmatpush.bf16.msra.mxu3 %v854_v9  ;;  %v141_v54 = vcvt.s32.f32 %v77_v46  ;;  %v143_v55 = vcvt.s32.f32 %v79_v47  ;;  %v177_v56 = vcvt.s32.f32 %v113_v48  ;;  %v179_v57 = vcvt.s32.f32 %v115_v49 }
  0x14   :  { %v202_v58 = vpack.c.bf16 %v142_v51, %v140_v50  ;;  %v220_v59 = vpack.c.bf16 %v178_v53, %v176_v52  ;;  %v80_v0 = vunpack.c.0.s8 %v58_v62  ;;  %v82_v1 = vunpack.c.1.s8 %v58_v62 }
  0x15   :  { %v203_v60 = vpack.c.bf16 %v143_v55, %v141_v54  ;;  %v221_v61 = vpack.c.bf16 %v179_v57, %v177_v56  ;;  %v116_v2 = vunpack.c.2.s8 %v66_v40  ;;  %v118_v3 = vunpack.c.3.s8 %v66_v40 }
  0x16   :  { %401 = vmatpush.bf16.msra.mxu0 %v845_v10  ;;  %864 = vmatpush.bf16.msra.mxu2 %v845_v10  ;;  %v81_v4 = vunpack.c.0.s8 %v59_v63  ;;  %v83_v5 = vunpack.c.1.s8 %v59_v63  ;;  %v117_v6 = vunpack.c.2.s8 %v67_v41  ;;  %v119_v7 = vunpack.c.3.s8 %v67_v41 }
  0x17   :  { %490 = vmatpush.bf16.msra.mxu1 %v853_v13  ;;  %872 = vmatpush.bf16.msra.mxu3 %v853_v13  ;;  %v144_v8 = vcvt.s32.f32 %v80_v0  ;;  %v146_v9 = vcvt.s32.f32 %v82_v1  ;;  %v180_v10 = vcvt.s32.f32 %v116_v2  ;;  %v182_v11 = vcvt.s32.f32 %v118_v3  ;;  %v70_v2 = vld [vmem:[%s1146_s0 + $0x70] sm:$0xff]  ;;  %v71_v3 = vld [vmem:[%s1146_s0 + $0x78] sm:$0xff] }
  0x18   :  { %v145_v13 = vcvt.s32.f32 %v81_v4  ;;  %v147_v14 = vcvt.s32.f32 %v83_v5  ;;  %v181_v16 = vcvt.s32.f32 %v117_v6  ;;  %v183_v17 = vcvt.s32.f32 %v119_v7 }
  0x19   :  { %v204_v18 = vpack.c.bf16 %v146_v9, %v144_v8  ;;  %v222_v19 = vpack.c.bf16 %v182_v11, %v180_v10  ;;  %v84_v24 = vunpack.c.2.s8 %v58_v62  ;;  %v120_v26 = vunpack.c.0.s8 %v68_v22 }
  0x1a   :  { %402 = vmatpush.bf16.msra.mxu0 %v844_v20  ;;  %865 = vmatpush.bf16.msra.mxu2 %v844_v20  ;;  %v205_v20 = vpack.c.bf16 %v147_v14, %v145_v13  ;;  %v223_v21 = vpack.c.bf16 %v183_v17, %v181_v16  ;;  %v122_v27 = vunpack.c.1.s8 %v68_v22  ;;  %v85_v28 = vunpack.c.2.s8 %v59_v63 }
  0x1b   :  { %491 = vmatpush.bf16.msra.mxu1 %v852_v25  ;;  %873 = vmatpush.bf16.msra.mxu3 %v852_v25  ;;  %v86_v25 = vunpack.c.3.s8 %v58_v62  ;;  %v87_v29 = vunpack.c.3.s8 %v59_v63  ;;  %v123_v31 = vunpack.c.1.s8 %v69_v23  ;;  %v148_v32 = vcvt.s32.f32 %v84_v24 }
  0x1c   :  { %v184_v34 = vcvt.s32.f32 %v120_v26  ;;  %v88_v46 = vunpack.c.0.s8 %v60_v44  ;;  %v90_v47 = vunpack.c.1.s8 %v60_v44  ;;  %v124_v48 = vunpack.c.2.s8 %v68_v22  ;;  %v62_v26 = vld [vmem:[%s1146_s0 + $0x30] sm:$0xff] }
  0x1d   :  { %v150_v33 = vcvt.s32.f32 %v86_v25  ;;  %v126_v49 = vunpack.c.3.s8 %v68_v22  ;;  %v89_v50 = vunpack.c.0.s8 %v61_v45  ;;  %v91_v51 = vunpack.c.1.s8 %v61_v45 }
  0x1e   :  { %403 = vmatpush.bf16.msra.mxu0 %v843_v30  ;;  %866 = vmatpush.bf16.msra.mxu2 %v843_v30  ;;  %v121_v30 = vunpack.c.0.s8 %v69_v23  ;;  %v125_v52 = vunpack.c.2.s8 %v69_v23  ;;  %v127_v53 = vunpack.c.3.s8 %v69_v23  ;;  %v152_v54 = vcvt.s32.f32 %v88_v46 }
  0x1f   :  { %492 = vmatpush.bf16.msra.mxu1 %v851_v35  ;;  %874 = vmatpush.bf16.msra.mxu3 %v851_v35  ;;  %v186_v35 = vcvt.s32.f32 %v122_v27  ;;  %v206_v40 = vpack.c.bf16 %v150_v33, %v148_v32  ;;  %v154_v55 = vcvt.s32.f32 %v90_v47  ;;  %v188_v56 = vcvt.s32.f32 %v124_v48  ;;  %v63_v27 = vld [vmem:[%s1146_s0 + $0x38] sm:$0xff] }
  0x20   :  { %v190_v57 = vcvt.s32.f32 %v126_v49  ;;  %v92_v4 = vunpack.c.2.s8 %v60_v44  ;;  %v94_v5 = vunpack.c.3.s8 %v60_v44  ;;  %v128_v6 = vunpack.c.0.s8 %v70_v2 }
  0x21   :  { %404 = vmatmul.bf16.vlgmr.msra.gmra.mxu0 %v200_v36  ;;  %449 = vmatmul.bf16.vlgmr.msra.gmra.mxu2 %v218_v37  ;;  %v149_v36 = vcvt.s32.f32 %v85_v28  ;;  %v151_v37 = vcvt.s32.f32 %v87_v29  ;;  %v224_v41 = vpack.c.bf16 %v186_v35, %v184_v34  ;;  %v208_v62 = vpack.c.bf16 %v154_v55, %v152_v54 }
  0x22   :  { %493 = vmatmul.bf16.vlgmr.msra.gmra.mxu1 %v201_v38  ;;  %538 = vmatmul.bf16.vlgmr.msra.gmra.mxu3 %v219_v39  ;;  %v185_v38 = vcvt.s32.f32 %v121_v30  ;;  %v187_v39 = vcvt.s32.f32 %v123_v31  ;;  %v226_v63 = vpack.c.bf16 %v190_v57, %v188_v56  ;;  %v130_v7 = vunpack.c.1.s8 %v70_v2 }
  0x23   :  { %v207_v42 = vpack.c.bf16 %v151_v37, %v149_v36  ;;  %v93_v8 = vunpack.c.2.s8 %v61_v45  ;;  %v95_v9 = vunpack.c.3.s8 %v61_v45  ;;  %v129_v10 = vunpack.c.0.s8 %v71_v3 }
  0x24   :  { %v225_v43 = vpack.c.bf16 %v187_v39, %v185_v38  ;;  %v131_v11 = vunpack.c.1.s8 %v71_v3  ;;  %v156_v13 = vcvt.s32.f32 %v92_v4  ;;  %v158_v14 = vcvt.s32.f32 %v94_v5 }
  0x25   :  { %v192_v16 = vcvt.s32.f32 %v128_v6  ;;  %v194_v17 = vcvt.s32.f32 %v130_v7  ;;  %v96_v28 = vunpack.c.0.s8 %v62_v26  ;;  %v98_v29 = vunpack.c.1.s8 %v62_v26 }
  0x26   :  { %v210_v22 = vpack.c.bf16 %v158_v14, %v156_v13  ;;  %v132_v30 = vunpack.c.2.s8 %v70_v2  ;;  %v134_v31 = vunpack.c.3.s8 %v70_v2  ;;  %v97_v32 = vunpack.c.0.s8 %v63_v27 }
  0x27   :  { %v228_v23 = vpack.c.bf16 %v194_v17, %v192_v16  ;;  %v99_v33 = vunpack.c.1.s8 %v63_v27  ;;  %v133_v34 = vunpack.c.2.s8 %v71_v3  ;;  %v135_v35 = vunpack.c.3.s8 %v71_v3 }
  0x28   :  { %v160_v36 = vcvt.s32.f32 %v96_v28  ;;  %v162_v37 = vcvt.s32.f32 %v98_v29  ;;  %v196_v38 = vcvt.s32.f32 %v132_v30  ;;  %v198_v39 = vcvt.s32.f32 %v134_v31 }
  0x29   :  { %v904_v44 = vmov 0.0   ;;  %v100_v49 = vunpack.c.2.s8 %v62_v26 }
  0x2a   :  { %23 = vst.msk [vmem:[#allocation2] sm:$0xff] %vm22_vm0, %v904_v44  ;;  %v212_v45 = vpack.c.bf16 %v162_v37, %v160_v36  ;;  %v230_v46 = vpack.c.bf16 %v198_v39, %v196_v38 }
  0x2b   :  { %24 = vst.msk [vmem:[#allocation2 + $0x8] sm:$0xff] %vm22_vm0, %v904_v44 }
  0x2c   :  { %25 = vst.msk [vmem:[#allocation2 + $0x10] sm:$0xff] %vm22_vm0, %v904_v44 }
  0x2d   :  { %26 = vst.msk [vmem:[#allocation2 + $0x18] sm:$0xff] %vm22_vm0, %v904_v44 }
  0x2e   :  { %27 = vst.msk [vmem:[#allocation2 + $0x20] sm:$0xff] %vm22_vm0, %v904_v44 }
  0x2f   :  { %28 = vst.msk [vmem:[#allocation2 + $0x28] sm:$0xff] %vm22_vm0, %v904_v44 }
  0x30   :  { %29 = vst.msk [vmem:[#allocation2 + $0x30] sm:$0xff] %vm22_vm0, %v904_v44 }
  0x31   :  { %409 = vmatmul.bf16.gmra.mxu0 %v202_v58  ;;  %454 = vmatmul.bf16.gmra.mxu2 %v220_v59  ;;  %v153_v58 = vcvt.s32.f32 %v89_v50  ;;  %v155_v59 = vcvt.s32.f32 %v91_v51  ;;  %30 = vst.msk [vmem:[#allocation2 + $0x38] sm:$0xff] %vm22_vm0, %v904_v44  ;;  %v102_v50 = vunpack.c.3.s8 %v62_v26  ;;  %v101_v51 = vunpack.c.2.s8 %v63_v27 }
  0x32   :  { %498 = vmatmul.bf16.gmra.mxu1 %v203_v60  ;;  %543 = vmatmul.bf16.gmra.mxu3 %v221_v61  ;;  %v189_v60 = vcvt.s32.f32 %v125_v52  ;;  %v191_v61 = vcvt.s32.f32 %v127_v53  ;;  %31 = vst.msk [vmem:[#allocation2 + $0x40] sm:$0xff] %vm22_vm0, %v904_v44  ;;  %v103_v52 = vunpack.c.3.s8 %v63_v27  ;;  %v164_v53 = vcvt.s32.f32 %v100_v49  ;;  %v233_v14 = vld [vmem:[#allocation2 + $0x8] sm:$0xff] }
  0x33   :  { %v209_v0 = vpack.c.bf16 %v155_v59, %v153_v58  ;;  %32 = vst.msk [vmem:[#allocation2 + $0x48] sm:$0xff] %vm22_vm0, %v904_v44  ;;  %v166_v54 = vcvt.s32.f32 %v102_v50  ;;  %v165_v55 = vcvt.s32.f32 %v101_v51  ;;  %v104_v59 = vunpack.c.0.s8 %v970_v12 }
  0x34   :  { %v227_v1 = vpack.c.bf16 %v191_v61, %v189_v60  ;;  %33 = vst.msk [vmem:[#allocation2 + $0x50] sm:$0xff] %vm22_vm0, %v904_v44  ;;  %v167_v56 = vcvt.s32.f32 %v103_v52  ;;  %v106_v60 = vunpack.c.1.s8 %v970_v12  ;;  %v105_v61 = vunpack.c.0.s8 %v981_v15  ;;  %v232_v12 = vld [vmem:[#allocation2] sm:$0xff] }
  0x35   :  { %34 = vst.msk [vmem:[#allocation2 + $0x58] sm:$0xff] %vm22_vm0, %v904_v44  ;;  %v214_v57 = vpack.c.bf16 %v166_v54, %v164_v53 }
  0x36   :  { %35 = vst.msk [vmem:[#allocation2 + $0x60] sm:$0xff] %vm22_vm0, %v904_v44  ;;  %v215_v58 = vpack.c.bf16 %v167_v56, %v165_v55  ;;  %v237_v55 = vld [vmem:[#allocation2 + $0x28] sm:$0xff] }
  0x37   :  { %36 = vst.msk [vmem:[#allocation2 + $0x68] sm:$0xff] %vm22_vm0, %v904_v44 }
  0x38   :  { %37 = vst.msk [vmem:[#allocation2 + $0x70] sm:$0xff] %vm22_vm0, %v904_v44 }
  0x39   :  { %38 = vst.msk [vmem:[#allocation2 + $0x78] sm:$0xff] %vm22_vm0, %v904_v44 }
  0x3a   :  { %39 = vst.msk [vmem:[#allocation2 + $0x80] sm:$0xff] %vm22_vm0, %v904_v44 }
  0x3b   :  { %40 = vst.msk [vmem:[#allocation2 + $0x88] sm:$0xff] %vm22_vm0, %v904_v44 }
  0x3c   :  { %41 = vst.msk [vmem:[#allocation2 + $0x90] sm:$0xff] %vm22_vm0, %v904_v44 }
  0x3d   :  { %42 = vst.msk [vmem:[#allocation2 + $0x98] sm:$0xff] %vm22_vm0, %v904_v44 }
  0x3e   :  { %43 = vst.msk [vmem:[#allocation2 + $0xa0] sm:$0xff] %vm22_vm0, %v904_v44 }
  0x3f   :  { %44 = vst.msk [vmem:[#allocation2 + $0xa8] sm:$0xff] %vm22_vm0, %v904_v44 }
  0x40   :  { %45 = vst.msk [vmem:[#allocation2 + $0xb0] sm:$0xff] %vm22_vm0, %v904_v44 }
  0x41   :  { %414 = vmatmul.bf16.gmra.mxu0 %v204_v18  ;;  %459 = vmatmul.bf16.gmra.mxu2 %v222_v19  ;;  %v157_v18 = vcvt.s32.f32 %v93_v8  ;;  %v159_v19 = vcvt.s32.f32 %v95_v9  ;;  %46 = vst.msk [vmem:[#allocation2 + $0xb8] sm:$0xff] %vm22_vm0, %v904_v44 }
  0x42   :  { %503 = vmatmul.bf16.gmra.mxu1 %v205_v20  ;;  %548 = vmatmul.bf16.gmra.mxu3 %v223_v21  ;;  %v193_v20 = vcvt.s32.f32 %v129_v10  ;;  %v195_v21 = vcvt.s32.f32 %v131_v11  ;;  %47 = vst.msk [vmem:[#allocation2 + $0xc0] sm:$0xff] %vm22_vm0, %v904_v44 }
  0x43   :  { %v211_v24 = vpack.c.bf16 %v159_v19, %v157_v18  ;;  %48 = vst.msk [vmem:[#allocation2 + $0xc8] sm:$0xff] %vm22_vm0, %v904_v44  ;;  %v250_v9 = vld [vmem:[#allocation2 + $0x90] sm:$0xff] }
  0x44   :  { %v229_v25 = vpack.c.bf16 %v195_v21, %v193_v20  ;;  %49 = vst.msk [vmem:[#allocation2 + $0xd0] sm:$0xff] %vm22_vm0, %v904_v44  ;;  %v251_v21 = vld [vmem:[#allocation2 + $0x98] sm:$0xff] }
  0x45   :  { %50 = vst.msk [vmem:[#allocation2 + $0xd8] sm:$0xff] %vm22_vm0, %v904_v44  ;;  %v252_v31 = vld [vmem:[#allocation2 + $0xa0] sm:$0xff] }
  0x46   :  { %51 = vst.msk [vmem:[#allocation2 + $0xe0] sm:$0xff] %vm22_vm0, %v904_v44 }
  0x47   :  { %52 = vst.msk [vmem:[#allocation2 + $0xe8] sm:$0xff] %vm22_vm0, %v904_v44  ;;  %v254_v51 = vld [vmem:[#allocation2 + $0xb0] sm:$0xff] }
  0x48   :  { %53 = vst.msk [vmem:[#allocation2 + $0xf0] sm:$0xff] %vm22_vm0, %v904_v44 }
  0x49   :  { %54 = vst.msk [vmem:[#allocation2 + $0xf8] sm:$0xff] %vm22_vm0, %v904_v44 }
  0x51   :  { %419 = vmatmul.bf16.gmra.mxu0 %v206_v40  ;;  %464 = vmatmul.bf16.gmra.mxu2 %v224_v41  ;;  %v161_v40 = vcvt.s32.f32 %v97_v32  ;;  %v163_v41 = vcvt.s32.f32 %v99_v33 }
  0x52   :  { %508 = vmatmul.bf16.gmra.mxu1 %v207_v42  ;;  %553 = vmatmul.bf16.gmra.mxu3 %v225_v43  ;;  %v197_v42 = vcvt.s32.f32 %v133_v34  ;;  %v199_v43 = vcvt.s32.f32 %v135_v35  ;;  %v235_v35 = vld [vmem:[#allocation2 + $0x18] sm:$0xff] }
  0x53   :  { %v213_v47 = vpack.c.bf16 %v163_v41, %v161_v40  ;;  %v253_v41 = vld [vmem:[#allocation2 + $0xa8] sm:$0xff] }
  0x54   :  { %v231_v48 = vpack.c.bf16 %v199_v43, %v197_v42 }
  0x61   :  { %424 = vmatmul.bf16.gmra.mxu0 %v208_v62  ;;  %469 = vmatmul.bf16.gmra.mxu2 %v226_v63  ;;  %v107_v62 = vunpack.c.1.s8 %v981_v15  ;;  %v168_v63 = vcvt.s32.f32 %v104_v59 }
  0x62   :  { %513 = vmatmul.bf16.gmra.mxu1 %v209_v0  ;;  %558 = vmatmul.bf16.gmra.mxu3 %v227_v1  ;;  %v170_v0 = vcvt.s32.f32 %v106_v60  ;;  %v169_v1 = vcvt.s32.f32 %v105_v61  ;;  %v255_v61 = vld [vmem:[#allocation2 + $0xb8] sm:$0xff] }
  0x63   :  { %v171_v2 = vcvt.s32.f32 %v107_v62 }
  0x64   :  { %v216_v3 = vpack.c.bf16 %v170_v0, %v168_v63 }
  0x65   :  { %v217_v5 = vpack.c.bf16 %v171_v2, %v169_v1  ;;  %v238_v1 = vld [vmem:[#allocation2 + $0x30] sm:$0xff] }
  0x71   :  { %429 = vmatmul.bf16.gmra.mxu0 %v210_v22  ;;  %474 = vmatmul.bf16.gmra.mxu2 %v228_v23 }
  0x72   :  { %518 = vmatmul.bf16.gmra.mxu1 %v211_v24  ;;  %563 = vmatmul.bf16.gmra.mxu3 %v229_v25  ;;  %v234_v25 = vld [vmem:[#allocation2 + $0x10] sm:$0xff] }
  0x81   :  { %434 = vmatmul.bf16.gmra.mxu0 %v212_v45  ;;  %479 = vmatmul.bf16.gmra.mxu2 %v230_v46  ;;  %v236_v45 = vld [vmem:[#allocation2 + $0x20] sm:$0xff] }
  0x82   :  { %523 = vmatmul.bf16.gmra.mxu1 %v213_v47  ;;  %568 = vmatmul.bf16.gmra.mxu3 %v231_v48 }
  0x91   :  { %439 = vmatmul.bf16.gmra.mxu0 %v214_v57 }
  0x92   :  { %528 = vmatmul.bf16.gmra.mxu1 %v215_v58 }
  0x9e   :  { %v405_v4 = vpop.f32.mrf.mxu0 }
  0x9f   :  { %v494_v6 = vpop.f32.mrf.mxu1 }
  0xa0   :  { %v495_v7 = vadd.f32 %v494_v6, %v405_v4  ;;  %v256_v6 = vld [vmem:[#allocation2 + $0xc0] sm:$0xff] }
  0xa1   :  { %444 = vmatmul.bf16.gmra.mxu0 %v216_v3 }
  0xa2   :  { %v574_v8 = vadd.f32 %v495_v7, %v232_v12  ;;  %533 = vmatmul.bf16.gmra.mxu1 %v217_v5 }
  0xa4   :  { %607 = vst.msk [vmem:[#allocation2] sm:$0xff] %vm22_vm0, %v574_v8  ;;  %v450_v15 = vpop.f32.mrf.mxu2 }
  0xa5   :  { %v539_v10 = vpop.f32.mrf.mxu3 }
  0xa6   :  { %v540_v11 = vadd.f32 %v539_v10, %v450_v15  ;;  %v407_v13 = vpop.f32.mrf.mxu0 }
  0xa7   :  { %v496_v16 = vpop.f32.mrf.mxu1 }
  0xa8   :  { %v592_v17 = vadd.f32 %v540_v11, %v250_v9  ;;  %v497_v18 = vadd.f32 %v496_v16, %v407_v13  ;;  %v239_v9 = vld [vmem:[#allocation2 + $0x38] sm:$0xff] }
  0xaa   :  { %625 = vst.msk [vmem:[#allocation2 + $0x90] sm:$0xff] %vm22_vm0, %v592_v17  ;;  %v575_v19 = vadd.f32 %v497_v18, %v233_v14  ;;  %v257_v17 = vld [vmem:[#allocation2 + $0xc8] sm:$0xff] }
  0xac   :  { %608 = vst.msk [vmem:[#allocation2 + $0x8] sm:$0xff] %vm22_vm0, %v575_v19  ;;  %v452_v20 = vpop.f32.mrf.mxu2 }
  0xad   :  { %v541_v22 = vpop.f32.mrf.mxu3 }
  0xae   :  { %v542_v23 = vadd.f32 %v541_v22, %v452_v20  ;;  %v410_v24 = vpop.f32.mrf.mxu0 }
  0xaf   :  { %v499_v26 = vpop.f32.mrf.mxu1 }
  0xb0   :  { %v593_v27 = vadd.f32 %v542_v23, %v251_v21  ;;  %v500_v28 = vadd.f32 %v499_v26, %v410_v24  ;;  %v240_v21 = vld [vmem:[#allocation2 + $0x40] sm:$0xff] }
  0xb2   :  { %626 = vst.msk [vmem:[#allocation2 + $0x98] sm:$0xff] %vm22_vm0, %v593_v27  ;;  %v576_v29 = vadd.f32 %v500_v28, %v234_v25  ;;  %v258_v27 = vld [vmem:[#allocation2 + $0xd0] sm:$0xff] }
  0xb4   :  { %609 = vst.msk [vmem:[#allocation2 + $0x10] sm:$0xff] %vm22_vm0, %v576_v29  ;;  %v455_v30 = vpop.f32.mrf.mxu2 }
  0xb5   :  { %v544_v32 = vpop.f32.mrf.mxu3 }
  0xb6   :  { %v545_v33 = vadd.f32 %v544_v32, %v455_v30  ;;  %v412_v34 = vpop.f32.mrf.mxu0 }
  0xb7   :  { %v501_v36 = vpop.f32.mrf.mxu1 }
  0xb8   :  { %v594_v37 = vadd.f32 %v545_v33, %v252_v31  ;;  %v502_v38 = vadd.f32 %v501_v36, %v412_v34  ;;  %v241_v31 = vld [vmem:[#allocation2 + $0x48] sm:$0xff] }
  0xba   :  { %627 = vst.msk [vmem:[#allocation2 + $0xa0] sm:$0xff] %vm22_vm0, %v594_v37  ;;  %v577_v39 = vadd.f32 %v502_v38, %v235_v35  ;;  %v259_v37 = vld [vmem:[#allocation2 + $0xd8] sm:$0xff] }
  0xbc   :  { %610 = vst.msk [vmem:[#allocation2 + $0x18] sm:$0xff] %vm22_vm0, %v577_v39  ;;  %v457_v40 = vpop.f32.mrf.mxu2 }
  0xbd   :  { %v546_v42 = vpop.f32.mrf.mxu3 }
  0xbe   :  { %v547_v43 = vadd.f32 %v546_v42, %v457_v40  ;;  %v415_v44 = vpop.f32.mrf.mxu0 }
  0xbf   :  { %v504_v46 = vpop.f32.mrf.mxu1 }
  0xc0   :  { %v595_v47 = vadd.f32 %v547_v43, %v253_v41  ;;  %v505_v48 = vadd.f32 %v504_v46, %v415_v44  ;;  %v242_v41 = vld [vmem:[#allocation2 + $0x50] sm:$0xff] }
  0xc2   :  { %628 = vst.msk [vmem:[#allocation2 + $0xa8] sm:$0xff] %vm22_vm0, %v595_v47  ;;  %v578_v49 = vadd.f32 %v505_v48, %v236_v45  ;;  %v260_v47 = vld [vmem:[#allocation2 + $0xe0] sm:$0xff] }
  0xc4   :  { %611 = vst.msk [vmem:[#allocation2 + $0x20] sm:$0xff] %vm22_vm0, %v578_v49  ;;  %v460_v50 = vpop.f32.mrf.mxu2 }
  0xc5   :  { %v549_v52 = vpop.f32.mrf.mxu3 }
  0xc6   :  { %v550_v53 = vadd.f32 %v549_v52, %v460_v50  ;;  %v417_v54 = vpop.f32.mrf.mxu0 }
  0xc7   :  { %v506_v56 = vpop.f32.mrf.mxu1 }
  0xc8   :  { %v596_v57 = vadd.f32 %v550_v53, %v254_v51  ;;  %v507_v58 = vadd.f32 %v506_v56, %v417_v54  ;;  %v243_v51 = vld [vmem:[#allocation2 + $0x58] sm:$0xff] }
  0xca   :  { %629 = vst.msk [vmem:[#allocation2 + $0xb0] sm:$0xff] %vm22_vm0, %v596_v57  ;;  %v579_v59 = vadd.f32 %v507_v58, %v237_v55  ;;  %v261_v57 = vld [vmem:[#allocation2 + $0xe8] sm:$0xff] }
  0xcc   :  { %612 = vst.msk [vmem:[#allocation2 + $0x28] sm:$0xff] %vm22_vm0, %v579_v59  ;;  %v462_v60 = vpop.f32.mrf.mxu2 }
  0xcd   :  { %v551_v62 = vpop.f32.mrf.mxu3 }
  0xce   :  { %v552_v63 = vadd.f32 %v551_v62, %v462_v60  ;;  %v420_v0 = vpop.f32.mrf.mxu0 }
  0xcf   :  { %v509_v2 = vpop.f32.mrf.mxu1 }
  0xd0   :  { %v597_v3 = vadd.f32 %v552_v63, %v255_v61  ;;  %v510_v4 = vadd.f32 %v509_v2, %v420_v0  ;;  %v244_v61 = vld [vmem:[#allocation2 + $0x60] sm:$0xff] }
  0xd2   :  { %630 = vst.msk [vmem:[#allocation2 + $0xb8] sm:$0xff] %vm22_vm0, %v597_v3  ;;  %v580_v5 = vadd.f32 %v510_v4, %v238_v1  ;;  %v262_v3 = vld [vmem:[#allocation2 + $0xf0] sm:$0xff] }
  0xd4   :  { %613 = vst.msk [vmem:[#allocation2 + $0x30] sm:$0xff] %vm22_vm0, %v580_v5  ;;  %v465_v12 = vpop.f32.mrf.mxu2 }
  0xd5   :  { %v554_v7 = vpop.f32.mrf.mxu3 }
  0xd6   :  { %v555_v8 = vadd.f32 %v554_v7, %v465_v12  ;;  %v422_v15 = vpop.f32.mrf.mxu0 }
  0xd7   :  { %v511_v10 = vpop.f32.mrf.mxu1 }
  0xd8   :  { %v598_v11 = vadd.f32 %v555_v8, %v256_v6  ;;  %v512_v13 = vadd.f32 %v511_v10, %v422_v15  ;;  %v245_v6 = vld [vmem:[#allocation2 + $0x68] sm:$0xff] }
  0xda   :  { %631 = vst.msk [vmem:[#allocation2 + $0xc0] sm:$0xff] %vm22_vm0, %v598_v11  ;;  %v581_v14 = vadd.f32 %v512_v13, %v239_v9  ;;  %v263_v11 = vld [vmem:[#allocation2 + $0xf8] sm:$0xff] }
  0xdc   :  { %614 = vst.msk [vmem:[#allocation2 + $0x38] sm:$0xff] %vm22_vm0, %v581_v14  ;;  %v467_v16 = vpop.f32.mrf.mxu2 }
  0xdd   :  { %v556_v18 = vpop.f32.mrf.mxu3 }
  0xde   :  { %v557_v19 = vadd.f32 %v556_v18, %v467_v16  ;;  %v425_v20 = vpop.f32.mrf.mxu0 }
  0xdf   :  { %v514_v22 = vpop.f32.mrf.mxu1 }
  0xe0   :  { %v599_v23 = vadd.f32 %v557_v19, %v257_v17  ;;  %v515_v24 = vadd.f32 %v514_v22, %v425_v20  ;;  %v246_v17 = vld [vmem:[#allocation2 + $0x70] sm:$0xff] }
  0xe2   :  { %632 = vst.msk [vmem:[#allocation2 + $0xc8] sm:$0xff] %vm22_vm0, %v599_v23  ;;  %v582_v25 = vadd.f32 %v515_v24, %v240_v21  ;;  %v1103_v24 = vld [vmem:[%s1148_s2] ss:$0 sm:$0xff]  ;;  %s905_s2 = smov [#allocation3]  }
  0xe4   :  { %615 = vst.msk [vmem:[#allocation2 + $0x40] sm:$0xff] %vm22_vm0, %v582_v25  ;;  %v470_v26 = vpop.f32.mrf.mxu2  ;;  %v710_v25 = vld [vmem:[%s1149_s3] sm:$0x3]  ;;  %s766_s3 = sshll.u32 %s905_s2, 4  ;;  %s767_s3 = int_to_ptr.vmem [resolvable:$true] %s766_s3 }
  0xe5   :  { %v559_v28 = vpop.f32.mrf.mxu3  ;;  %728 = vst [vmem:[#allocation1] ss:$9 sm:$0xff] %v710_v25  ;;  %v649_v25 = vld [vmem:[#allocation2 + $0x38] sm:$0xff] }
  0xe6   :  { %v560_v29 = vadd.f32 %v559_v28, %v470_v26  ;;  %v427_v30 = vpop.f32.mrf.mxu0  ;;  %v247_v26 = vld [vmem:[#allocation2 + $0x78] sm:$0xff] }
  0xe7   :  { %v516_v32 = vpop.f32.mrf.mxu1 }
  0xe8   :  { %v600_v33 = vadd.f32 %v560_v29, %v258_v27  ;;  %v517_v34 = vadd.f32 %v516_v32, %v427_v30 }
  0xea   :  { %633 = vst.msk [vmem:[#allocation2 + $0xd0] sm:$0xff] %vm22_vm0, %v600_v33  ;;  %v583_v35 = vadd.f32 %v517_v34, %v241_v31 }
  0xec   :  { %616 = vst.msk [vmem:[#allocation2 + $0x48] sm:$0xff] %vm22_vm0, %v583_v35  ;;  %v472_v36 = vpop.f32.mrf.mxu2 }
  0xed   :  { %v561_v38 = vpop.f32.mrf.mxu3 }
  0xee   :  { %v562_v39 = vadd.f32 %v561_v38, %v472_v36  ;;  %v430_v40 = vpop.f32.mrf.mxu0 }
  0xef   :  { %v519_v42 = vpop.f32.mrf.mxu1 }
  0xf0   :  { %v601_v43 = vadd.f32 %v562_v39, %v259_v37  ;;  %v520_v44 = vadd.f32 %v519_v42, %v430_v40 }
  0xf1   :  { %v668_v38 = vld [vmem:[#allocation2 + $0xd0] sm:$0xff] }
  0xf2   :  { %634 = vst.msk [vmem:[#allocation2 + $0xd8] sm:$0xff] %vm22_vm0, %v601_v43  ;;  %v584_v45 = vadd.f32 %v520_v44, %v242_v41  ;;  %v248_v41 = vld [vmem:[#allocation2 + $0x80] sm:$0xff]  ;;  %v704_v44 = vadd.f32 %v1103_v24, %v668_v38 }
  0xf4   :  { %617 = vst.msk [vmem:[#allocation2 + $0x50] sm:$0xff] %vm22_vm0, %v584_v45  ;;  %v475_v46 = vpop.f32.mrf.mxu2 }
  0xf5   :  { %v564_v48 = vpop.f32.mrf.mxu3 }
  0xf6   :  { %v565_v49 = vadd.f32 %v564_v48, %v475_v46  ;;  %v432_v50 = vpop.f32.mrf.mxu0  ;;  %v666_v46 = vld [vmem:[#allocation2 + $0xc0] sm:$0xff] }
  0xf7   :  { %v521_v52 = vpop.f32.mrf.mxu1 }
  0xf8   :  { %v602_v53 = vadd.f32 %v565_v49, %v260_v47  ;;  %v522_v54 = vadd.f32 %v521_v52, %v432_v50  ;;  %v667_v49 = vld [vmem:[#allocation2 + $0xc8] sm:$0xff]  ;;  %v702_v52 = vadd.f32 %v1103_v24, %v666_v46  ;;  %v644_v46 = vld [vmem:[#allocation2 + $0x10] sm:$0xff] }
  0xf9   :  { %v669_v39 = vld [vmem:[#allocation2 + $0xd8] sm:$0xff] }
  0xfa   :  { %635 = vst.msk [vmem:[#allocation2 + $0xe0] sm:$0xff] %vm22_vm0, %v602_v53  ;;  %v585_v55 = vadd.f32 %v522_v54, %v243_v51  ;;  %v705_v45 = vadd.f32 %v1103_v24, %v669_v39 }
  0xfc   :  { %618 = vst.msk [vmem:[#allocation2 + $0x58] sm:$0xff] %vm22_vm0, %v585_v55  ;;  %v477_v56 = vpop.f32.mrf.mxu2  ;;  %v724_v54 = vpack.c.bf16 %v705_v45, %v704_v44  ;;  %v645_v44 = vld [vmem:[#allocation2 + $0x18] sm:$0xff] }
  0xfd   :  { %v566_v58 = vpop.f32.mrf.mxu3 }
  0xfe   :  { %v567_v59 = vadd.f32 %v566_v58, %v477_v56  ;;  %v435_v60 = vpop.f32.mrf.mxu0  ;;  %v664_v58 = vld [vmem:[#allocation2 + $0xb0] sm:$0xff] }
  0xff   :  { %v524_v62 = vpop.f32.mrf.mxu1 }
 0x100   :  { %v603_v63 = vadd.f32 %v567_v59, %v261_v57  ;;  %v525_v0 = vadd.f32 %v524_v62, %v435_v60  ;;  %v703_v57 = vadd.f32 %v1103_v24, %v667_v49  ;;  %v665_v60 = vld [vmem:[#allocation2 + $0xb8] sm:$0xff]  ;;  %v730_v49 = vld [vmem:[#allocation1 + $0x9] sm:$0xff] }
 0x101   :  { %v670_v31 = vld [vmem:[#allocation2 + $0xe0] sm:$0xff] }
 0x102   :  { %636 = vst.msk [vmem:[#allocation2 + $0xe8] sm:$0xff] %vm22_vm0, %v603_v63  ;;  %v586_v1 = vadd.f32 %v525_v0, %v244_v61  ;;  %v706_v36 = vadd.f32 %v1103_v24, %v670_v31  ;;  %v700_v0 = vadd.f32 %v1103_v24, %v664_v58  ;;  %v648_v31 = vld [vmem:[#allocation2 + $0x30] sm:$0xff] }
 0x103   :  { %v684_v38 = vadd.f32 %v1103_v24, %v648_v31 }
 0x104   :  { %619 = vst.msk [vmem:[#allocation2 + $0x60] sm:$0xff] %vm22_vm0, %v586_v1  ;;  %v480_v2 = vpop.f32.mrf.mxu2  ;;  %v653_v1 = vld [vmem:[#allocation2 + $0x58] sm:$0xff] }
 0x105   :  { %v569_v4 = vpop.f32.mrf.mxu3 }
 0x106   :  { %v570_v5 = vadd.f32 %v569_v4, %v480_v2  ;;  %v437_v12 = vpop.f32.mrf.mxu0  ;;  %v249_v2 = vld [vmem:[#allocation2 + $0x88] sm:$0xff]  ;;  %v723_v4 = vpack.c.bf16 %v703_v57, %v702_v52  ;;  %v642_v52 = vld [vmem:[#allocation2] sm:$0xff]  ;;  %v729_v57 = vld [vmem:[#allocation1] sm:$0xff] }
 0x107   :  { %v526_v7 = vpop.f32.mrf.mxu1 }
 0x108   :  { %v604_v8 = vadd.f32 %v570_v5, %v262_v3  ;;  %v527_v15 = vadd.f32 %v526_v7, %v437_v12  ;;  %v701_v12 = vadd.f32 %v1103_v24, %v665_v60 }
 0x109   :  { %v671_v32 = vld [vmem:[#allocation2 + $0xe8] sm:$0xff] }
 0x10a   :  { %637 = vst.msk [vmem:[#allocation2 + $0xf0] sm:$0xff] %vm22_vm0, %v604_v8  ;;  %v587_v9 = vadd.f32 %v527_v15, %v245_v6  ;;  %v707_v37 = vadd.f32 %v1103_v24, %v671_v32  ;;  %v662_v6 = vld [vmem:[#allocation2 + $0xa0] sm:$0xff]  ;;  %v652_v8 = vld [vmem:[#allocation2 + $0x50] sm:$0xff]  ;;  %v663_v15 = vld [vmem:[#allocation2 + $0xa8] sm:$0xff] }
 0x10b   :  { %v654_v59 = vld [vmem:[#allocation2 + $0x60] sm:$0xff] }
 0x10c   :  { %620 = vst.msk [vmem:[#allocation2 + $0x68] sm:$0xff] %vm22_vm0, %v587_v9  ;;  %v482_v10 = vpop.f32.mrf.mxu2  ;;  %v725_v43 = vpack.c.bf16 %v707_v37, %v706_v36  ;;  %v690_v5 = vadd.f32 %v1103_v24, %v654_v59 }
 0x10d   :  { %v571_v13 = vpop.f32.mrf.mxu3 }
 0x10e   :  { %v572_v14 = vadd.f32 %v571_v13, %v482_v10  ;;  %v440_v16 = vpop.f32.mrf.mxu0  ;;  %v689_v10 = vadd.f32 %v1103_v24, %v653_v1  ;;  %v698_v13 = vadd.f32 %v1103_v24, %v662_v6 }
 0x10f   :  { %v529_v18 = vpop.f32.mrf.mxu1 }
 0x110   :  { %v605_v19 = vadd.f32 %v572_v14, %v263_v11  ;;  %v530_v20 = vadd.f32 %v529_v18, %v440_v16  ;;  %v651_v14 = vld [vmem:[#allocation2 + $0x48] sm:$0xff]  ;;  %v722_v16 = vpack.c.bf16 %v701_v12, %v700_v0  ;;  %v699_v18 = vadd.f32 %v1103_v24, %v663_v15 }
 0x111   :  { %v672_v22 = vld [vmem:[#allocation2 + $0xf0] sm:$0xff] }
 0x112   :  { %638 = vst.msk [vmem:[#allocation2 + $0xf8] sm:$0xff] %vm22_vm0, %v605_v19  ;;  %v588_v21 = vadd.f32 %v530_v20, %v246_v17  ;;  %v708_v29 = vadd.f32 %v1103_v24, %v672_v22  ;;  %v688_v17 = vadd.f32 %v1103_v24, %v652_v8  ;;  %v650_v19 = vld [vmem:[#allocation2 + $0x40] sm:$0xff]  ;;  %v660_v20 = vld [vmem:[#allocation2 + $0x90] sm:$0xff] }
 0x113   :  { %v655_v53 = vld [vmem:[#allocation2 + $0x68] sm:$0xff] }
 0x114   :  { %621 = vst.msk [vmem:[#allocation2 + $0x70] sm:$0xff] %vm22_vm0, %v588_v21  ;;  %v691_v62 = vadd.f32 %v1103_v24, %v655_v53  ;;  %v661_v21 = vld [vmem:[#allocation2 + $0x98] sm:$0xff]  ;;  %v716_v22 = vpack.c.bf16 %v689_v10, %v688_v17 }
 0x116   :  { %v442_v23 = vpop.f32.mrf.mxu0  ;;  %v717_v9 = vpack.c.bf16 %v691_v62, %v690_v5 }
 0x117   :  { %v531_v27 = vpop.f32.mrf.mxu1 }
 0x118   :  { %v532_v28 = vadd.f32 %v531_v27, %v442_v23  ;;  %v687_v23 = vadd.f32 %v1103_v24, %v651_v14  ;;  %v721_v27 = vpack.c.bf16 %v699_v18, %v698_v13 }
 0x119   :  { %v673_v30 = vld [vmem:[#allocation2 + $0xf8] sm:$0xff] }
 0x11a   :  { %v589_v33 = vadd.f32 %v532_v28, %v247_v26  ;;  %v709_v34 = vadd.f32 %v1103_v24, %v673_v30  ;;  %v686_v28 = vadd.f32 %v1103_v24, %v650_v19  ;;  %v697_v30 = vadd.f32 %v1103_v24, %v661_v21 }
 0x11b   :  { %v656_v48 = vld [vmem:[#allocation2 + $0x70] sm:$0xff] }
 0x11c   :  { %622 = vst.msk [vmem:[#allocation2 + $0x78] sm:$0xff] %vm22_vm0, %v589_v33  ;;  %v726_v35 = vpack.c.bf16 %v709_v34, %v708_v29  ;;  %v692_v55 = vadd.f32 %v1103_v24, %v656_v48  ;;  %v696_v29 = vadd.f32 %v1103_v24, %v660_v20  ;;  %v715_v32 = vpack.c.bf16 %v687_v23, %v686_v28 }
 0x11d   :  { %v685_v33 = vadd.f32 %v1103_v24, %v649_v25  ;;  %v681_v48 = vadd.f32 %v1103_v24, %v645_v44 }
 0x11e   :  { %746 = vmatpush.bf16.msrb.mxu3 %v726_v35  ;;  %v445_v40 = vpop.f32.mrf.mxu0  ;;  %v647_v35 = vld [vmem:[#allocation2 + $0x28] sm:$0xff]  ;;  %v720_v37 = vpack.c.bf16 %v697_v30, %v696_v29 }
 0x11f   :  { %v534_v42 = vpop.f32.mrf.mxu1 }
 0x120   :  { %v535_v47 = vadd.f32 %v534_v42, %v445_v40  ;;  %v646_v40 = vld [vmem:[#allocation2 + $0x20] sm:$0xff]  ;;  %v683_v42 = vadd.f32 %v1103_v24, %v647_v35 }
 0x121   :  { %v682_v45 = vadd.f32 %v1103_v24, %v646_v40 }
 0x122   :  { %747 = vmatpush.bf16.msrb.mxu3 %v725_v43  ;;  %v590_v50 = vadd.f32 %v535_v47, %v248_v41  ;;  %v714_v41 = vpack.c.bf16 %v685_v33, %v684_v38 }
 0x123   :  { %v657_v51 = vld [vmem:[#allocation2 + $0x78] sm:$0xff]  ;;  %v713_v47 = vpack.c.bf16 %v683_v42, %v682_v45 }
 0x124   :  { %v693_v56 = vadd.f32 %v1103_v24, %v657_v51  ;;  %623 = vst.msk [vmem:[#allocation2 + $0x80] sm:$0xff] %vm22_vm0, %v590_v50  ;;  %v643_v50 = vld [vmem:[#allocation2 + $0x8] sm:$0xff]  ;;  %v680_v51 = vadd.f32 %v1103_v24, %v644_v46 }
 0x126   :  { %748 = vmatpush.bf16.msrb.mxu3 %v724_v54  ;;  %v718_v61 = vpack.c.bf16 %v693_v56, %v692_v55  ;;  %v447_v63 = vpop.f32.mrf.mxu0  ;;  %v712_v53 = vpack.c.bf16 %v681_v48, %v680_v51  ;;  %v679_v54 = vadd.f32 %v1103_v24, %v643_v50  ;;  %v678_v55 = vadd.f32 %v1103_v24, %v642_v52 }
 0x127   :  { %v536_v3 = vpop.f32.mrf.mxu1 }
 0x128   :  { %733 = vmatpush.bf16.msrb.mxu2 %v718_v61  ;;  %v537_v7 = vadd.f32 %v536_v3, %v447_v63  ;;  %v711_v56 = vpack.c.bf16 %v679_v54, %v678_v55 }
 0x12a   :  { %749 = vmatpush.bf16.msrb.mxu3 %v723_v4  ;;  %v591_v11 = vadd.f32 %v537_v7, %v249_v2 }
 0x12b   :  { %v658_v26 = vld [vmem:[#allocation2 + $0x80] sm:$0xff] }
 0x12c   :  { %734 = vmatpush.bf16.msrb.mxu2 %v717_v9  ;;  %624 = vst.msk [vmem:[#allocation2 + $0x88] sm:$0xff] %vm22_vm0, %v591_v11  ;;  %v694_v34 = vadd.f32 %v1103_v24, %v658_v26 }
 0x12e   :  { %750 = vmatpush.bf16.msrb.mxu3 %v722_v16 }
 0x130   :  { %735 = vmatpush.bf16.msrb.mxu2 %v716_v22 }
 0x132   :  { %751 = vmatpush.bf16.msrb.mxu3 %v721_v27 }
 0x133   :  { %v659_v36 = vld [vmem:[#allocation2 + $0x88] sm:$0xff] }
 0x134   :  { %736 = vmatpush.bf16.msrb.mxu2 %v715_v32  ;;  %v695_v39 = vadd.f32 %v1103_v24, %v659_v36 }
 0x136   :  { %752 = vmatpush.bf16.msrb.mxu3 %v720_v37  ;;  %v719_v43 = vpack.c.bf16 %v695_v39, %v694_v34 }
 0x138   :  { %737 = vmatpush.bf16.msrb.mxu2 %v714_v41 }
 0x13a   :  { %753 = vmatpush.bf16.msrb.mxu3 %v719_v43 }
 0x13c   :  { %738 = vmatpush.bf16.msrb.mxu2 %v713_v47 }
 0x13d   :  { %754 = vmatmul.bf16.vlgmr.msrb.gmra.mxu3 %v730_v49 }
 0x140   :  { %739 = vmatpush.bf16.msrb.mxu2 %v712_v53 }
 0x144   :  { %740 = vmatpush.bf16.msrb.mxu2 %v711_v56 }
 0x147   :  { %741 = vmatmul.bf16.vlgmr.msrb.gmra.mxu2 %v729_v57 }
 0x1c0   :  { %v755_v58 = vpop.f32.mrf.mxu3 }
 0x1c8   :  { %v757_v59 = vpop.f32.mrf.mxu3 }
 0x1ca   :  { %v742_v60 = vpop.f32.mrf.mxu2 }
 0x1cb   :  { %v756_v61 = vadd.f32 %v755_v58, %v742_v60 }
 0x1cd   :  { %760 = vst.msk [vmem:[#allocation3] sm:$0x3] %vm759_vm1, %v756_v61 }
 0x1ce   :  { %771 = dma.vmem_to_hbm [thread:$0]  %s767_s3, 32, %s769_s5, [#allocation4]  }
 0x1d2   :  { %v744_v24 = vpop.f32.mrf.mxu2 }
 0x1d3   :  { %902 = dma.done.wait [#allocation4], 32  }
 0x1d4   :  { %903 = vsyncadd [#allocation4], 4294967264 }
 0x1d5   :  { %776 = vsyncpa [#allocation4], 1 }

// kernel: basic_gnn_forward.4
= control target key start
LH: loop header
LB: loop body
LE: loop exit
PB: predicated region body
PF: predicated region fallthrough
CT: control target
= control target key end

     0   :  { %vm815_vm0 = vcmask 130048   ;;  %s1949_s2 = inlined_call_operand.vmem [shape: bf16[256,128], index: 2, kind: input, shape index: {}]   ;;  %s1950_s3 = inlined_call_operand.vmem [shape: f32[1,128], index: 3, kind: input, shape index: {}]   ;;  %s1951_s1 = inlined_call_operand.vmem [shape: bf16[256,256], index: 1, kind: input, shape index: {}]   ;;  %s1952_s5 = inlined_call_operand.vmem [shape: bf16[128,128], index: 5, kind: input, shape index: {}]   ;;  %s1953_s4 = inlined_call_operand.vmem [shape: bf16[16,128], index: 4, kind: input, shape index: {}]   ;;  %s1954_s0 = inlined_call_operand.vmem [shape: bf16[256,16], index: 0, kind: input, shape index: {}]   ;;  %s1955_s6 = inlined_call_operand.vmem [shape: bf16[256,128], index: 6, kind: output, shape index: {}]  }
   0x1   :  { %v1368_v0 = vld [vmem:[%s1949_s2 + $0x38] sm:$0xff]  ;;  %v1367_v2 = vld [vmem:[%s1949_s2 + $0x30] sm:$0xff]  ;;  %v1366_v4 = vld [vmem:[%s1949_s2 + $0x28] sm:$0xff] }
   0x2   :  { %v1376_v1 = vld [vmem:[%s1949_s2 + $0x78] sm:$0xff]  ;;  %348 = vmatpush.bf16.msra.mxu0 %v1368_v0  ;;  %v1375_v3 = vld [vmem:[%s1949_s2 + $0x70] sm:$0xff]  ;;  %v1374_v5 = vld [vmem:[%s1949_s2 + $0x68] sm:$0xff] }
   0x3   :  { %437 = vmatpush.bf16.msra.mxu1 %v1376_v1  ;;  %v1365_v6 = vld [vmem:[%s1949_s2 + $0x20] sm:$0xff]  ;;  %v1364_v8 = vld [vmem:[%s1949_s2 + $0x18] sm:$0xff]  ;;  %v1363_v10 = vld [vmem:[%s1949_s2 + $0x10] sm:$0xff] }
   0x4   :  { %v1373_v7 = vld [vmem:[%s1949_s2 + $0x60] sm:$0xff]  ;;  %v1372_v9 = vld [vmem:[%s1949_s2 + $0x58] sm:$0xff]  ;;  %v1371_v11 = vld [vmem:[%s1949_s2 + $0x50] sm:$0xff] }
   0x5   :  { %v1362_v12 = vld [vmem:[%s1949_s2 + $0x8] sm:$0xff]  ;;  %v1361_v14 = vld [vmem:[%s1949_s2] sm:$0xff]  ;;  %v1031_v22 = vld [vmem:[%s1951_s1 + $0x10] sm:$0xf] }
   0x6   :  { %349 = vmatpush.bf16.msra.mxu0 %v1367_v2  ;;  %v1370_v13 = vld [vmem:[%s1949_s2 + $0x48] sm:$0xff]  ;;  %v1369_v15 = vld [vmem:[%s1949_s2 + $0x40] sm:$0xff]  ;;  %v1332_v23 = vld [vmem:[%s1951_s1 + $0x14] sm:$0xf0] }
   0x7   :  { %438 = vmatpush.bf16.msra.mxu1 %v1375_v3  ;;  %v1023_v16 = vld [vmem:[%s1951_s1] sm:$0xf]  ;;  %v1330_v17 = vld [vmem:[%s1951_s1 + $0x4] sm:$0xf0]  ;;  %v1329_v18 = vld [vmem:[%s1951_s1 + $0x4] sm:$0xf]  ;;  %v1032_v26 = vor.u32 %v1332_v23, %v1031_v22 }
   0x8   :  { %v1025_v19 = vld [vmem:[%s1951_s1 + $0x8] sm:$0xf0]  ;;  %v1024_v20 = vor.u32 %v1330_v17, %v1023_v16  ;;  %v1331_v24 = vld [vmem:[%s1951_s1 + $0x14] sm:$0xf]  ;;  %v1033_v25 = vld [vmem:[%s1951_s1 + $0x18] sm:$0xf0] }
   0x9   :  { %v1028_v21 = vor.u32 %v1329_v18, %v1025_v19  ;;  %v1036_v27 = vor.u32 %v1331_v24, %v1033_v25  ;;  %v1039_v28 = vld [vmem:[%s1951_s1 + $0x20] sm:$0xf]  ;;  %v1334_v29 = vld [vmem:[%s1951_s1 + $0x24] sm:$0xf0]  ;;  %v1333_v30 = vld [vmem:[%s1951_s1 + $0x24] sm:$0xf] }
   0xa   :  { %350 = vmatpush.bf16.msra.mxu0 %v1366_v4  ;;  %v1041_v31 = vld [vmem:[%s1951_s1 + $0x28] sm:$0xf0]  ;;  %v1040_v32 = vor.u32 %v1334_v29, %v1039_v28  ;;  %v1047_v34 = vld [vmem:[%s1951_s1 + $0x30] sm:$0xf]  ;;  %v1336_v35 = vld [vmem:[%s1951_s1 + $0x34] sm:$0xf0] }
   0xb   :  { %439 = vmatpush.bf16.msra.mxu1 %v1374_v5  ;;  %v1044_v33 = vor.u32 %v1333_v30, %v1041_v31  ;;  %v1335_v36 = vld [vmem:[%s1951_s1 + $0x34] sm:$0xf]  ;;  %v1049_v37 = vld [vmem:[%s1951_s1 + $0x38] sm:$0xf0]  ;;  %v1048_v38 = vor.u32 %v1336_v35, %v1047_v34  ;;  %v1055_v40 = vld [vmem:[%s1951_s1 + $0x40] sm:$0xf] }
   0xc   :  { %v1052_v39 = vor.u32 %v1335_v36, %v1049_v37  ;;  %v1338_v41 = vld [vmem:[%s1951_s1 + $0x44] sm:$0xf0]  ;;  %v1337_v42 = vld [vmem:[%s1951_s1 + $0x44] sm:$0xf]  ;;  %v1057_v43 = vld [vmem:[%s1951_s1 + $0x48] sm:$0xf0] }
   0xd   :  { %v1056_v44 = vor.u32 %v1338_v41, %v1055_v40  ;;  %v1060_v45 = vor.u32 %v1337_v42, %v1057_v43  ;;  %v1401_v46 = vld [vmem:[%s1952_s5 + $0x38] sm:$0xff]  ;;  %v1063_v47 = vld [vmem:[%s1951_s1 + $0x50] sm:$0xf]  ;;  %v1339_v49 = vld [vmem:[%s1951_s1 + $0x54] sm:$0xf] }
   0xe   :  { %351 = vmatpush.bf16.msra.mxu0 %v1365_v6  ;;  %640 = vmatpush.bf16.msra.mxu2 %v1401_v46  ;;  %v1340_v48 = vld [vmem:[%s1951_s1 + $0x54] sm:$0xf0]  ;;  %v1065_v50 = vld [vmem:[%s1951_s1 + $0x58] sm:$0xf0]  ;;  %v1400_v53 = vld [vmem:[%s1952_s5 + $0x30] sm:$0xff] }
   0xf   :  { %440 = vmatpush.bf16.msra.mxu1 %v1373_v7  ;;  %v1064_v51 = vor.u32 %v1340_v48, %v1063_v47  ;;  %v1068_v52 = vor.u32 %v1339_v49, %v1065_v50  ;;  %v1399_v54 = vld [vmem:[%s1952_s5 + $0x28] sm:$0xff]  ;;  %v1398_v55 = vld [vmem:[%s1952_s5 + $0x20] sm:$0xff]  ;;  %v1397_v60 = vld [vmem:[%s1952_s5 + $0x18] sm:$0xff] }
  0x10   :  { %v1071_v56 = vld [vmem:[%s1951_s1 + $0x60] sm:$0xf]  ;;  %v1342_v57 = vld [vmem:[%s1951_s1 + $0x64] sm:$0xf0]  ;;  %v1341_v58 = vld [vmem:[%s1951_s1 + $0x64] sm:$0xf] }
  0x11   :  { %v1073_v59 = vld [vmem:[%s1951_s1 + $0x68] sm:$0xf0]  ;;  %v1072_v61 = vor.u32 %v1342_v57, %v1071_v56  ;;  %v1396_v63 = vld [vmem:[%s1952_s5 + $0x10] sm:$0xff]  ;;  %v1393_v0 = vld [vmem:[%s1953_s4] sm:$0xff] }
  0x12   :  { %352 = vmatpush.bf16.msra.mxu0 %v1364_v8  ;;  %641 = vmatpush.bf16.msra.mxu2 %v1400_v53  ;;  %v1076_v62 = vor.u32 %v1341_v58, %v1073_v59  ;;  %v1377_v1 = vld [vmem:[%s1954_s0] sm:$0xff]  ;;  %v1395_v2 = vld [vmem:[%s1952_s5 + $0x8] sm:$0xff]  ;;  %v1079_v4 = vld [vmem:[%s1951_s1 + $0x70] sm:$0xf] }
  0x13   :  { %441 = vmatpush.bf16.msra.mxu1 %v1372_v9  ;;  %871 = vmatpush.bf16.msra.mxu3 %v1393_v0  ;;  %v1394_v3 = vld [vmem:[%s1952_s5] sm:$0xff]  ;;  %v1344_v5 = vld [vmem:[%s1951_s1 + $0x74] sm:$0xf0]  ;;  %v1343_v6 = vld [vmem:[%s1951_s1 + $0x74] sm:$0xf] }
  0x14   :  { %v1081_v7 = vld [vmem:[%s1951_s1 + $0x78] sm:$0xf0]  ;;  %v1080_v8 = vor.u32 %v1344_v5, %v1079_v4  ;;  %v1727_v19 = vld [vmem:[%s1950_s3] ss:$0 sm:$0xff]  ;;  %v1348_v28 = vld [vmem:[%s1951_s1 + $0x94] sm:$0xf0] }
  0x15   :  { %v1084_v9 = vor.u32 %v1343_v6, %v1081_v7  ;;  %v1347_v29 = vld [vmem:[%s1951_s1 + $0x94] sm:$0xf]  ;;  %v1097_v30 = vld [vmem:[%s1951_s1 + $0x98] sm:$0xf0]  ;;  %v1103_v43 = vld [vmem:[%s1951_s1 + $0xa0] sm:$0xf] }
  0x16   :  { %353 = vmatpush.bf16.msra.mxu0 %v1363_v10  ;;  %642 = vmatpush.bf16.msra.mxu2 %v1399_v54  ;;  %v1378_v10 = vld [vmem:[%s1954_s0 + $0x8] sm:$0xff]  ;;  %v1380_v36 = vld [vmem:[%s1954_s0 + $0x18] sm:$0xff]  ;;  %v1111_v59 = vld [vmem:[%s1951_s1 + $0xb0] sm:$0xf] }
  0x17   :  { %442 = vmatpush.bf16.msra.mxu1 %v1371_v11  ;;  %1313 = vmatmul.msk.bf16.vlgmr.msra.gmra.mxu3 %vm815_vm0, %v1377_v1  ;;  %v1087_v11 = vld [vmem:[%s1951_s1 + $0x80] sm:$0xf]  ;;  %v1105_v46 = vld [vmem:[%s1951_s1 + $0xa8] sm:$0xf0] }
  0x18   :  { %v1382_v4 = vld [vmem:[%s1954_s0 + $0x28] sm:$0xff] }
  0x1a   :  { %354 = vmatpush.bf16.msra.mxu0 %v1362_v12  ;;  %643 = vmatpush.bf16.msra.mxu2 %v1398_v55  ;;  %v1346_v12 = vld [vmem:[%s1951_s1 + $0x84] sm:$0xf0] }
  0x1b   :  { %443 = vmatpush.bf16.msra.mxu1 %v1370_v13  ;;  %v1345_v13 = vld [vmem:[%s1951_s1 + $0x84] sm:$0xf] }
  0x1e   :  { %355 = vmatpush.bf16.msra.mxu0 %v1361_v14  ;;  %644 = vmatpush.bf16.msra.mxu2 %v1397_v60  ;;  %v1089_v14 = vld [vmem:[%s1951_s1 + $0x88] sm:$0xf0]  ;;  %v1352_v60 = vld [vmem:[%s1951_s1 + $0xb4] sm:$0xf0] }
  0x1f   :  { %444 = vmatpush.bf16.msra.mxu1 %v1369_v15  ;;  %v1088_v15 = vor.u32 %v1346_v12, %v1087_v11  ;;  %v1092_v16 = vor.u32 %v1345_v13, %v1089_v14  ;;  %v1112_v0 = vor.u32 %v1352_v60, %v1111_v59  ;;  %v1119_v11 = vld [vmem:[%s1951_s1 + $0xc0] sm:$0xf]  ;;  %v1354_v12 = vld [vmem:[%s1951_s1 + $0xc4] sm:$0xf0]  ;;  %v1353_v13 = vld [vmem:[%s1951_s1 + $0xc4] sm:$0xf] }
  0x20   :  { %v1121_v14 = vld [vmem:[%s1951_s1 + $0xc8] sm:$0xf0] }
  0x21   :  { %356 = vmatmul.bf16.vlgmr.msra.gmra.mxu0 %v1024_v20  ;;  %v1379_v20 = vld [vmem:[%s1954_s0 + $0x10] sm:$0xff] }
  0x22   :  { %445 = vmatmul.bf16.vlgmr.msra.gmra.mxu1 %v1028_v21  ;;  %645 = vmatpush.bf16.msra.mxu2 %v1396_v63 }
  0x26   :  { %646 = vmatpush.bf16.msra.mxu2 %v1395_v2 }
  0x27   :  { %1314 = vmatmul.msk.bf16.gmra.mxu3 %vm815_vm0, %v1378_v10 }
  0x2a   :  { %647 = vmatpush.bf16.msra.mxu2 %v1394_v3 }
  0x31   :  { %361 = vmatmul.bf16.gmra.mxu0 %v1032_v26 }
  0x32   :  { %450 = vmatmul.bf16.gmra.mxu1 %v1036_v27  ;;  %v1095_v27 = vld [vmem:[%s1951_s1 + $0x90] sm:$0xf] }
  0x37   :  { %1315 = vmatmul.msk.bf16.gmra.mxu3 %vm815_vm0, %v1379_v20 }
  0x41   :  { %366 = vmatmul.bf16.gmra.mxu0 %v1040_v32  ;;  %v1096_v32 = vor.u32 %v1348_v28, %v1095_v27  ;;  %v1127_v28 = vld [vmem:[%s1951_s1 + $0xd0] sm:$0xf] }
  0x42   :  { %455 = vmatmul.bf16.gmra.mxu1 %v1044_v33  ;;  %v1100_v33 = vor.u32 %v1347_v29, %v1097_v30  ;;  %v1356_v29 = vld [vmem:[%s1951_s1 + $0xd4] sm:$0xf0]  ;;  %v1355_v30 = vld [vmem:[%s1951_s1 + $0xd4] sm:$0xf] }
  0x47   :  { %1316 = vmatmul.msk.bf16.gmra.mxu3 %vm815_vm0, %v1380_v36 }
  0x51   :  { %371 = vmatmul.bf16.gmra.mxu0 %v1048_v38 }
  0x52   :  { %460 = vmatmul.bf16.gmra.mxu1 %v1052_v39 }
  0x61   :  { %376 = vmatmul.bf16.gmra.mxu0 %v1056_v44  ;;  %v1350_v44 = vld [vmem:[%s1951_s1 + $0xa4] sm:$0xf0] }
  0x62   :  { %465 = vmatmul.bf16.gmra.mxu1 %v1060_v45  ;;  %v1349_v45 = vld [vmem:[%s1951_s1 + $0xa4] sm:$0xf]  ;;  %v1104_v48 = vor.u32 %v1350_v44, %v1103_v43  ;;  %v1135_v44 = vld [vmem:[%s1951_s1 + $0xe0] sm:$0xf] }
  0x63   :  { %v1108_v49 = vor.u32 %v1349_v45, %v1105_v46  ;;  %v1358_v45 = vld [vmem:[%s1951_s1 + $0xe4] sm:$0xf0]  ;;  %v1357_v46 = vld [vmem:[%s1951_s1 + $0xe4] sm:$0xf] }
  0x71   :  { %381 = vmatmul.bf16.gmra.mxu0 %v1064_v51 }
  0x72   :  { %470 = vmatmul.bf16.gmra.mxu1 %v1068_v52  ;;  %v1381_v52 = vld [vmem:[%s1954_s0 + $0x20] sm:$0xff] }
  0x73   :  { %1317 = vmatmul.msk.bf16.gmra.mxu3 %vm815_vm0, %v1381_v52 }
  0x81   :  { %386 = vmatmul.bf16.gmra.mxu0 %v1072_v61  ;;  %v1351_v61 = vld [vmem:[%s1951_s1 + $0xb4] sm:$0xf] }
  0x82   :  { %475 = vmatmul.bf16.gmra.mxu1 %v1076_v62  ;;  %v1113_v62 = vld [vmem:[%s1951_s1 + $0xb8] sm:$0xf0] }
  0x83   :  { %v1116_v1 = vor.u32 %v1351_v61, %v1113_v62  ;;  %1318 = vmatmul.msk.bf16.gmra.mxu3 %vm815_vm0, %v1382_v4  ;;  %v1143_v61 = vld [vmem:[%s1951_s1 + $0xf0] sm:$0xf]  ;;  %v1360_v62 = vld [vmem:[%s1951_s1 + $0xf4] sm:$0xf0] }
  0x91   :  { %391 = vmatmul.bf16.gmra.mxu0 %v1080_v8 }
  0x92   :  { %480 = vmatmul.bf16.gmra.mxu1 %v1084_v9 }
  0x9e   :  { %v357_v17 = vpop.f32.mrf.mxu0 }
  0x9f   :  { %v446_v18 = vpop.f32.mrf.mxu1  ;;  %v358_v21 = vadd.f32 %v1727_v19, %v357_v17  ;;  %v1124_v17 = vor.u32 %v1353_v13, %v1121_v14 }
  0xa1   :  { %396 = vmatmul.bf16.gmra.mxu0 %v1088_v15  ;;  %v447_v25 = vadd.f32 %v446_v18, %v358_v21  ;;  %v1383_v21 = vld [vmem:[%s1954_s0 + $0x30] sm:$0xff] }
  0xa2   :  { %485 = vmatmul.bf16.gmra.mxu1 %v1092_v16  ;;  %v1120_v16 = vor.u32 %v1354_v12, %v1119_v11  ;;  %1319 = vmatmul.msk.bf16.gmra.mxu3 %vm815_vm0, %v1383_v21 }
  0xa6   :  { %v359_v22 = vpop.f32.mrf.mxu0 }
  0xa7   :  { %v448_v23 = vpop.f32.mrf.mxu1  ;;  %v360_v24 = vadd.f32 %v1727_v19, %v359_v22 }
  0xa9   :  { %v449_v26 = vadd.f32 %v448_v23, %v360_v24 }
  0xab   :  { %v560_v31 = vpack.c.bf16 %v449_v26, %v447_v25 }
  0xad   :  { %648 = vmatmul.bf16.vlgmr.msra.gmra.mxu2 %v560_v31  ;;  %v1129_v31 = vld [vmem:[%s1951_s1 + $0xd8] sm:$0xf0] }
  0xae   :  { %v362_v34 = vpop.f32.mrf.mxu0 }
  0xaf   :  { %v451_v35 = vpop.f32.mrf.mxu1  ;;  %v363_v37 = vadd.f32 %v1727_v19, %v362_v34  ;;  %v1132_v34 = vor.u32 %v1355_v30, %v1129_v31 }
  0xb1   :  { %401 = vmatmul.bf16.gmra.mxu0 %v1096_v32  ;;  %v452_v41 = vadd.f32 %v451_v35, %v363_v37  ;;  %v1384_v37 = vld [vmem:[%s1954_s0 + $0x38] sm:$0xff] }
  0xb2   :  { %490 = vmatmul.bf16.gmra.mxu1 %v1100_v33  ;;  %v1128_v33 = vor.u32 %v1356_v29, %v1127_v28  ;;  %1320 = vmatmul.msk.bf16.gmra.mxu3 %vm815_vm0, %v1384_v37 }
  0xb6   :  { %v364_v38 = vpop.f32.mrf.mxu0 }
  0xb7   :  { %v453_v39 = vpop.f32.mrf.mxu1  ;;  %v365_v40 = vadd.f32 %v1727_v19, %v364_v38 }
  0xb9   :  { %v454_v42 = vadd.f32 %v453_v39, %v365_v40 }
  0xbb   :  { %v561_v47 = vpack.c.bf16 %v454_v42, %v452_v41 }
  0xbd   :  { %653 = vmatmul.bf16.gmra.mxu2 %v561_v47  ;;  %v1137_v47 = vld [vmem:[%s1951_s1 + $0xe8] sm:$0xf0] }
  0xbe   :  { %v367_v50 = vpop.f32.mrf.mxu0 }
  0xbf   :  { %v456_v51 = vpop.f32.mrf.mxu1  ;;  %v368_v53 = vadd.f32 %v1727_v19, %v367_v50  ;;  %v1140_v50 = vor.u32 %v1357_v46, %v1137_v47 }
  0xc1   :  { %406 = vmatmul.bf16.gmra.mxu0 %v1104_v48  ;;  %v457_v57 = vadd.f32 %v456_v51, %v368_v53  ;;  %v1385_v53 = vld [vmem:[%s1954_s0 + $0x40] sm:$0xff] }
  0xc2   :  { %495 = vmatmul.bf16.gmra.mxu1 %v1108_v49  ;;  %v1136_v49 = vor.u32 %v1358_v45, %v1135_v44  ;;  %1321 = vmatmul.msk.bf16.gmra.mxu3 %vm815_vm0, %v1385_v53 }
  0xc6   :  { %v369_v54 = vpop.f32.mrf.mxu0 }
  0xc7   :  { %v458_v55 = vpop.f32.mrf.mxu1  ;;  %v370_v56 = vadd.f32 %v1727_v19, %v369_v54 }
  0xc9   :  { %v459_v58 = vadd.f32 %v458_v55, %v370_v56 }
  0xcb   :  { %v562_v63 = vpack.c.bf16 %v459_v58, %v457_v57  ;;  %v873_v58 = vpop.f32.mrf.mxu3 }
  0xcd   :  { %658 = vmatmul.bf16.gmra.mxu2 %v562_v63  ;;  %v1359_v63 = vld [vmem:[%s1951_s1 + $0xf4] sm:$0xf] }
  0xce   :  { %v372_v2 = vpop.f32.mrf.mxu0 }
  0xcf   :  { %v461_v3 = vpop.f32.mrf.mxu1  ;;  %v373_v5 = vadd.f32 %v1727_v19, %v372_v2  ;;  %v1144_v2 = vor.u32 %v1360_v62, %v1143_v61 }
  0xd1   :  { %411 = vmatmul.bf16.gmra.mxu0 %v1112_v0  ;;  %v462_v9 = vadd.f32 %v461_v3, %v373_v5  ;;  %v1145_v0 = vld [vmem:[%s1951_s1 + $0xf8] sm:$0xf0] }
  0xd2   :  { %500 = vmatmul.bf16.gmra.mxu1 %v1116_v1  ;;  %v1148_v3 = vor.u32 %v1359_v63, %v1145_v0 }
  0xd6   :  { %v374_v6 = vpop.f32.mrf.mxu0 }
  0xd7   :  { %v463_v7 = vpop.f32.mrf.mxu1  ;;  %v375_v8 = vadd.f32 %v1727_v19, %v374_v6  ;;  %v875_v6 = vpop.f32.mrf.mxu3 }
  0xd9   :  { %v464_v10 = vadd.f32 %v463_v7, %v375_v8  ;;  %v1386_v7 = vld [vmem:[%s1954_s0 + $0x48] sm:$0xff] }
  0xda   :  { %1322 = vmatmul.msk.bf16.gmra.mxu3 %vm815_vm0, %v1386_v7 }
  0xdb   :  { %v563_v15 = vpack.c.bf16 %v464_v10, %v462_v9 }
  0xdd   :  { %663 = vmatmul.bf16.gmra.mxu2 %v563_v15 }
  0xde   :  { %v377_v18 = vpop.f32.mrf.mxu0 }
  0xdf   :  { %v466_v20 = vpop.f32.mrf.mxu1  ;;  %v378_v22 = vadd.f32 %v1727_v19, %v377_v18  ;;  %v878_v12 = vpop.f32.mrf.mxu3 }
  0xe1   :  { %416 = vmatmul.bf16.gmra.mxu0 %v1120_v16  ;;  %v467_v26 = vadd.f32 %v466_v20, %v378_v22  ;;  %v1387_v20 = vld [vmem:[%s1954_s0 + $0x50] sm:$0xff] }
  0xe2   :  { %505 = vmatmul.bf16.gmra.mxu1 %v1124_v17 }
  0xe6   :  { %v379_v23 = vpop.f32.mrf.mxu0 }
  0xe7   :  { %v468_v24 = vpop.f32.mrf.mxu1  ;;  %v380_v25 = vadd.f32 %v1727_v19, %v379_v23  ;;  %v880_v18 = vpop.f32.mrf.mxu3 }
  0xe9   :  { %v469_v27 = vadd.f32 %v468_v24, %v380_v25 }
  0xea   :  { %1323 = vmatmul.msk.bf16.gmra.mxu3 %vm815_vm0, %v1387_v20 }
  0xeb   :  { %v564_v32 = vpack.c.bf16 %v469_v27, %v467_v26 }
  0xed   :  { %668 = vmatmul.bf16.gmra.mxu2 %v564_v32 }
  0xee   :  { %v382_v35 = vpop.f32.mrf.mxu0 }
  0xef   :  { %v471_v36 = vpop.f32.mrf.mxu1  ;;  %v383_v38 = vadd.f32 %v1727_v19, %v382_v35  ;;  %v883_v25 = vpop.f32.mrf.mxu3 }
  0xf1   :  { %421 = vmatmul.bf16.gmra.mxu0 %v1128_v33  ;;  %v472_v42 = vadd.f32 %v471_v36, %v383_v38  ;;  %v1388_v33 = vld [vmem:[%s1954_s0 + $0x58] sm:$0xff] }
  0xf2   :  { %510 = vmatmul.bf16.gmra.mxu1 %v1132_v34 }
  0xf6   :  { %v384_v39 = vpop.f32.mrf.mxu0 }
  0xf7   :  { %v473_v40 = vpop.f32.mrf.mxu1  ;;  %v385_v41 = vadd.f32 %v1727_v19, %v384_v39  ;;  %v885_v32 = vpop.f32.mrf.mxu3 }
  0xf9   :  { %v474_v43 = vadd.f32 %v473_v40, %v385_v41 }
  0xfa   :  { %1324 = vmatmul.msk.bf16.gmra.mxu3 %vm815_vm0, %v1388_v33 }
  0xfb   :  { %v565_v48 = vpack.c.bf16 %v474_v43, %v472_v42 }
  0xfd   :  { %673 = vmatmul.bf16.gmra.mxu2 %v565_v48 }
  0xfe   :  { %v387_v51 = vpop.f32.mrf.mxu0 }
  0xff   :  { %v476_v52 = vpop.f32.mrf.mxu1  ;;  %v388_v54 = vadd.f32 %v1727_v19, %v387_v51  ;;  %v888_v39 = vpop.f32.mrf.mxu3 }
 0x101   :  { %426 = vmatmul.bf16.gmra.mxu0 %v1136_v49  ;;  %v477_v59 = vadd.f32 %v476_v52, %v388_v54 }
 0x102   :  { %515 = vmatmul.bf16.gmra.mxu1 %v1140_v50  ;;  %v1389_v50 = vld [vmem:[%s1954_s0 + $0x60] sm:$0xff] }
 0x106   :  { %v389_v55 = vpop.f32.mrf.mxu0 }
 0x107   :  { %v478_v56 = vpop.f32.mrf.mxu1  ;;  %v390_v57 = vadd.f32 %v1727_v19, %v389_v55  ;;  %v890_v49 = vpop.f32.mrf.mxu3 }
 0x109   :  { %v479_v60 = vadd.f32 %v478_v56, %v390_v57 }
 0x10a   :  { %1325 = vmatmul.msk.bf16.gmra.mxu3 %vm815_vm0, %v1389_v50 }
 0x10b   :  { %v566_v1 = vpack.c.bf16 %v479_v60, %v477_v59 }
 0x10d   :  { %678 = vmatmul.bf16.gmra.mxu2 %v566_v1 }
 0x10e   :  { %v392_v4 = vpop.f32.mrf.mxu0 }
 0x10f   :  { %v481_v5 = vpop.f32.mrf.mxu1  ;;  %v393_v8 = vadd.f32 %v1727_v19, %v392_v4  ;;  %v893_v56 = vpop.f32.mrf.mxu3 }
 0x111   :  { %431 = vmatmul.bf16.gmra.mxu0 %v1144_v2  ;;  %v482_v13 = vadd.f32 %v481_v5, %v393_v8 }
 0x112   :  { %520 = vmatmul.bf16.gmra.mxu1 %v1148_v3  ;;  %v1390_v3 = vld [vmem:[%s1954_s0 + $0x68] sm:$0xff] }
 0x116   :  { %v394_v9 = vpop.f32.mrf.mxu0 }
 0x117   :  { %v483_v10 = vpop.f32.mrf.mxu1  ;;  %v395_v11 = vadd.f32 %v1727_v19, %v394_v9  ;;  %v895_v2 = vpop.f32.mrf.mxu3 }
 0x119   :  { %v484_v14 = vadd.f32 %v483_v10, %v395_v11 }
 0x11a   :  { %1326 = vmatmul.msk.bf16.gmra.mxu3 %vm815_vm0, %v1390_v3 }
 0x11b   :  { %v567_v15 = vpack.c.bf16 %v484_v14, %v482_v13 }
 0x11d   :  { %683 = vmatmul.bf16.gmra.mxu2 %v567_v15 }
 0x11e   :  { %v397_v16 = vpop.f32.mrf.mxu0 }
 0x11f   :  { %v486_v17 = vpop.f32.mrf.mxu1  ;;  %v398_v21 = vadd.f32 %v1727_v19, %v397_v16  ;;  %v898_v9 = vpop.f32.mrf.mxu3 }
 0x121   :  { %v487_v26 = vadd.f32 %v486_v17, %v398_v21  ;;  %v1391_v21 = vld [vmem:[%s1954_s0 + $0x70] sm:$0xff] }
 0x126   :  { %v399_v22 = vpop.f32.mrf.mxu0 }
 0x127   :  { %v488_v23 = vpop.f32.mrf.mxu1  ;;  %v400_v24 = vadd.f32 %v1727_v19, %v399_v22  ;;  %v900_v20 = vpop.f32.mrf.mxu3 }
 0x129   :  { %v489_v27 = vadd.f32 %v488_v23, %v400_v24 }
 0x12a   :  { %1327 = vmatmul.msk.bf16.gmra.mxu3 %vm815_vm0, %v1391_v21 }
 0x12b   :  { %v568_v28 = vpack.c.bf16 %v489_v27, %v487_v26 }
 0x12d   :  { %688 = vmatmul.bf16.gmra.mxu2 %v568_v28 }
 0x12e   :  { %v402_v29 = vpop.f32.mrf.mxu0 }
 0x12f   :  { %v491_v30 = vpop.f32.mrf.mxu1  ;;  %v403_v34 = vadd.f32 %v1727_v19, %v402_v29 }
 0x130   :  { %v649_v31 = vpop.f32.mrf.mxu2 }
 0x131   :  { %v492_v40 = vadd.f32 %v491_v30, %v403_v34  ;;  %v874_v41 = vadd.f32 %v873_v58, %v649_v31  ;;  %v903_v31 = vpop.f32.mrf.mxu3 }
 0x136   :  { %v404_v35 = vpop.f32.mrf.mxu0 }
 0x137   :  { %v493_v36 = vpop.f32.mrf.mxu1  ;;  %v405_v37 = vadd.f32 %v1727_v19, %v404_v35 }
 0x138   :  { %v651_v38 = vpop.f32.mrf.mxu2 }
 0x139   :  { %v494_v42 = vadd.f32 %v493_v36, %v405_v37  ;;  %v876_v43 = vadd.f32 %v875_v6, %v651_v38  ;;  %v1392_v37 = vld [vmem:[%s1954_s0 + $0x78] sm:$0xff]  ;;  %v905_v38 = vpop.f32.mrf.mxu3 }
 0x13a   :  { %1328 = vmatmul.msk.bf16.gmra.mxu3 %vm815_vm0, %v1392_v37 }
 0x13b   :  { %v1405_v44 = vpack.c.bf16 %v876_v43, %v874_v41  ;;  %v569_v45 = vpack.c.bf16 %v494_v42, %v492_v40 }
 0x13d   :  { %1406 = vst [vmem:[%s1955_s6] sm:$0xff] %v1405_v44   ;;  %693 = vmatmul.bf16.gmra.mxu2 %v569_v45 }
 0x13e   :  { %v407_v46 = vpop.f32.mrf.mxu0 }
 0x13f   :  { %v496_v47 = vpop.f32.mrf.mxu1  ;;  %v408_v51 = vadd.f32 %v1727_v19, %v407_v46 }
 0x140   :  { %v654_v48 = vpop.f32.mrf.mxu2 }
 0x141   :  { %v497_v57 = vadd.f32 %v496_v47, %v408_v51  ;;  %v879_v58 = vadd.f32 %v878_v12, %v654_v48  ;;  %v908_v50 = vpop.f32.mrf.mxu3 }
 0x146   :  { %v409_v52 = vpop.f32.mrf.mxu0 }
 0x147   :  { %v498_v53 = vpop.f32.mrf.mxu1  ;;  %v410_v54 = vadd.f32 %v1727_v19, %v409_v52 }
 0x148   :  { %v656_v55 = vpop.f32.mrf.mxu2 }
 0x149   :  { %v499_v59 = vadd.f32 %v498_v53, %v410_v54  ;;  %v881_v60 = vadd.f32 %v880_v18, %v656_v55 }
 0x14b   :  { %v1410_v61 = vpack.c.bf16 %v881_v60, %v879_v58  ;;  %v570_v62 = vpack.c.bf16 %v499_v59, %v497_v57  ;;  %v910_v59 = vpop.f32.mrf.mxu3 }
 0x14d   :  { %1482 = vst [vmem:[%s1955_s6 + $0x8] sm:$0xff] %v1410_v61   ;;  %698 = vmatmul.bf16.gmra.mxu2 %v570_v62 }
 0x14e   :  { %v412_v63 = vpop.f32.mrf.mxu0 }
 0x14f   :  { %v501_v0 = vpop.f32.mrf.mxu1  ;;  %v413_v4 = vadd.f32 %v1727_v19, %v412_v63 }
 0x150   :  { %v659_v1 = vpop.f32.mrf.mxu2 }
 0x151   :  { %v502_v10 = vadd.f32 %v501_v0, %v413_v4  ;;  %v884_v11 = vadd.f32 %v883_v25, %v659_v1 }
 0x156   :  { %v414_v5 = vpop.f32.mrf.mxu0 }
 0x157   :  { %v503_v6 = vpop.f32.mrf.mxu1  ;;  %v415_v7 = vadd.f32 %v1727_v19, %v414_v5  ;;  %v913_v5 = vpop.f32.mrf.mxu3 }
 0x158   :  { %v661_v8 = vpop.f32.mrf.mxu2 }
 0x159   :  { %v504_v12 = vadd.f32 %v503_v6, %v415_v7  ;;  %v886_v13 = vadd.f32 %v885_v32, %v661_v8 }
 0x15b   :  { %v1415_v14 = vpack.c.bf16 %v886_v13, %v884_v11  ;;  %v571_v15 = vpack.c.bf16 %v504_v12, %v502_v10 }
 0x15d   :  { %1483 = vst [vmem:[%s1955_s6 + $0x10] sm:$0xff] %v1415_v14   ;;  %703 = vmatmul.bf16.gmra.mxu2 %v571_v15 }
 0x15e   :  { %v417_v16 = vpop.f32.mrf.mxu0 }
 0x15f   :  { %v506_v17 = vpop.f32.mrf.mxu1  ;;  %v418_v22 = vadd.f32 %v1727_v19, %v417_v16 }
 0x160   :  { %v664_v18 = vpop.f32.mrf.mxu2 }
 0x161   :  { %v507_v27 = vadd.f32 %v506_v17, %v418_v22  ;;  %v889_v28 = vadd.f32 %v888_v39, %v664_v18  ;;  %v915_v17 = vpop.f32.mrf.mxu3 }
 0x166   :  { %v419_v23 = vpop.f32.mrf.mxu0 }
 0x167   :  { %v508_v24 = vpop.f32.mrf.mxu1  ;;  %v420_v25 = vadd.f32 %v1727_v19, %v419_v23 }
 0x168   :  { %v666_v26 = vpop.f32.mrf.mxu2 }
 0x169   :  { %v509_v29 = vadd.f32 %v508_v24, %v420_v25  ;;  %v891_v30 = vadd.f32 %v890_v49, %v666_v26 }
 0x16b   :  { %v572_v32 = vpack.c.bf16 %v509_v29, %v507_v27  ;;  %v1420_v33 = vpack.c.bf16 %v891_v30, %v889_v28 }
 0x16d   :  { %1484 = vst [vmem:[%s1955_s6 + $0x18] sm:$0xff] %v1420_v33   ;;  %708 = vmatmul.bf16.gmra.mxu2 %v572_v32 }
 0x16e   :  { %v422_v34 = vpop.f32.mrf.mxu0 }
 0x16f   :  { %v511_v35 = vpop.f32.mrf.mxu1  ;;  %v423_v39 = vadd.f32 %v1727_v19, %v422_v34 }
 0x170   :  { %v669_v36 = vpop.f32.mrf.mxu2 }
 0x171   :  { %v512_v44 = vadd.f32 %v511_v35, %v423_v39  ;;  %v894_v45 = vadd.f32 %v893_v56, %v669_v36 }
 0x176   :  { %v424_v40 = vpop.f32.mrf.mxu0 }
 0x177   :  { %v513_v41 = vpop.f32.mrf.mxu1  ;;  %v425_v42 = vadd.f32 %v1727_v19, %v424_v40 }
 0x178   :  { %v671_v43 = vpop.f32.mrf.mxu2 }
 0x179   :  { %v514_v46 = vadd.f32 %v513_v41, %v425_v42  ;;  %v896_v47 = vadd.f32 %v895_v2, %v671_v43 }
 0x17b   :  { %v573_v48 = vpack.c.bf16 %v514_v46, %v512_v44  ;;  %v1425_v49 = vpack.c.bf16 %v896_v47, %v894_v45 }
 0x17d   :  { %1485 = vst [vmem:[%s1955_s6 + $0x20] sm:$0xff] %v1425_v49   ;;  %713 = vmatmul.bf16.gmra.mxu2 %v573_v48 }
 0x17e   :  { %v427_v51 = vpop.f32.mrf.mxu0 }
 0x17f   :  { %v516_v52 = vpop.f32.mrf.mxu1  ;;  %v428_v54 = vadd.f32 %v1727_v19, %v427_v51 }
 0x180   :  { %v674_v53 = vpop.f32.mrf.mxu2 }
 0x181   :  { %v517_v60 = vadd.f32 %v516_v52, %v428_v54  ;;  %v899_v61 = vadd.f32 %v898_v9, %v674_v53 }
 0x186   :  { %v429_v55 = vpop.f32.mrf.mxu0 }
 0x187   :  { %v518_v57 = vpop.f32.mrf.mxu1  ;;  %v430_v58 = vadd.f32 %v1727_v19, %v429_v55 }
 0x188   :  { %v676_v56 = vpop.f32.mrf.mxu2 }
 0x189   :  { %v519_v62 = vadd.f32 %v518_v57, %v430_v58  ;;  %v901_v63 = vadd.f32 %v900_v20, %v676_v56  ;;  %v918_v20 = vpop.f32.mrf.mxu3 }
 0x18b   :  { %v574_v0 = vpack.c.bf16 %v519_v62, %v517_v60  ;;  %v1430_v1 = vpack.c.bf16 %v901_v63, %v899_v61 }
 0x18d   :  { %1486 = vst [vmem:[%s1955_s6 + $0x28] sm:$0xff] %v1430_v1   ;;  %718 = vmatmul.bf16.gmra.mxu2 %v574_v0 }
 0x18e   :  { %v432_v2 = vpop.f32.mrf.mxu0 }
 0x18f   :  { %v521_v3 = vpop.f32.mrf.mxu1  ;;  %v433_v6 = vadd.f32 %v1727_v19, %v432_v2 }
 0x190   :  { %v679_v4 = vpop.f32.mrf.mxu2 }
 0x191   :  { %v522_v11 = vadd.f32 %v521_v3, %v433_v6  ;;  %v904_v12 = vadd.f32 %v903_v31, %v679_v4  ;;  %v920_v25 = vpop.f32.mrf.mxu3 }
 0x196   :  { %v434_v7 = vpop.f32.mrf.mxu0 }
 0x197   :  { %v435_v8 = vadd.f32 %v1727_v19, %v434_v7  ;;  %v523_v10 = vpop.f32.mrf.mxu1 }
 0x198   :  { %v681_v9 = vpop.f32.mrf.mxu2 }
 0x199   :  { %v524_v13 = vadd.f32 %v523_v10, %v435_v8  ;;  %v906_v14 = vadd.f32 %v905_v38, %v681_v9  ;;  %v923_v29 = vpop.f32.mrf.mxu3 }
 0x19b   :  { %v575_v15 = vpack.c.bf16 %v524_v13, %v522_v11  ;;  %v1435_v16 = vpack.c.bf16 %v906_v14, %v904_v12 }
 0x19d   :  { %1487 = vst [vmem:[%s1955_s6 + $0x30] sm:$0xff] %v1435_v16   ;;  %723 = vmatmul.bf16.gmra.mxu2 %v575_v15 }
 0x1a0   :  { %v684_v18 = vpop.f32.mrf.mxu2 }
 0x1a1   :  { %v909_v22 = vadd.f32 %v908_v50, %v684_v18  ;;  %v925_v32 = vpop.f32.mrf.mxu3 }
 0x1a8   :  { %v686_v21 = vpop.f32.mrf.mxu2 }
 0x1a9   :  { %v911_v23 = vadd.f32 %v910_v59, %v686_v21  ;;  %v928_v37 = vpop.f32.mrf.mxu3 }
 0x1ab   :  { %v1440_v19 = vpack.c.bf16 %v911_v23, %v909_v22 }
 0x1ad   :  { %1488 = vst [vmem:[%s1955_s6 + $0x38] sm:$0xff] %v1440_v19  }
 0x1b0   :  { %v689_v24 = vpop.f32.mrf.mxu2 }
 0x1b1   :  { %v914_v27 = vadd.f32 %v913_v5, %v689_v24  ;;  %v930_v40 = vpop.f32.mrf.mxu3 }
 0x1b8   :  { %v691_v26 = vpop.f32.mrf.mxu2 }
 0x1b9   :  { %v916_v28 = vadd.f32 %v915_v17, %v691_v26  ;;  %v933_v45 = vpop.f32.mrf.mxu3 }
 0x1bb   :  { %v1445_v30 = vpack.c.bf16 %v916_v28, %v914_v27 }
 0x1bd   :  { %1489 = vst [vmem:[%s1955_s6 + $0x40] sm:$0xff] %v1445_v30  }
 0x1c0   :  { %v694_v31 = vpop.f32.mrf.mxu2 }
 0x1c1   :  { %v919_v34 = vadd.f32 %v918_v20, %v694_v31  ;;  %v935_v50 = vpop.f32.mrf.mxu3 }
 0x1c8   :  { %v696_v33 = vpop.f32.mrf.mxu2 }
 0x1c9   :  { %v921_v35 = vadd.f32 %v920_v25, %v696_v33  ;;  %v938_v52 = vpop.f32.mrf.mxu3 }
 0x1cb   :  { %v1450_v36 = vpack.c.bf16 %v921_v35, %v919_v34 }
 0x1cd   :  { %1490 = vst [vmem:[%s1955_s6 + $0x48] sm:$0xff] %v1450_v36  }
 0x1d0   :  { %v699_v38 = vpop.f32.mrf.mxu2 }
 0x1d1   :  { %v924_v41 = vadd.f32 %v923_v29, %v699_v38  ;;  %v940_v56 = vpop.f32.mrf.mxu3 }
 0x1d8   :  { %v701_v39 = vpop.f32.mrf.mxu2 }
 0x1d9   :  { %v926_v42 = vadd.f32 %v925_v32, %v701_v39  ;;  %v943_v62 = vpop.f32.mrf.mxu3 }
 0x1db   :  { %v1455_v43 = vpack.c.bf16 %v926_v42, %v924_v41 }
 0x1dd   :  { %1491 = vst [vmem:[%s1955_s6 + $0x50] sm:$0xff] %v1455_v43  }
 0x1e0   :  { %v704_v44 = vpop.f32.mrf.mxu2 }
 0x1e1   :  { %v929_v47 = vadd.f32 %v928_v37, %v704_v44  ;;  %v945_v1 = vpop.f32.mrf.mxu3 }
 0x1e8   :  { %v706_v46 = vpop.f32.mrf.mxu2 }
 0x1e9   :  { %v931_v48 = vadd.f32 %v930_v40, %v706_v46  ;;  %v948_v6 = vpop.f32.mrf.mxu3 }
 0x1eb   :  { %v1460_v49 = vpack.c.bf16 %v931_v48, %v929_v47 }
 0x1ed   :  { %1492 = vst [vmem:[%s1955_s6 + $0x58] sm:$0xff] %v1460_v49  }
 0x1f0   :  { %v709_v51 = vpop.f32.mrf.mxu2 }
 0x1f1   :  { %v934_v54 = vadd.f32 %v933_v45, %v709_v51  ;;  %v950_v8 = vpop.f32.mrf.mxu3 }
 0x1f8   :  { %v711_v53 = vpop.f32.mrf.mxu2 }
 0x1f9   :  { %v936_v55 = vadd.f32 %v935_v50, %v711_v53 }
 0x1fb   :  { %v1465_v57 = vpack.c.bf16 %v936_v55, %v934_v54 }
 0x1fd   :  { %1493 = vst [vmem:[%s1955_s6 + $0x60] sm:$0xff] %v1465_v57  }
 0x200   :  { %v714_v58 = vpop.f32.mrf.mxu2 }
 0x201   :  { %v939_v60 = vadd.f32 %v938_v52, %v714_v58 }
 0x208   :  { %v716_v59 = vpop.f32.mrf.mxu2 }
 0x209   :  { %v941_v61 = vadd.f32 %v940_v56, %v716_v59 }
 0x20b   :  { %v1470_v63 = vpack.c.bf16 %v941_v61, %v939_v60 }
 0x20d   :  { %1494 = vst [vmem:[%s1955_s6 + $0x68] sm:$0xff] %v1470_v63  }
 0x210   :  { %v719_v0 = vpop.f32.mrf.mxu2 }
 0x211   :  { %v944_v3 = vadd.f32 %v943_v62, %v719_v0 }
 0x218   :  { %v721_v2 = vpop.f32.mrf.mxu2 }
 0x219   :  { %v946_v4 = vadd.f32 %v945_v1, %v721_v2 }
 0x21b   :  { %v1475_v5 = vpack.c.bf16 %v946_v4, %v944_v3 }
 0x21d   :  { %1495 = vst [vmem:[%s1955_s6 + $0x70] sm:$0xff] %v1475_v5  }
 0x220   :  { %v724_v7 = vpop.f32.mrf.mxu2 }
 0x221   :  { %v949_v9 = vadd.f32 %v948_v6, %v724_v7 }
 0x228   :  { %v726_v10 = vpop.f32.mrf.mxu2 }
 0x229   :  { %v951_v11 = vadd.f32 %v950_v8, %v726_v10 }
 0x22b   :  { %v1480_v12 = vpack.c.bf16 %v951_v11, %v949_v9 }
 0x22d   :  { %1496 = vst [vmem:[%s1955_s6 + $0x78] sm:$0xff] %v1480_v12  }

// kernel: basic_gnn_forward.5
= control target key start
LH: loop header
LB: loop body
LE: loop exit
PB: predicated region body
PF: predicated region fallthrough
CT: control target
= control target key end

     0   :  { %s1472_s1 = inlined_call_operand.vmem [shape: bf16[256,128], index: 1, kind: input, shape index: {}]   ;;  %s1473_s0 = inlined_call_operand.vmem [shape: s8[256,256], index: 0, kind: input, shape index: {}]   ;;  %s1474_s2 = inlined_call_operand.vmem [shape: f32[1,128], index: 2, kind: input, shape index: {}]   ;;  %s1475_s3 = inlined_call_operand.vmem [shape: bf16[128,128], index: 3, kind: input, shape index: {}]   ;;  %s1476_s4 = inlined_call_operand.vmem [shape: bf16[256,128], index: 4, kind: output, shape index: {}]  }
   0x1   :  { %v1081_v0 = vld [vmem:[%s1472_s1 + $0x38] sm:$0xff]  ;;  %v1080_v2 = vld [vmem:[%s1472_s1 + $0x30] sm:$0xff]  ;;  %v1079_v4 = vld [vmem:[%s1472_s1 + $0x28] sm:$0xff] }
   0x2   :  { %v1089_v1 = vld [vmem:[%s1472_s1 + $0x78] sm:$0xff]  ;;  %394 = vmatpush.bf16.msra.mxu0 %v1081_v0  ;;  %1193 = vmatpush.bf16.msra.mxu3 %v1081_v0  ;;  %v1088_v3 = vld [vmem:[%s1472_s1 + $0x70] sm:$0xff]  ;;  %v1087_v5 = vld [vmem:[%s1472_s1 + $0x68] sm:$0xff] }
   0x3   :  { %483 = vmatpush.bf16.msra.mxu1 %v1089_v1  ;;  %v1078_v6 = vld [vmem:[%s1472_s1 + $0x20] sm:$0xff]  ;;  %v1077_v8 = vld [vmem:[%s1472_s1 + $0x18] sm:$0xff]  ;;  %v1076_v10 = vld [vmem:[%s1472_s1 + $0x10] sm:$0xff] }
   0x4   :  { %v1086_v7 = vld [vmem:[%s1472_s1 + $0x60] sm:$0xff]  ;;  %v1085_v9 = vld [vmem:[%s1472_s1 + $0x58] sm:$0xff]  ;;  %v1084_v13 = vld [vmem:[%s1472_s1 + $0x50] sm:$0xff] }
   0x5   :  { %v54_v11 = vld [vmem:[%s1473_s0] sm:$0xff]  ;;  %v55_v14 = vld [vmem:[%s1473_s0 + $0x8] sm:$0xff]  ;;  %v56_v49 = vld [vmem:[%s1473_s0 + $0x10] sm:$0xff] }
   0x6   :  { %395 = vmatpush.bf16.msra.mxu0 %v1080_v2  ;;  %1194 = vmatpush.bf16.msra.mxu3 %v1080_v2  ;;  %v66_v12 = vld [vmem:[%s1473_s0 + $0x60] sm:$0xff]  ;;  %v70_v15 = vunpack.c.0.s8 %v54_v11  ;;  %v72_v16 = vunpack.c.1.s8 %v54_v11  ;;  %v1075_v19 = vld [vmem:[%s1472_s1 + $0x8] sm:$0xff]  ;;  %v71_v20 = vunpack.c.0.s8 %v55_v14  ;;  %v73_v21 = vunpack.c.1.s8 %v55_v14  ;;  %v68_v50 = vld [vmem:[%s1473_s0 + $0x70] sm:$0xff] }
   0x7   :  { %484 = vmatpush.bf16.msra.mxu1 %v1088_v3  ;;  %v118_v17 = vunpack.c.0.s8 %v66_v12  ;;  %v120_v18 = vunpack.c.1.s8 %v66_v12  ;;  %v1083_v22 = vld [vmem:[%s1472_s1 + $0x48] sm:$0xff]  ;;  %v1074_v27 = vld [vmem:[%s1472_s1] sm:$0xff]  ;;  %v74_v34 = vunpack.c.2.s8 %v54_v11  ;;  %v76_v35 = vunpack.c.3.s8 %v54_v11  ;;  %v57_v51 = vld [vmem:[%s1473_s0 + $0x18] sm:$0xff] }
   0x8   :  { %v134_v23 = vcvt.s32.f32 %v70_v15  ;;  %v136_v24 = vcvt.s32.f32 %v72_v16  ;;  %v135_v28 = vcvt.s32.f32 %v71_v20  ;;  %v137_v29 = vcvt.s32.f32 %v73_v21  ;;  %v1082_v30 = vld [vmem:[%s1472_s1 + $0x40] sm:$0xff]  ;;  %v59_v20 = vld [vmem:[%s1473_s0 + $0x28] sm:$0xff] }
   0x9   :  { %v182_v25 = vcvt.s32.f32 %v118_v17  ;;  %v184_v26 = vcvt.s32.f32 %v120_v18  ;;  %v122_v36 = vunpack.c.2.s8 %v66_v12  ;;  %v124_v37 = vunpack.c.3.s8 %v66_v12  ;;  %v58_v18 = vld [vmem:[%s1473_s0 + $0x20] sm:$0xff] }
   0xa   :  { %396 = vmatpush.bf16.msra.mxu0 %v1079_v4  ;;  %1195 = vmatpush.bf16.msra.mxu3 %v1079_v4  ;;  %v198_v31 = vpack.c.bf16 %v136_v24, %v134_v23  ;;  %v199_v33 = vpack.c.bf16 %v137_v29, %v135_v28  ;;  %v75_v38 = vunpack.c.2.s8 %v55_v14  ;;  %v77_v39 = vunpack.c.3.s8 %v55_v14 }
   0xb   :  { %485 = vmatpush.bf16.msra.mxu1 %v1087_v5  ;;  %v222_v32 = vpack.c.bf16 %v184_v26, %v182_v25  ;;  %v138_v40 = vcvt.s32.f32 %v74_v34  ;;  %v140_v41 = vcvt.s32.f32 %v76_v35  ;;  %v186_v42 = vcvt.s32.f32 %v122_v36  ;;  %v1097_v36 = vld [vmem:[%s1475_s3 + $0x38] sm:$0xff] }
   0xc   :  { %v188_v43 = vcvt.s32.f32 %v124_v37  ;;  %v139_v44 = vcvt.s32.f32 %v75_v38  ;;  %v141_v45 = vcvt.s32.f32 %v77_v39  ;;  %v78_v52 = vunpack.c.0.s8 %v56_v49  ;;  %819 = vmatpush.bf16.msra.mxu2 %v1097_v36 }
   0xd   :  { %v200_v46 = vpack.c.bf16 %v140_v41, %v138_v40  ;;  %v80_v53 = vunpack.c.1.s8 %v56_v49  ;;  %v126_v54 = vunpack.c.0.s8 %v68_v50  ;;  %v128_v55 = vunpack.c.1.s8 %v68_v50 }
   0xe   :  { %397 = vmatpush.bf16.msra.mxu0 %v1078_v6  ;;  %1196 = vmatpush.bf16.msra.mxu3 %v1078_v6  ;;  %v224_v47 = vpack.c.bf16 %v188_v43, %v186_v42  ;;  %v201_v48 = vpack.c.bf16 %v141_v45, %v139_v44  ;;  %v79_v56 = vunpack.c.0.s8 %v57_v51  ;;  %v81_v57 = vunpack.c.1.s8 %v57_v51 }
   0xf   :  { %486 = vmatpush.bf16.msra.mxu1 %v1086_v7  ;;  %v142_v58 = vcvt.s32.f32 %v78_v52  ;;  %v144_v59 = vcvt.s32.f32 %v80_v53  ;;  %v190_v60 = vcvt.s32.f32 %v126_v54  ;;  %v192_v61 = vcvt.s32.f32 %v128_v55  ;;  %v60_v52 = vld [vmem:[%s1473_s0 + $0x30] sm:$0xff]  ;;  %v69_v53 = vld [vmem:[%s1473_s0 + $0x78] sm:$0xff] }
  0x10   :  { %v143_v62 = vcvt.s32.f32 %v79_v56  ;;  %v145_v63 = vcvt.s32.f32 %v81_v57  ;;  %v84_v4 = vunpack.c.3.s8 %v56_v49  ;;  %v132_v6 = vunpack.c.3.s8 %v68_v50  ;;  %v1096_v54 = vld [vmem:[%s1475_s3 + $0x30] sm:$0xff]  ;;  %v61_v55 = vld [vmem:[%s1473_s0 + $0x38] sm:$0xff]  ;;  %v1095_v56 = vld [vmem:[%s1475_s3 + $0x28] sm:$0xff] }
  0x11   :  { %v202_v0 = vpack.c.bf16 %v144_v59, %v142_v58  ;;  %v86_v21 = vunpack.c.0.s8 %v58_v18  ;;  %v87_v25 = vunpack.c.0.s8 %v59_v20  ;;  %v89_v26 = vunpack.c.1.s8 %v59_v20  ;;  %820 = vmatpush.bf16.msra.mxu2 %v1096_v54 }
  0x12   :  { %398 = vmatpush.bf16.msra.mxu0 %v1077_v8  ;;  %1197 = vmatpush.bf16.msra.mxu3 %v1077_v8  ;;  %v203_v2 = vpack.c.bf16 %v145_v63, %v143_v62  ;;  %v85_v8 = vunpack.c.3.s8 %v57_v51  ;;  %v196_v12 = vcvt.s32.f32 %v132_v6  ;;  %v90_v37 = vunpack.c.2.s8 %v58_v18  ;;  %v1094_v63 = vld [vmem:[%s1475_s3 + $0x20] sm:$0xff] }
  0x13   :  { %487 = vmatpush.bf16.msra.mxu1 %v1085_v9  ;;  %v92_v38 = vunpack.c.3.s8 %v58_v18  ;;  %v91_v41 = vunpack.c.2.s8 %v59_v20  ;;  %v93_v42 = vunpack.c.3.s8 %v59_v20  ;;  %v94_v57 = vunpack.c.0.s8 %v60_v52 }
  0x14   :  { %v149_v14 = vcvt.s32.f32 %v85_v8  ;;  %v154_v43 = vcvt.s32.f32 %v90_v37  ;;  %v96_v58 = vunpack.c.1.s8 %v60_v52  ;;  %v127_v59 = vunpack.c.0.s8 %v69_v53 }
  0x15   :  { %v156_v44 = vcvt.s32.f32 %v92_v38  ;;  %v97_v62 = vunpack.c.1.s8 %v61_v55  ;;  %821 = vmatpush.bf16.msra.mxu2 %v1095_v56 }
  0x16   :  { %399 = vmatpush.bf16.msra.mxu0 %v1076_v10  ;;  %1198 = vmatpush.bf16.msra.mxu3 %v1076_v10  ;;  %v148_v10 = vcvt.s32.f32 %v84_v4 }
  0x17   :  { %488 = vmatpush.bf16.msra.mxu1 %v1084_v13 }
  0x19   :  { %822 = vmatpush.bf16.msra.mxu2 %v1094_v63 }
  0x1a   :  { %400 = vmatpush.bf16.msra.mxu0 %v1075_v19  ;;  %1199 = vmatpush.bf16.msra.mxu3 %v1075_v19  ;;  %v67_v19 = vld [vmem:[%s1473_s0 + $0x68] sm:$0xff] }
  0x1b   :  { %489 = vmatpush.bf16.msra.mxu1 %v1083_v22  ;;  %v119_v23 = vunpack.c.0.s8 %v67_v19  ;;  %v121_v24 = vunpack.c.1.s8 %v67_v19  ;;  %v123_v39 = vunpack.c.2.s8 %v67_v19  ;;  %v125_v40 = vunpack.c.3.s8 %v67_v19 }
  0x1d   :  { %v183_v29 = vcvt.s32.f32 %v119_v23  ;;  %v187_v45 = vcvt.s32.f32 %v123_v39 }
  0x1e   :  { %401 = vmatpush.bf16.msra.mxu0 %v1074_v27  ;;  %1200 = vmatpush.bf16.msra.mxu3 %v1074_v27  ;;  %v150_v27 = vcvt.s32.f32 %v86_v21 }
  0x1f   :  { %490 = vmatpush.bf16.msra.mxu1 %v1082_v30 }
  0x21   :  { %402 = vmatmul.bf16.vlgmr.msra.gmra.mxu0 %v198_v31  ;;  %462 = vmatmul.bf16.vlgmr.msra.gmra.mxu3 %v222_v32  ;;  %v151_v31 = vcvt.s32.f32 %v87_v25  ;;  %v153_v32 = vcvt.s32.f32 %v89_v26 }
  0x22   :  { %1201 = vmatpush.bf16.msrb.mxu3 %v1089_v1  ;;  %491 = vmatmul.bf16.vlgmr.msra.gmra.mxu1 %v199_v33  ;;  %v226_v1 = vpack.c.bf16 %v192_v61, %v190_v60  ;;  %v129_v60 = vunpack.c.1.s8 %v69_v53  ;;  %v95_v61 = vunpack.c.0.s8 %v61_v55 }
  0x23   :  { %v207_v35 = vpack.c.bf16 %v153_v32, %v151_v31 }
  0x24   :  { %v159_v4 = vcvt.s32.f32 %v95_v61 }
  0x26   :  { %1202 = vmatpush.bf16.msrb.mxu3 %v1088_v3  ;;  %v82_v3 = vunpack.c.2.s8 %v56_v49  ;;  %v208_v49 = vpack.c.bf16 %v156_v44, %v154_v43  ;;  %v1360_v43 = vld [vmem:[%s1474_s2] ss:$0 sm:$0xff] }
  0x2a   :  { %1203 = vmatpush.bf16.msrb.mxu3 %v1087_v5  ;;  %v130_v5 = vunpack.c.2.s8 %v68_v50 }
  0x2c   :  { %v194_v11 = vcvt.s32.f32 %v130_v5  ;;  %v161_v5 = vcvt.s32.f32 %v97_v62 }
  0x2e   :  { %1204 = vmatpush.bf16.msrb.mxu3 %v1086_v7  ;;  %v83_v7 = vunpack.c.2.s8 %v57_v51  ;;  %v228_v16 = vpack.c.bf16 %v196_v12, %v194_v11  ;;  %v211_v8 = vpack.c.bf16 %v161_v5, %v159_v4  ;;  %v98_v11 = vunpack.c.2.s8 %v60_v52 }
  0x2f   :  { %v100_v12 = vunpack.c.3.s8 %v60_v52 }
  0x31   :  { %407 = vmatmul.bf16.gmra.mxu0 %v200_v46  ;;  %467 = vmatmul.bf16.gmra.mxu3 %v224_v47  ;;  %v189_v46 = vcvt.s32.f32 %v125_v40  ;;  %v155_v47 = vcvt.s32.f32 %v91_v41  ;;  %v164_v19 = vcvt.s32.f32 %v100_v12 }
  0x32   :  { %1205 = vmatpush.bf16.msrb.mxu3 %v1085_v9  ;;  %496 = vmatmul.bf16.gmra.mxu1 %v201_v48  ;;  %v146_v9 = vcvt.s32.f32 %v82_v3  ;;  %v157_v48 = vcvt.s32.f32 %v93_v42  ;;  %v193_v3 = vcvt.s32.f32 %v129_v60 }
  0x33   :  { %v225_v50 = vpack.c.bf16 %v189_v46, %v187_v45 }
  0x34   :  { %v204_v15 = vpack.c.bf16 %v148_v10, %v146_v9  ;;  %v209_v51 = vpack.c.bf16 %v157_v48, %v155_v47  ;;  %v1093_v9 = vld [vmem:[%s1475_s3 + $0x18] sm:$0xff]  ;;  %v1092_v10 = vld [vmem:[%s1475_s3 + $0x10] sm:$0xff] }
  0x35   :  { %823 = vmatpush.bf16.msra.mxu2 %v1093_v9 }
  0x36   :  { %1206 = vmatpush.bf16.msrb.mxu3 %v1084_v13  ;;  %v147_v13 = vcvt.s32.f32 %v83_v7 }
  0x38   :  { %v205_v17 = vpack.c.bf16 %v149_v14, %v147_v13  ;;  %v131_v13 = vunpack.c.2.s8 %v69_v53  ;;  %v133_v14 = vunpack.c.3.s8 %v69_v53 }
  0x39   :  { %824 = vmatpush.bf16.msra.mxu2 %v1092_v10 }
  0x3a   :  { %1207 = vmatpush.bf16.msrb.mxu3 %v1083_v22  ;;  %v88_v22 = vunpack.c.1.s8 %v58_v18  ;;  %v162_v18 = vcvt.s32.f32 %v98_v11  ;;  %v195_v20 = vcvt.s32.f32 %v131_v13  ;;  %v197_v21 = vcvt.s32.f32 %v133_v14 }
  0x3c   :  { %v152_v28 = vcvt.s32.f32 %v88_v22  ;;  %v212_v25 = vpack.c.bf16 %v164_v19, %v162_v18  ;;  %v229_v26 = vpack.c.bf16 %v197_v21, %v195_v20 }
  0x3e   :  { %1208 = vmatpush.bf16.msrb.mxu3 %v1082_v30  ;;  %v185_v30 = vcvt.s32.f32 %v121_v24  ;;  %v206_v33 = vpack.c.bf16 %v152_v28, %v150_v27  ;;  %v1090_v24 = vld [vmem:[%s1475_s3] sm:$0xff] }
  0x3f   :  { %v62_v28 = vld [vmem:[%s1473_s0 + $0x40] sm:$0xff] }
  0x40   :  { %v223_v34 = vpack.c.bf16 %v185_v30, %v183_v29  ;;  %v63_v29 = vld [vmem:[%s1473_s0 + $0x48] sm:$0xff]  ;;  %v102_v30 = vunpack.c.0.s8 %v62_v28  ;;  %v104_v31 = vunpack.c.1.s8 %v62_v28  ;;  %v106_v45 = vunpack.c.2.s8 %v62_v28 }
  0x41   :  { %412 = vmatmul.bf16.gmra.mxu0 %v202_v0  ;;  %472 = vmatmul.bf16.gmra.mxu3 %v226_v1  ;;  %v158_v0 = vcvt.s32.f32 %v94_v57  ;;  %v160_v1 = vcvt.s32.f32 %v96_v58  ;;  %v103_v32 = vunpack.c.0.s8 %v63_v29  ;;  %v108_v46 = vunpack.c.3.s8 %v62_v28 }
  0x42   :  { %501 = vmatmul.bf16.gmra.mxu1 %v203_v2  ;;  %1209 = vmatpush.bf16.msra.mxu3 %v1097_v36  ;;  %v191_v2 = vcvt.s32.f32 %v127_v59  ;;  %v107_v48 = vunpack.c.2.s8 %v63_v29  ;;  %v170_v53 = vcvt.s32.f32 %v106_v45 }
  0x43   :  { %v210_v6 = vpack.c.bf16 %v160_v1, %v158_v0  ;;  %v167_v36 = vcvt.s32.f32 %v103_v32 }
  0x44   :  { %v227_v7 = vpack.c.bf16 %v193_v3, %v191_v2  ;;  %v64_v2 = vld [vmem:[%s1473_s0 + $0x50] sm:$0xff]  ;;  %v65_v3 = vld [vmem:[%s1473_s0 + $0x58] sm:$0xff] }
  0x45   :  { %v115_v32 = vunpack.c.2.s8 %v65_v3 }
  0x46   :  { %1210 = vmatpush.bf16.msra.mxu3 %v1096_v54  ;;  %v172_v54 = vcvt.s32.f32 %v108_v46 }
  0x48   :  { %v216_v61 = vpack.c.bf16 %v172_v54, %v170_v53 }
  0x4a   :  { %1211 = vmatpush.bf16.msra.mxu3 %v1095_v56  ;;  %v171_v56 = vcvt.s32.f32 %v107_v48 }
  0x4e   :  { %1212 = vmatpush.bf16.msra.mxu3 %v1094_v63 }
  0x51   :  { %417 = vmatmul.bf16.gmra.mxu0 %v204_v15  ;;  %477 = vmatmul.bf16.gmra.mxu3 %v228_v16  ;;  %v99_v15 = vunpack.c.2.s8 %v61_v55  ;;  %v101_v16 = vunpack.c.3.s8 %v61_v55 }
  0x52   :  { %506 = vmatmul.bf16.gmra.mxu1 %v205_v17  ;;  %1213 = vmatpush.bf16.msra.mxu3 %v1093_v9  ;;  %v1091_v17 = vld [vmem:[%s1475_s3 + $0x8] sm:$0xff]  ;;  %v111_v9 = vunpack.c.0.s8 %v65_v3 }
  0x53   :  { %v163_v22 = vcvt.s32.f32 %v99_v15  ;;  %v165_v23 = vcvt.s32.f32 %v101_v16  ;;  %825 = vmatpush.bf16.msra.mxu2 %v1091_v17 }
  0x55   :  { %v213_v27 = vpack.c.bf16 %v165_v23, %v163_v22 }
  0x56   :  { %1214 = vmatpush.bf16.msra.mxu3 %v1092_v10  ;;  %v113_v10 = vunpack.c.1.s8 %v65_v3 }
  0x57   :  { %826 = vmatpush.bf16.msra.mxu2 %v1090_v24 }
  0x58   :  { %v177_v18 = vcvt.s32.f32 %v113_v10 }
  0x5a   :  { %1215 = vmatpush.bf16.msra.mxu3 %v1091_v17  ;;  %v175_v17 = vcvt.s32.f32 %v111_v9 }
  0x5e   :  { %1216 = vmatpush.bf16.msra.mxu3 %v1090_v24 }
  0x61   :  { %422 = vmatmul.bf16.gmra.mxu0 %v206_v33  ;;  %551 = vmatmul.bf16.vlgmr.msrb.gmra.mxu3 %v223_v34  ;;  %v105_v33 = vunpack.c.1.s8 %v63_v29  ;;  %v166_v34 = vcvt.s32.f32 %v102_v30  ;;  %v116_v30 = vunpack.c.3.s8 %v64_v2 }
  0x62   :  { %511 = vmatmul.bf16.gmra.mxu1 %v207_v35  ;;  %v168_v35 = vcvt.s32.f32 %v104_v31 }
  0x63   :  { %v169_v37 = vcvt.s32.f32 %v105_v33  ;;  %v117_v33 = vunpack.c.3.s8 %v65_v3 }
  0x64   :  { %v214_v38 = vpack.c.bf16 %v168_v35, %v166_v34 }
  0x65   :  { %v215_v40 = vpack.c.bf16 %v169_v37, %v167_v36 }
  0x71   :  { %427 = vmatmul.bf16.gmra.mxu0 %v208_v49  ;;  %556 = vmatmul.bf16.gmra.mxu3 %v225_v50  ;;  %v109_v49 = vunpack.c.3.s8 %v63_v29  ;;  %v114_v29 = vunpack.c.2.s8 %v64_v2 }
  0x72   :  { %516 = vmatmul.bf16.gmra.mxu1 %v209_v51 }
  0x73   :  { %v173_v57 = vcvt.s32.f32 %v109_v49  ;;  %v178_v37 = vcvt.s32.f32 %v114_v29 }
  0x75   :  { %v217_v0 = vpack.c.bf16 %v173_v57, %v171_v56 }
  0x81   :  { %432 = vmatmul.bf16.gmra.mxu0 %v210_v6  ;;  %561 = vmatmul.bf16.gmra.mxu3 %v227_v7  ;;  %v110_v6 = vunpack.c.0.s8 %v64_v2  ;;  %v112_v7 = vunpack.c.1.s8 %v64_v2 }
  0x82   :  { %521 = vmatmul.bf16.gmra.mxu1 %v211_v8 }
  0x83   :  { %v174_v14 = vcvt.s32.f32 %v110_v6  ;;  %v176_v15 = vcvt.s32.f32 %v112_v7 }
  0x85   :  { %v218_v22 = vpack.c.bf16 %v176_v15, %v174_v14 }
  0x91   :  { %437 = vmatmul.bf16.gmra.mxu0 %v212_v25  ;;  %566 = vmatmul.bf16.gmra.mxu3 %v229_v26  ;;  %v219_v25 = vpack.c.bf16 %v177_v18, %v175_v17 }
  0x92   :  { %526 = vmatmul.bf16.gmra.mxu1 %v213_v27 }
  0x9e   :  { %v403_v39 = vpop.f32.mrf.mxu0 }
  0x9f   :  { %v492_v41 = vpop.f32.mrf.mxu1 }
  0xa0   :  { %v493_v42 = vadd.f32 %v492_v41, %v403_v39  ;;  %v181_v41 = vcvt.s32.f32 %v117_v33 }
  0xa1   :  { %442 = vmatmul.bf16.gmra.mxu0 %v214_v38  ;;  %v180_v38 = vcvt.s32.f32 %v116_v30 }
  0xa2   :  { %531 = vmatmul.bf16.gmra.mxu1 %v215_v40  ;;  %v675_v51 = vadd.f32 %v1360_v43, %v493_v42  ;;  %v179_v40 = vcvt.s32.f32 %v115_v32 }
  0xa4   :  { %v1362_v44 = vpop.f32.mrf.mxu3  ;;  %v707_v58 = vmax.f32 %v675_v51, 0.0 }
  0xa6   :  { %v405_v47 = vpop.f32.mrf.mxu0 }
  0xa7   :  { %v494_v50 = vpop.f32.mrf.mxu1 }
  0xa8   :  { %v495_v52 = vadd.f32 %v494_v50, %v405_v47  ;;  %v220_v47 = vpack.c.bf16 %v180_v38, %v178_v37  ;;  %v221_v50 = vpack.c.bf16 %v181_v41, %v179_v40 }
  0xaa   :  { %v676_v55 = vadd.f32 %v1360_v43, %v495_v52 }
  0xac   :  { %v708_v59 = vmax.f32 %v676_v55, 0.0  ;;  %v1366_v60 = vpop.f32.mrf.mxu3 }
  0xae   :  { %v408_v62 = vpop.f32.mrf.mxu0  ;;  %v739_v63 = vpack.c.bf16 %v708_v59, %v707_v58 }
  0xaf   :  { %v497_v1 = vpop.f32.mrf.mxu1 }
  0xb0   :  { %827 = vmatmul.bf16.vlgmr.msra.gmra.mxu2 %v739_v63  ;;  %v498_v4 = vadd.f32 %v497_v1, %v408_v62 }
  0xb1   :  { %447 = vmatmul.bf16.gmra.mxu0 %v216_v61 }
  0xb2   :  { %536 = vmatmul.bf16.gmra.mxu1 %v217_v0  ;;  %v677_v12 = vadd.f32 %v1360_v43, %v498_v4 }
  0xb4   :  { %v1374_v5 = vpop.f32.mrf.mxu3  ;;  %v709_v19 = vmax.f32 %v677_v12, 0.0 }
  0xb6   :  { %v410_v8 = vpop.f32.mrf.mxu0 }
  0xb7   :  { %v499_v11 = vpop.f32.mrf.mxu1 }
  0xb8   :  { %v500_v13 = vadd.f32 %v499_v11, %v410_v8 }
  0xba   :  { %v678_v16 = vadd.f32 %v1360_v43, %v500_v13 }
  0xbc   :  { %v710_v20 = vmax.f32 %v678_v16, 0.0  ;;  %v1378_v21 = vpop.f32.mrf.mxu3 }
  0xbe   :  { %v413_v23 = vpop.f32.mrf.mxu0  ;;  %v740_v24 = vpack.c.bf16 %v710_v20, %v709_v19 }
  0xbf   :  { %v502_v26 = vpop.f32.mrf.mxu1 }
  0xc0   :  { %832 = vmatmul.bf16.gmra.mxu2 %v740_v24  ;;  %v503_v27 = vadd.f32 %v502_v26, %v413_v23 }
  0xc1   :  { %452 = vmatmul.bf16.gmra.mxu0 %v218_v22 }
  0xc2   :  { %541 = vmatmul.bf16.gmra.mxu1 %v219_v25  ;;  %v679_v35 = vadd.f32 %v1360_v43, %v503_v27 }
  0xc4   :  { %v1380_v28 = vpop.f32.mrf.mxu3  ;;  %v711_v42 = vmax.f32 %v679_v35, 0.0 }
  0xc6   :  { %v415_v31 = vpop.f32.mrf.mxu0 }
  0xc7   :  { %v504_v34 = vpop.f32.mrf.mxu1 }
  0xc8   :  { %v505_v36 = vadd.f32 %v504_v34, %v415_v31 }
  0xca   :  { %v680_v39 = vadd.f32 %v1360_v43, %v505_v36 }
  0xcc   :  { %v712_v45 = vmax.f32 %v680_v39, 0.0  ;;  %v1384_v46 = vpop.f32.mrf.mxu3 }
  0xce   :  { %v418_v48 = vpop.f32.mrf.mxu0  ;;  %v741_v49 = vpack.c.bf16 %v712_v45, %v711_v42 }
  0xcf   :  { %v507_v51 = vpop.f32.mrf.mxu1 }
  0xd0   :  { %837 = vmatmul.bf16.gmra.mxu2 %v741_v49  ;;  %v508_v52 = vadd.f32 %v507_v51, %v418_v48 }
  0xd1   :  { %457 = vmatmul.bf16.gmra.mxu0 %v220_v47 }
  0xd2   :  { %546 = vmatmul.bf16.gmra.mxu1 %v221_v50  ;;  %v681_v56 = vadd.f32 %v1360_v43, %v508_v52 }
  0xd4   :  { %v1386_v53 = vpop.f32.mrf.mxu3  ;;  %v713_v59 = vmax.f32 %v681_v56, 0.0 }
  0xd6   :  { %v420_v54 = vpop.f32.mrf.mxu0 }
  0xd7   :  { %v509_v55 = vpop.f32.mrf.mxu1 }
  0xd8   :  { %v510_v57 = vadd.f32 %v509_v55, %v420_v54 }
  0xda   :  { %v682_v58 = vadd.f32 %v1360_v43, %v510_v57 }
  0xdc   :  { %v714_v61 = vmax.f32 %v682_v58, 0.0  ;;  %v1390_v62 = vpop.f32.mrf.mxu3 }
  0xde   :  { %v423_v63 = vpop.f32.mrf.mxu0  ;;  %v742_v0 = vpack.c.bf16 %v714_v61, %v713_v59 }
  0xdf   :  { %v512_v1 = vpop.f32.mrf.mxu1 }
  0xe0   :  { %842 = vmatmul.bf16.gmra.mxu2 %v742_v0  ;;  %v513_v2 = vadd.f32 %v512_v1, %v423_v63 }
  0xe2   :  { %v683_v7 = vadd.f32 %v1360_v43, %v513_v2 }
  0xe4   :  { %v552_v3 = vpop.f32.mrf.mxu3  ;;  %v715_v11 = vmax.f32 %v683_v7, 0.0 }
  0xe5   :  { %v553_v9 = vadd.f32 %v552_v3, %v1362_v44 }
  0xe6   :  { %v425_v4 = vpop.f32.mrf.mxu0 }
  0xe7   :  { %v514_v6 = vpop.f32.mrf.mxu1  ;;  %v699_v14 = vadd.f32 %v1360_v43, %v553_v9 }
  0xe8   :  { %v515_v8 = vadd.f32 %v514_v6, %v425_v4 }
  0xe9   :  { %v731_v20 = vmax.f32 %v699_v14, 0.0 }
  0xea   :  { %v684_v10 = vadd.f32 %v1360_v43, %v515_v8 }
  0xec   :  { %v716_v12 = vmax.f32 %v684_v10, 0.0  ;;  %v554_v13 = vpop.f32.mrf.mxu3 }
  0xed   :  { %v555_v15 = vadd.f32 %v554_v13, %v1366_v60 }
  0xee   :  { %v428_v16 = vpop.f32.mrf.mxu0  ;;  %v743_v17 = vpack.c.bf16 %v716_v12, %v715_v11 }
  0xef   :  { %v700_v18 = vadd.f32 %v1360_v43, %v555_v15  ;;  %v517_v19 = vpop.f32.mrf.mxu1 }
  0xf0   :  { %847 = vmatmul.bf16.gmra.mxu2 %v743_v17  ;;  %v518_v24 = vadd.f32 %v517_v19, %v428_v16 }
  0xf1   :  { %v732_v22 = vmax.f32 %v700_v18, 0.0 }
  0xf2   :  { %v685_v27 = vadd.f32 %v1360_v43, %v518_v24 }
  0xf3   :  { %v751_v23 = vpack.c.bf16 %v732_v22, %v731_v20 }
  0xf4   :  { %v557_v44 = vpop.f32.mrf.mxu3  ;;  %v717_v31 = vmax.f32 %v685_v27, 0.0 }
  0xf5   :  { %887 = vmatmul.bf16.vlgmr.msra.gmra.mxu3 %v751_v23  ;;  %v558_v30 = vadd.f32 %v557_v44, %v1374_v5 }
  0xf6   :  { %v430_v25 = vpop.f32.mrf.mxu0 }
  0xf7   :  { %v519_v26 = vpop.f32.mrf.mxu1  ;;  %v701_v34 = vadd.f32 %v1360_v43, %v558_v30 }
  0xf8   :  { %v520_v29 = vadd.f32 %v519_v26, %v430_v25 }
  0xf9   :  { %v733_v40 = vmax.f32 %v701_v34, 0.0 }
  0xfa   :  { %v686_v60 = vadd.f32 %v1360_v43, %v520_v29 }
  0xfc   :  { %v718_v32 = vmax.f32 %v686_v60, 0.0  ;;  %v559_v33 = vpop.f32.mrf.mxu3 }
  0xfd   :  { %v560_v35 = vadd.f32 %v559_v33, %v1378_v21 }
  0xfe   :  { %v433_v36 = vpop.f32.mrf.mxu0  ;;  %v744_v37 = vpack.c.bf16 %v718_v32, %v717_v31 }
  0xff   :  { %v702_v38 = vadd.f32 %v1360_v43, %v560_v35  ;;  %v522_v39 = vpop.f32.mrf.mxu1 }
 0x100   :  { %852 = vmatmul.bf16.gmra.mxu2 %v744_v37  ;;  %v523_v45 = vadd.f32 %v522_v39, %v433_v36 }
 0x101   :  { %v734_v41 = vmax.f32 %v702_v38, 0.0 }
 0x102   :  { %v687_v49 = vadd.f32 %v1360_v43, %v523_v45 }
 0x103   :  { %v752_v42 = vpack.c.bf16 %v734_v41, %v733_v40 }
 0x104   :  { %v562_v5 = vpop.f32.mrf.mxu3  ;;  %v719_v52 = vmax.f32 %v687_v49, 0.0 }
 0x105   :  { %892 = vmatmul.bf16.gmra.mxu3 %v752_v42  ;;  %v563_v51 = vadd.f32 %v562_v5, %v1380_v28 }
 0x106   :  { %v435_v47 = vpop.f32.mrf.mxu0 }
 0x107   :  { %v524_v48 = vpop.f32.mrf.mxu1  ;;  %v703_v56 = vadd.f32 %v1360_v43, %v563_v51 }
 0x108   :  { %v525_v50 = vadd.f32 %v524_v48, %v435_v47 }
 0x109   :  { %v735_v0 = vmax.f32 %v703_v56, 0.0 }
 0x10a   :  { %v688_v21 = vadd.f32 %v1360_v43, %v525_v50 }
 0x10c   :  { %v720_v54 = vmax.f32 %v688_v21, 0.0  ;;  %v564_v55 = vpop.f32.mrf.mxu3 }
 0x10d   :  { %v565_v57 = vadd.f32 %v564_v55, %v1384_v46 }
 0x10e   :  { %v438_v58 = vpop.f32.mrf.mxu0  ;;  %v745_v59 = vpack.c.bf16 %v720_v54, %v719_v52 }
 0x10f   :  { %v704_v61 = vadd.f32 %v1360_v43, %v565_v57  ;;  %v527_v63 = vpop.f32.mrf.mxu1 }
 0x110   :  { %857 = vmatmul.bf16.gmra.mxu2 %v745_v59  ;;  %v528_v3 = vadd.f32 %v527_v63, %v438_v58 }
 0x111   :  { %v736_v1 = vmax.f32 %v704_v61, 0.0 }
 0x112   :  { %v689_v7 = vadd.f32 %v1360_v43, %v528_v3 }
 0x113   :  { %v753_v2 = vpack.c.bf16 %v736_v1, %v735_v0 }
 0x114   :  { %v567_v28 = vpop.f32.mrf.mxu3  ;;  %v721_v10 = vmax.f32 %v689_v7, 0.0 }
 0x115   :  { %897 = vmatmul.bf16.gmra.mxu3 %v753_v2  ;;  %v568_v9 = vadd.f32 %v567_v28, %v1386_v53 }
 0x116   :  { %v440_v4 = vpop.f32.mrf.mxu0 }
 0x117   :  { %v529_v6 = vpop.f32.mrf.mxu1  ;;  %v705_v13 = vadd.f32 %v1360_v43, %v568_v9 }
 0x118   :  { %v530_v8 = vadd.f32 %v529_v6, %v440_v4 }
 0x119   :  { %v737_v19 = vmax.f32 %v705_v13, 0.0 }
 0x11a   :  { %v690_v46 = vadd.f32 %v1360_v43, %v530_v8 }
 0x11c   :  { %v722_v11 = vmax.f32 %v690_v46, 0.0  ;;  %v569_v12 = vpop.f32.mrf.mxu3 }
 0x11d   :  { %v570_v14 = vadd.f32 %v569_v12, %v1390_v62 }
 0x11e   :  { %v443_v15 = vpop.f32.mrf.mxu0  ;;  %v746_v16 = vpack.c.bf16 %v722_v11, %v721_v10 }
 0x11f   :  { %v706_v17 = vadd.f32 %v1360_v43, %v570_v14  ;;  %v532_v18 = vpop.f32.mrf.mxu1 }
 0x120   :  { %862 = vmatmul.bf16.gmra.mxu2 %v746_v16  ;;  %v533_v23 = vadd.f32 %v532_v18, %v443_v15 }
 0x121   :  { %v738_v20 = vmax.f32 %v706_v17, 0.0 }
 0x122   :  { %v691_v44 = vadd.f32 %v1360_v43, %v533_v23 }
 0x123   :  { %v754_v22 = vpack.c.bf16 %v738_v20, %v737_v19 }
 0x124   :  { %v723_v27 = vmax.f32 %v691_v44, 0.0 }
 0x125   :  { %902 = vmatmul.bf16.gmra.mxu3 %v754_v22 }
 0x126   :  { %v445_v53 = vpop.f32.mrf.mxu0 }
 0x127   :  { %v534_v24 = vpop.f32.mrf.mxu1 }
 0x128   :  { %v535_v25 = vadd.f32 %v534_v24, %v445_v53 }
 0x12a   :  { %v692_v26 = vadd.f32 %v1360_v43, %v535_v25 }
 0x12c   :  { %v724_v62 = vmax.f32 %v692_v26, 0.0 }
 0x12e   :  { %v448_v29 = vpop.f32.mrf.mxu0  ;;  %v747_v30 = vpack.c.bf16 %v724_v62, %v723_v27 }
 0x12f   :  { %v537_v60 = vpop.f32.mrf.mxu1 }
 0x130   :  { %867 = vmatmul.bf16.gmra.mxu2 %v747_v30  ;;  %v538_v32 = vadd.f32 %v537_v60, %v448_v29 }
 0x132   :  { %v693_v35 = vadd.f32 %v1360_v43, %v538_v32 }
 0x133   :  { %v828_v31 = vpop.f32.mrf.mxu2 }
 0x134   :  { %v725_v39 = vmax.f32 %v693_v35, 0.0 }
 0x136   :  { %v450_v33 = vpop.f32.mrf.mxu0 }
 0x137   :  { %v539_v34 = vpop.f32.mrf.mxu1 }
 0x138   :  { %v540_v36 = vadd.f32 %v539_v34, %v450_v33 }
 0x13a   :  { %v694_v37 = vadd.f32 %v1360_v43, %v540_v36 }
 0x13b   :  { %v830_v38 = vpop.f32.mrf.mxu2 }
 0x13c   :  { %v726_v40 = vmax.f32 %v694_v37, 0.0  ;;  %v1101_v41 = vpack.c.bf16 %v830_v38, %v828_v31 }
 0x13e   :  { %1102 = vst [vmem:[%s1476_s4] sm:$0xff] %v1101_v41   ;;  %v453_v42 = vpop.f32.mrf.mxu0  ;;  %v748_v45 = vpack.c.bf16 %v726_v40, %v725_v39 }
 0x13f   :  { %v542_v5 = vpop.f32.mrf.mxu1 }
 0x140   :  { %872 = vmatmul.bf16.gmra.mxu2 %v748_v45  ;;  %v543_v48 = vadd.f32 %v542_v5, %v453_v42 }
 0x142   :  { %v695_v51 = vadd.f32 %v1360_v43, %v543_v48 }
 0x143   :  { %v833_v47 = vpop.f32.mrf.mxu2 }
 0x144   :  { %v727_v55 = vmax.f32 %v695_v51, 0.0 }
 0x146   :  { %v455_v49 = vpop.f32.mrf.mxu0 }
 0x147   :  { %v544_v50 = vpop.f32.mrf.mxu1 }
 0x148   :  { %v545_v21 = vadd.f32 %v544_v50, %v455_v49 }
 0x14a   :  { %v696_v52 = vadd.f32 %v1360_v43, %v545_v21 }
 0x14b   :  { %v835_v54 = vpop.f32.mrf.mxu2 }
 0x14c   :  { %v728_v56 = vmax.f32 %v696_v52, 0.0  ;;  %v1106_v57 = vpack.c.bf16 %v835_v54, %v833_v47 }
 0x14e   :  { %1178 = vst [vmem:[%s1476_s4 + $0x8] sm:$0xff] %v1106_v57   ;;  %v458_v58 = vpop.f32.mrf.mxu0  ;;  %v749_v59 = vpack.c.bf16 %v728_v56, %v727_v55 }
 0x14f   :  { %v547_v61 = vpop.f32.mrf.mxu1 }
 0x150   :  { %877 = vmatmul.bf16.gmra.mxu2 %v749_v59  ;;  %v548_v0 = vadd.f32 %v547_v61, %v458_v58 }
 0x152   :  { %v697_v3 = vadd.f32 %v1360_v43, %v548_v0 }
 0x153   :  { %v838_v63 = vpop.f32.mrf.mxu2 }
 0x154   :  { %v729_v7 = vmax.f32 %v697_v3, 0.0 }
 0x156   :  { %v460_v1 = vpop.f32.mrf.mxu0 }
 0x157   :  { %v549_v2 = vpop.f32.mrf.mxu1 }
 0x158   :  { %v550_v28 = vadd.f32 %v549_v2, %v460_v1 }
 0x15a   :  { %v698_v4 = vadd.f32 %v1360_v43, %v550_v28 }
 0x15b   :  { %v840_v6 = vpop.f32.mrf.mxu2 }
 0x15c   :  { %v730_v8 = vmax.f32 %v698_v4, 0.0  ;;  %v1111_v9 = vpack.c.bf16 %v840_v6, %v838_v63 }
 0x15e   :  { %1179 = vst [vmem:[%s1476_s4 + $0x10] sm:$0xff] %v1111_v9   ;;  %v750_v46 = vpack.c.bf16 %v730_v8, %v729_v7 }
 0x160   :  { %882 = vmatmul.bf16.gmra.mxu2 %v750_v46 }
 0x163   :  { %v843_v10 = vpop.f32.mrf.mxu2 }
 0x16b   :  { %v845_v11 = vpop.f32.mrf.mxu2 }
 0x16c   :  { %v1116_v12 = vpack.c.bf16 %v845_v11, %v843_v10 }
 0x16e   :  { %1180 = vst [vmem:[%s1476_s4 + $0x18] sm:$0xff] %v1116_v12  }
 0x173   :  { %v848_v13 = vpop.f32.mrf.mxu2 }
 0x178   :  { %v888_v14 = vpop.f32.mrf.mxu3 }
 0x17b   :  { %v850_v43 = vpop.f32.mrf.mxu2 }
 0x17c   :  { %v1121_v15 = vpack.c.bf16 %v850_v43, %v848_v13 }
 0x17e   :  { %1181 = vst [vmem:[%s1476_s4 + $0x20] sm:$0xff] %v1121_v15  }
 0x180   :  { %v890_v16 = vpop.f32.mrf.mxu3 }
 0x181   :  { %v1161_v17 = vpack.c.bf16 %v890_v16, %v888_v14 }
 0x183   :  { %1189 = vst [vmem:[%s1476_s4 + $0x60] sm:$0xff] %v1161_v17   ;;  %v853_v18 = vpop.f32.mrf.mxu2 }
 0x188   :  { %v893_v19 = vpop.f32.mrf.mxu3 }
 0x18b   :  { %v855_v20 = vpop.f32.mrf.mxu2 }
 0x18c   :  { %v1126_v22 = vpack.c.bf16 %v855_v20, %v853_v18 }
 0x18e   :  { %1182 = vst [vmem:[%s1476_s4 + $0x28] sm:$0xff] %v1126_v22  }
 0x190   :  { %v895_v23 = vpop.f32.mrf.mxu3 }
 0x191   :  { %v1166_v53 = vpack.c.bf16 %v895_v23, %v893_v19 }
 0x193   :  { %1190 = vst [vmem:[%s1476_s4 + $0x68] sm:$0xff] %v1166_v53   ;;  %v858_v24 = vpop.f32.mrf.mxu2 }
 0x198   :  { %v898_v44 = vpop.f32.mrf.mxu3 }
 0x19b   :  { %v860_v25 = vpop.f32.mrf.mxu2 }
 0x19c   :  { %v1131_v26 = vpack.c.bf16 %v860_v25, %v858_v24 }
 0x19e   :  { %1183 = vst [vmem:[%s1476_s4 + $0x30] sm:$0xff] %v1131_v26  }
 0x1a0   :  { %v900_v27 = vpop.f32.mrf.mxu3 }
 0x1a1   :  { %v1171_v62 = vpack.c.bf16 %v900_v27, %v898_v44 }
 0x1a3   :  { %1191 = vst [vmem:[%s1476_s4 + $0x70] sm:$0xff] %v1171_v62   ;;  %v863_v29 = vpop.f32.mrf.mxu2 }
 0x1a8   :  { %v903_v30 = vpop.f32.mrf.mxu3 }
 0x1ab   :  { %v865_v60 = vpop.f32.mrf.mxu2 }
 0x1ac   :  { %v1136_v31 = vpack.c.bf16 %v865_v60, %v863_v29 }
 0x1ae   :  { %1184 = vst [vmem:[%s1476_s4 + $0x38] sm:$0xff] %v1136_v31  }
 0x1b0   :  { %v905_v32 = vpop.f32.mrf.mxu3 }
 0x1b1   :  { %v1176_v33 = vpack.c.bf16 %v905_v32, %v903_v30 }
 0x1b3   :  { %1192 = vst [vmem:[%s1476_s4 + $0x78] sm:$0xff] %v1176_v33   ;;  %v868_v34 = vpop.f32.mrf.mxu2 }
 0x1bb   :  { %v870_v35 = vpop.f32.mrf.mxu2 }
 0x1bc   :  { %v1141_v36 = vpack.c.bf16 %v870_v35, %v868_v34 }
 0x1be   :  { %1185 = vst [vmem:[%s1476_s4 + $0x40] sm:$0xff] %v1141_v36  }
 0x1c3   :  { %v873_v37 = vpop.f32.mrf.mxu2 }
 0x1cb   :  { %v875_v38 = vpop.f32.mrf.mxu2 }
 0x1cc   :  { %v1146_v39 = vpack.c.bf16 %v875_v38, %v873_v37 }
 0x1ce   :  { %1186 = vst [vmem:[%s1476_s4 + $0x48] sm:$0xff] %v1146_v39  }
 0x1d3   :  { %v878_v40 = vpop.f32.mrf.mxu2 }
 0x1db   :  { %v880_v41 = vpop.f32.mrf.mxu2 }
 0x1dc   :  { %v1151_v42 = vpack.c.bf16 %v880_v41, %v878_v40 }
 0x1de   :  { %1187 = vst [vmem:[%s1476_s4 + $0x50] sm:$0xff] %v1151_v42  }
 0x1e3   :  { %v883_v45 = vpop.f32.mrf.mxu2 }
 0x1eb   :  { %v885_v5 = vpop.f32.mrf.mxu2 }
 0x1ec   :  { %v1156_v47 = vpack.c.bf16 %v885_v5, %v883_v45 }
 0x1ee   :  { %1188 = vst [vmem:[%s1476_s4 + $0x58] sm:$0xff] %v1156_v47  }

// kernel: basic_gnn_forward.6
= control target key start
LH: loop header
LB: loop body
LE: loop exit
PB: predicated region body
PF: predicated region fallthrough
CT: control target
= control target key end

     0   :  { %vm940_vm0 = vcmask 257024   ;;  %s1458_s1 = inlined_call_operand.vmem [shape: bf16[256,128], index: 1, kind: input, shape index: {}]   ;;  %s1459_s0 = inlined_call_operand.vmem [shape: s8[256,256], index: 0, kind: input, shape index: {}]   ;;  %s1460_s2 = inlined_call_operand.vmem [shape: f32[1,128], index: 2, kind: input, shape index: {}]   ;;  %s1461_s3 = inlined_call_operand.vmem [shape: bf16[128,32], index: 3, kind: input, shape index: {}]   ;;  %s1462_s4 = inlined_call_operand.vmem [shape: bf16[256,32], index: 4, kind: output, shape index: {}]  }
   0x1   :  { %v1082_v0 = vld [vmem:[%s1458_s1 + $0x38] sm:$0xff]  ;;  %v1081_v2 = vld [vmem:[%s1458_s1 + $0x30] sm:$0xff]  ;;  %v1080_v4 = vld [vmem:[%s1458_s1 + $0x28] sm:$0xff] }
   0x2   :  { %v1090_v1 = vld [vmem:[%s1458_s1 + $0x78] sm:$0xff]  ;;  %394 = vmatpush.bf16.msra.mxu0 %v1082_v0  ;;  %1099 = vmatpush.bf16.msra.mxu3 %v1082_v0  ;;  %v1089_v3 = vld [vmem:[%s1458_s1 + $0x70] sm:$0xff]  ;;  %v1088_v5 = vld [vmem:[%s1458_s1 + $0x68] sm:$0xff] }
   0x3   :  { %483 = vmatpush.bf16.msra.mxu1 %v1090_v1  ;;  %v1079_v6 = vld [vmem:[%s1458_s1 + $0x20] sm:$0xff]  ;;  %v1078_v8 = vld [vmem:[%s1458_s1 + $0x18] sm:$0xff]  ;;  %v1077_v10 = vld [vmem:[%s1458_s1 + $0x10] sm:$0xff] }
   0x4   :  { %v1087_v7 = vld [vmem:[%s1458_s1 + $0x60] sm:$0xff]  ;;  %v1086_v9 = vld [vmem:[%s1458_s1 + $0x58] sm:$0xff]  ;;  %v1085_v13 = vld [vmem:[%s1458_s1 + $0x50] sm:$0xff] }
   0x5   :  { %v54_v11 = vld [vmem:[%s1459_s0] sm:$0xff]  ;;  %v55_v14 = vld [vmem:[%s1459_s0 + $0x8] sm:$0xff]  ;;  %v56_v49 = vld [vmem:[%s1459_s0 + $0x10] sm:$0xff] }
   0x6   :  { %395 = vmatpush.bf16.msra.mxu0 %v1081_v2  ;;  %1100 = vmatpush.bf16.msra.mxu3 %v1081_v2  ;;  %v66_v12 = vld [vmem:[%s1459_s0 + $0x60] sm:$0xff]  ;;  %v70_v15 = vunpack.c.0.s8 %v54_v11  ;;  %v72_v16 = vunpack.c.1.s8 %v54_v11  ;;  %v1076_v19 = vld [vmem:[%s1458_s1 + $0x8] sm:$0xff]  ;;  %v71_v20 = vunpack.c.0.s8 %v55_v14  ;;  %v73_v21 = vunpack.c.1.s8 %v55_v14  ;;  %v68_v50 = vld [vmem:[%s1459_s0 + $0x70] sm:$0xff] }
   0x7   :  { %484 = vmatpush.bf16.msra.mxu1 %v1089_v3  ;;  %v118_v17 = vunpack.c.0.s8 %v66_v12  ;;  %v120_v18 = vunpack.c.1.s8 %v66_v12  ;;  %v1084_v22 = vld [vmem:[%s1458_s1 + $0x48] sm:$0xff]  ;;  %v1075_v27 = vld [vmem:[%s1458_s1] sm:$0xff]  ;;  %v74_v34 = vunpack.c.2.s8 %v54_v11  ;;  %v76_v35 = vunpack.c.3.s8 %v54_v11  ;;  %v57_v51 = vld [vmem:[%s1459_s0 + $0x18] sm:$0xff] }
   0x8   :  { %v134_v23 = vcvt.s32.f32 %v70_v15  ;;  %v136_v24 = vcvt.s32.f32 %v72_v16  ;;  %v135_v28 = vcvt.s32.f32 %v71_v20  ;;  %v137_v29 = vcvt.s32.f32 %v73_v21  ;;  %v1083_v30 = vld [vmem:[%s1458_s1 + $0x40] sm:$0xff]  ;;  %v59_v20 = vld [vmem:[%s1459_s0 + $0x28] sm:$0xff] }
   0x9   :  { %v182_v25 = vcvt.s32.f32 %v118_v17  ;;  %v184_v26 = vcvt.s32.f32 %v120_v18  ;;  %v122_v36 = vunpack.c.2.s8 %v66_v12  ;;  %v124_v37 = vunpack.c.3.s8 %v66_v12  ;;  %v58_v18 = vld [vmem:[%s1459_s0 + $0x20] sm:$0xff] }
   0xa   :  { %396 = vmatpush.bf16.msra.mxu0 %v1080_v4  ;;  %1101 = vmatpush.bf16.msra.mxu3 %v1080_v4  ;;  %v198_v31 = vpack.c.bf16 %v136_v24, %v134_v23  ;;  %v199_v33 = vpack.c.bf16 %v137_v29, %v135_v28  ;;  %v75_v38 = vunpack.c.2.s8 %v55_v14  ;;  %v77_v39 = vunpack.c.3.s8 %v55_v14 }
   0xb   :  { %485 = vmatpush.bf16.msra.mxu1 %v1088_v5  ;;  %v222_v32 = vpack.c.bf16 %v184_v26, %v182_v25  ;;  %v138_v40 = vcvt.s32.f32 %v74_v34  ;;  %v140_v41 = vcvt.s32.f32 %v76_v35  ;;  %v186_v42 = vcvt.s32.f32 %v122_v36  ;;  %v1098_v36 = vld [vmem:[%s1461_s3 + $0x38] sm:$0xff] }
   0xc   :  { %v188_v43 = vcvt.s32.f32 %v124_v37  ;;  %v139_v44 = vcvt.s32.f32 %v75_v38  ;;  %v141_v45 = vcvt.s32.f32 %v77_v39  ;;  %v78_v52 = vunpack.c.0.s8 %v56_v49  ;;  %819 = vmatpush.bf16.msra.mxu2 %v1098_v36 }
   0xd   :  { %v200_v46 = vpack.c.bf16 %v140_v41, %v138_v40  ;;  %v80_v53 = vunpack.c.1.s8 %v56_v49  ;;  %v126_v54 = vunpack.c.0.s8 %v68_v50  ;;  %v128_v55 = vunpack.c.1.s8 %v68_v50 }
   0xe   :  { %397 = vmatpush.bf16.msra.mxu0 %v1079_v6  ;;  %1102 = vmatpush.bf16.msra.mxu3 %v1079_v6  ;;  %v224_v47 = vpack.c.bf16 %v188_v43, %v186_v42  ;;  %v201_v48 = vpack.c.bf16 %v141_v45, %v139_v44  ;;  %v79_v56 = vunpack.c.0.s8 %v57_v51  ;;  %v81_v57 = vunpack.c.1.s8 %v57_v51 }
   0xf   :  { %486 = vmatpush.bf16.msra.mxu1 %v1087_v7  ;;  %v142_v58 = vcvt.s32.f32 %v78_v52  ;;  %v144_v59 = vcvt.s32.f32 %v80_v53  ;;  %v190_v60 = vcvt.s32.f32 %v126_v54  ;;  %v192_v61 = vcvt.s32.f32 %v128_v55  ;;  %v60_v52 = vld [vmem:[%s1459_s0 + $0x30] sm:$0xff]  ;;  %v69_v53 = vld [vmem:[%s1459_s0 + $0x78] sm:$0xff] }
  0x10   :  { %v143_v62 = vcvt.s32.f32 %v79_v56  ;;  %v145_v63 = vcvt.s32.f32 %v81_v57  ;;  %v84_v4 = vunpack.c.3.s8 %v56_v49  ;;  %v132_v6 = vunpack.c.3.s8 %v68_v50  ;;  %v1097_v54 = vld [vmem:[%s1461_s3 + $0x30] sm:$0xff]  ;;  %v61_v55 = vld [vmem:[%s1459_s0 + $0x38] sm:$0xff]  ;;  %v1096_v56 = vld [vmem:[%s1461_s3 + $0x28] sm:$0xff] }
  0x11   :  { %v202_v0 = vpack.c.bf16 %v144_v59, %v142_v58  ;;  %v86_v21 = vunpack.c.0.s8 %v58_v18  ;;  %v87_v25 = vunpack.c.0.s8 %v59_v20  ;;  %v89_v26 = vunpack.c.1.s8 %v59_v20  ;;  %820 = vmatpush.bf16.msra.mxu2 %v1097_v54 }
  0x12   :  { %398 = vmatpush.bf16.msra.mxu0 %v1078_v8  ;;  %1103 = vmatpush.bf16.msra.mxu3 %v1078_v8  ;;  %v203_v2 = vpack.c.bf16 %v145_v63, %v143_v62  ;;  %v85_v8 = vunpack.c.3.s8 %v57_v51  ;;  %v196_v12 = vcvt.s32.f32 %v132_v6  ;;  %v90_v37 = vunpack.c.2.s8 %v58_v18  ;;  %v1095_v63 = vld [vmem:[%s1461_s3 + $0x20] sm:$0xff] }
  0x13   :  { %487 = vmatpush.bf16.msra.mxu1 %v1086_v9  ;;  %v92_v38 = vunpack.c.3.s8 %v58_v18  ;;  %v91_v41 = vunpack.c.2.s8 %v59_v20  ;;  %v93_v42 = vunpack.c.3.s8 %v59_v20  ;;  %v94_v57 = vunpack.c.0.s8 %v60_v52 }
  0x14   :  { %v149_v14 = vcvt.s32.f32 %v85_v8  ;;  %v154_v43 = vcvt.s32.f32 %v90_v37  ;;  %v96_v58 = vunpack.c.1.s8 %v60_v52  ;;  %v127_v59 = vunpack.c.0.s8 %v69_v53 }
  0x15   :  { %v156_v44 = vcvt.s32.f32 %v92_v38  ;;  %v97_v62 = vunpack.c.1.s8 %v61_v55  ;;  %821 = vmatpush.bf16.msra.mxu2 %v1096_v56 }
  0x16   :  { %399 = vmatpush.bf16.msra.mxu0 %v1077_v10  ;;  %1104 = vmatpush.bf16.msra.mxu3 %v1077_v10  ;;  %v148_v10 = vcvt.s32.f32 %v84_v4 }
  0x17   :  { %488 = vmatpush.bf16.msra.mxu1 %v1085_v13 }
  0x19   :  { %822 = vmatpush.bf16.msra.mxu2 %v1095_v63 }
  0x1a   :  { %400 = vmatpush.bf16.msra.mxu0 %v1076_v19  ;;  %1105 = vmatpush.bf16.msra.mxu3 %v1076_v19  ;;  %v67_v19 = vld [vmem:[%s1459_s0 + $0x68] sm:$0xff] }
  0x1b   :  { %489 = vmatpush.bf16.msra.mxu1 %v1084_v22  ;;  %v119_v23 = vunpack.c.0.s8 %v67_v19  ;;  %v121_v24 = vunpack.c.1.s8 %v67_v19  ;;  %v123_v39 = vunpack.c.2.s8 %v67_v19  ;;  %v125_v40 = vunpack.c.3.s8 %v67_v19 }
  0x1d   :  { %v183_v29 = vcvt.s32.f32 %v119_v23  ;;  %v187_v45 = vcvt.s32.f32 %v123_v39 }
  0x1e   :  { %401 = vmatpush.bf16.msra.mxu0 %v1075_v27  ;;  %1106 = vmatpush.bf16.msra.mxu3 %v1075_v27  ;;  %v150_v27 = vcvt.s32.f32 %v86_v21 }
  0x1f   :  { %490 = vmatpush.bf16.msra.mxu1 %v1083_v30 }
  0x21   :  { %402 = vmatmul.bf16.vlgmr.msra.gmra.mxu0 %v198_v31  ;;  %462 = vmatmul.bf16.vlgmr.msra.gmra.mxu3 %v222_v32  ;;  %v151_v31 = vcvt.s32.f32 %v87_v25  ;;  %v153_v32 = vcvt.s32.f32 %v89_v26 }
  0x22   :  { %1107 = vmatpush.bf16.msrb.mxu3 %v1090_v1  ;;  %491 = vmatmul.bf16.vlgmr.msra.gmra.mxu1 %v199_v33  ;;  %v226_v1 = vpack.c.bf16 %v192_v61, %v190_v60  ;;  %v129_v60 = vunpack.c.1.s8 %v69_v53  ;;  %v95_v61 = vunpack.c.0.s8 %v61_v55 }
  0x23   :  { %v207_v35 = vpack.c.bf16 %v153_v32, %v151_v31 }
  0x24   :  { %v159_v4 = vcvt.s32.f32 %v95_v61 }
  0x26   :  { %1108 = vmatpush.bf16.msrb.mxu3 %v1089_v3  ;;  %v82_v3 = vunpack.c.2.s8 %v56_v49  ;;  %v208_v49 = vpack.c.bf16 %v156_v44, %v154_v43  ;;  %v1266_v43 = vld [vmem:[%s1460_s2] ss:$0 sm:$0xff] }
  0x2a   :  { %1109 = vmatpush.bf16.msrb.mxu3 %v1088_v5  ;;  %v130_v5 = vunpack.c.2.s8 %v68_v50 }
  0x2c   :  { %v194_v11 = vcvt.s32.f32 %v130_v5  ;;  %v161_v5 = vcvt.s32.f32 %v97_v62 }
  0x2e   :  { %1110 = vmatpush.bf16.msrb.mxu3 %v1087_v7  ;;  %v83_v7 = vunpack.c.2.s8 %v57_v51  ;;  %v228_v16 = vpack.c.bf16 %v196_v12, %v194_v11  ;;  %v211_v8 = vpack.c.bf16 %v161_v5, %v159_v4  ;;  %v98_v11 = vunpack.c.2.s8 %v60_v52 }
  0x2f   :  { %v100_v12 = vunpack.c.3.s8 %v60_v52 }
  0x31   :  { %407 = vmatmul.bf16.gmra.mxu0 %v200_v46  ;;  %467 = vmatmul.bf16.gmra.mxu3 %v224_v47  ;;  %v189_v46 = vcvt.s32.f32 %v125_v40  ;;  %v155_v47 = vcvt.s32.f32 %v91_v41  ;;  %v164_v19 = vcvt.s32.f32 %v100_v12 }
  0x32   :  { %1111 = vmatpush.bf16.msrb.mxu3 %v1086_v9  ;;  %496 = vmatmul.bf16.gmra.mxu1 %v201_v48  ;;  %v146_v9 = vcvt.s32.f32 %v82_v3  ;;  %v157_v48 = vcvt.s32.f32 %v93_v42  ;;  %v193_v3 = vcvt.s32.f32 %v129_v60 }
  0x33   :  { %v225_v50 = vpack.c.bf16 %v189_v46, %v187_v45 }
  0x34   :  { %v204_v15 = vpack.c.bf16 %v148_v10, %v146_v9  ;;  %v209_v51 = vpack.c.bf16 %v157_v48, %v155_v47  ;;  %v1094_v9 = vld [vmem:[%s1461_s3 + $0x18] sm:$0xff]  ;;  %v1093_v10 = vld [vmem:[%s1461_s3 + $0x10] sm:$0xff] }
  0x35   :  { %823 = vmatpush.bf16.msra.mxu2 %v1094_v9 }
  0x36   :  { %1112 = vmatpush.bf16.msrb.mxu3 %v1085_v13  ;;  %v147_v13 = vcvt.s32.f32 %v83_v7 }
  0x38   :  { %v205_v17 = vpack.c.bf16 %v149_v14, %v147_v13  ;;  %v131_v13 = vunpack.c.2.s8 %v69_v53  ;;  %v133_v14 = vunpack.c.3.s8 %v69_v53 }
  0x39   :  { %824 = vmatpush.bf16.msra.mxu2 %v1093_v10 }
  0x3a   :  { %1113 = vmatpush.bf16.msrb.mxu3 %v1084_v22  ;;  %v88_v22 = vunpack.c.1.s8 %v58_v18  ;;  %v162_v18 = vcvt.s32.f32 %v98_v11  ;;  %v195_v20 = vcvt.s32.f32 %v131_v13  ;;  %v197_v21 = vcvt.s32.f32 %v133_v14 }
  0x3c   :  { %v152_v28 = vcvt.s32.f32 %v88_v22  ;;  %v212_v25 = vpack.c.bf16 %v164_v19, %v162_v18  ;;  %v229_v26 = vpack.c.bf16 %v197_v21, %v195_v20 }
  0x3e   :  { %1114 = vmatpush.bf16.msrb.mxu3 %v1083_v30  ;;  %v185_v30 = vcvt.s32.f32 %v121_v24  ;;  %v206_v33 = vpack.c.bf16 %v152_v28, %v150_v27  ;;  %v1091_v24 = vld [vmem:[%s1461_s3] sm:$0xff] }
  0x3f   :  { %v62_v28 = vld [vmem:[%s1459_s0 + $0x40] sm:$0xff] }
  0x40   :  { %v223_v34 = vpack.c.bf16 %v185_v30, %v183_v29  ;;  %v63_v29 = vld [vmem:[%s1459_s0 + $0x48] sm:$0xff]  ;;  %v102_v30 = vunpack.c.0.s8 %v62_v28  ;;  %v104_v31 = vunpack.c.1.s8 %v62_v28  ;;  %v106_v45 = vunpack.c.2.s8 %v62_v28 }
  0x41   :  { %412 = vmatmul.bf16.gmra.mxu0 %v202_v0  ;;  %472 = vmatmul.bf16.gmra.mxu3 %v226_v1  ;;  %v158_v0 = vcvt.s32.f32 %v94_v57  ;;  %v160_v1 = vcvt.s32.f32 %v96_v58  ;;  %v103_v32 = vunpack.c.0.s8 %v63_v29  ;;  %v108_v46 = vunpack.c.3.s8 %v62_v28 }
  0x42   :  { %501 = vmatmul.bf16.gmra.mxu1 %v203_v2  ;;  %1115 = vmatpush.bf16.msra.mxu3 %v1098_v36  ;;  %v191_v2 = vcvt.s32.f32 %v127_v59  ;;  %v107_v48 = vunpack.c.2.s8 %v63_v29  ;;  %v170_v53 = vcvt.s32.f32 %v106_v45 }
  0x43   :  { %v210_v6 = vpack.c.bf16 %v160_v1, %v158_v0  ;;  %v167_v36 = vcvt.s32.f32 %v103_v32 }
  0x44   :  { %v227_v7 = vpack.c.bf16 %v193_v3, %v191_v2  ;;  %v64_v2 = vld [vmem:[%s1459_s0 + $0x50] sm:$0xff]  ;;  %v65_v3 = vld [vmem:[%s1459_s0 + $0x58] sm:$0xff] }
  0x45   :  { %v115_v32 = vunpack.c.2.s8 %v65_v3 }
  0x46   :  { %1116 = vmatpush.bf16.msra.mxu3 %v1097_v54  ;;  %v172_v54 = vcvt.s32.f32 %v108_v46 }
  0x48   :  { %v216_v61 = vpack.c.bf16 %v172_v54, %v170_v53 }
  0x4a   :  { %1117 = vmatpush.bf16.msra.mxu3 %v1096_v56  ;;  %v171_v56 = vcvt.s32.f32 %v107_v48 }
  0x4e   :  { %1118 = vmatpush.bf16.msra.mxu3 %v1095_v63 }
  0x51   :  { %417 = vmatmul.bf16.gmra.mxu0 %v204_v15  ;;  %477 = vmatmul.bf16.gmra.mxu3 %v228_v16  ;;  %v99_v15 = vunpack.c.2.s8 %v61_v55  ;;  %v101_v16 = vunpack.c.3.s8 %v61_v55 }
  0x52   :  { %506 = vmatmul.bf16.gmra.mxu1 %v205_v17  ;;  %1119 = vmatpush.bf16.msra.mxu3 %v1094_v9  ;;  %v1092_v17 = vld [vmem:[%s1461_s3 + $0x8] sm:$0xff]  ;;  %v111_v9 = vunpack.c.0.s8 %v65_v3 }
  0x53   :  { %v163_v22 = vcvt.s32.f32 %v99_v15  ;;  %v165_v23 = vcvt.s32.f32 %v101_v16  ;;  %825 = vmatpush.bf16.msra.mxu2 %v1092_v17 }
  0x55   :  { %v213_v27 = vpack.c.bf16 %v165_v23, %v163_v22 }
  0x56   :  { %1120 = vmatpush.bf16.msra.mxu3 %v1093_v10  ;;  %v113_v10 = vunpack.c.1.s8 %v65_v3 }
  0x57   :  { %826 = vmatpush.bf16.msra.mxu2 %v1091_v24 }
  0x58   :  { %v177_v18 = vcvt.s32.f32 %v113_v10 }
  0x5a   :  { %1121 = vmatpush.bf16.msra.mxu3 %v1092_v17  ;;  %v175_v17 = vcvt.s32.f32 %v111_v9 }
  0x5e   :  { %1122 = vmatpush.bf16.msra.mxu3 %v1091_v24 }
  0x61   :  { %422 = vmatmul.bf16.gmra.mxu0 %v206_v33  ;;  %551 = vmatmul.bf16.vlgmr.msrb.gmra.mxu3 %v223_v34  ;;  %v105_v33 = vunpack.c.1.s8 %v63_v29  ;;  %v166_v34 = vcvt.s32.f32 %v102_v30  ;;  %v116_v30 = vunpack.c.3.s8 %v64_v2 }
  0x62   :  { %511 = vmatmul.bf16.gmra.mxu1 %v207_v35  ;;  %v168_v35 = vcvt.s32.f32 %v104_v31 }
  0x63   :  { %v169_v37 = vcvt.s32.f32 %v105_v33  ;;  %v117_v33 = vunpack.c.3.s8 %v65_v3 }
  0x64   :  { %v214_v38 = vpack.c.bf16 %v168_v35, %v166_v34 }
  0x65   :  { %v215_v40 = vpack.c.bf16 %v169_v37, %v167_v36 }
  0x71   :  { %427 = vmatmul.bf16.gmra.mxu0 %v208_v49  ;;  %556 = vmatmul.bf16.gmra.mxu3 %v225_v50  ;;  %v109_v49 = vunpack.c.3.s8 %v63_v29  ;;  %v114_v29 = vunpack.c.2.s8 %v64_v2 }
  0x72   :  { %516 = vmatmul.bf16.gmra.mxu1 %v209_v51 }
  0x73   :  { %v173_v57 = vcvt.s32.f32 %v109_v49  ;;  %v178_v37 = vcvt.s32.f32 %v114_v29 }
  0x75   :  { %v217_v0 = vpack.c.bf16 %v173_v57, %v171_v56 }
  0x81   :  { %432 = vmatmul.bf16.gmra.mxu0 %v210_v6  ;;  %561 = vmatmul.bf16.gmra.mxu3 %v227_v7  ;;  %v110_v6 = vunpack.c.0.s8 %v64_v2  ;;  %v112_v7 = vunpack.c.1.s8 %v64_v2 }
  0x82   :  { %521 = vmatmul.bf16.gmra.mxu1 %v211_v8 }
  0x83   :  { %v174_v14 = vcvt.s32.f32 %v110_v6  ;;  %v176_v15 = vcvt.s32.f32 %v112_v7 }
  0x85   :  { %v218_v22 = vpack.c.bf16 %v176_v15, %v174_v14 }
  0x91   :  { %437 = vmatmul.bf16.gmra.mxu0 %v212_v25  ;;  %566 = vmatmul.bf16.gmra.mxu3 %v229_v26  ;;  %v219_v25 = vpack.c.bf16 %v177_v18, %v175_v17 }
  0x92   :  { %526 = vmatmul.bf16.gmra.mxu1 %v213_v27 }
  0x9e   :  { %v403_v39 = vpop.f32.mrf.mxu0 }
  0x9f   :  { %v492_v41 = vpop.f32.mrf.mxu1 }
  0xa0   :  { %v493_v42 = vadd.f32 %v492_v41, %v403_v39  ;;  %v181_v41 = vcvt.s32.f32 %v117_v33 }
  0xa1   :  { %442 = vmatmul.bf16.gmra.mxu0 %v214_v38  ;;  %v180_v38 = vcvt.s32.f32 %v116_v30 }
  0xa2   :  { %531 = vmatmul.bf16.gmra.mxu1 %v215_v40  ;;  %v675_v51 = vadd.f32 %v1266_v43, %v493_v42  ;;  %v179_v40 = vcvt.s32.f32 %v115_v32 }
  0xa4   :  { %v1268_v44 = vpop.f32.mrf.mxu3  ;;  %v707_v58 = vmax.f32 %v675_v51, 0.0 }
  0xa6   :  { %v405_v47 = vpop.f32.mrf.mxu0 }
  0xa7   :  { %v494_v50 = vpop.f32.mrf.mxu1 }
  0xa8   :  { %v495_v52 = vadd.f32 %v494_v50, %v405_v47  ;;  %v220_v47 = vpack.c.bf16 %v180_v38, %v178_v37  ;;  %v221_v50 = vpack.c.bf16 %v181_v41, %v179_v40 }
  0xaa   :  { %v676_v55 = vadd.f32 %v1266_v43, %v495_v52 }
  0xac   :  { %v708_v59 = vmax.f32 %v676_v55, 0.0  ;;  %v1272_v60 = vpop.f32.mrf.mxu3 }
  0xae   :  { %v408_v62 = vpop.f32.mrf.mxu0  ;;  %v739_v63 = vpack.c.bf16 %v708_v59, %v707_v58 }
  0xaf   :  { %v497_v1 = vpop.f32.mrf.mxu1 }
  0xb0   :  { %827 = vmatmul.bf16.vlgmr.msra.gmra.mxu2 %v739_v63  ;;  %v498_v4 = vadd.f32 %v497_v1, %v408_v62 }
  0xb1   :  { %447 = vmatmul.bf16.gmra.mxu0 %v216_v61 }
  0xb2   :  { %536 = vmatmul.bf16.gmra.mxu1 %v217_v0  ;;  %v677_v12 = vadd.f32 %v1266_v43, %v498_v4 }
  0xb4   :  { %v1280_v5 = vpop.f32.mrf.mxu3  ;;  %v709_v19 = vmax.f32 %v677_v12, 0.0 }
  0xb6   :  { %v410_v8 = vpop.f32.mrf.mxu0 }
  0xb7   :  { %v499_v11 = vpop.f32.mrf.mxu1 }
  0xb8   :  { %v500_v13 = vadd.f32 %v499_v11, %v410_v8 }
  0xba   :  { %v678_v16 = vadd.f32 %v1266_v43, %v500_v13 }
  0xbc   :  { %v710_v20 = vmax.f32 %v678_v16, 0.0  ;;  %v1284_v21 = vpop.f32.mrf.mxu3 }
  0xbe   :  { %v413_v23 = vpop.f32.mrf.mxu0  ;;  %v740_v24 = vpack.c.bf16 %v710_v20, %v709_v19 }
  0xbf   :  { %v502_v26 = vpop.f32.mrf.mxu1 }
  0xc0   :  { %832 = vmatmul.bf16.gmra.mxu2 %v740_v24  ;;  %v503_v27 = vadd.f32 %v502_v26, %v413_v23 }
  0xc1   :  { %452 = vmatmul.bf16.gmra.mxu0 %v218_v22 }
  0xc2   :  { %541 = vmatmul.bf16.gmra.mxu1 %v219_v25  ;;  %v679_v35 = vadd.f32 %v1266_v43, %v503_v27 }
  0xc4   :  { %v1286_v28 = vpop.f32.mrf.mxu3  ;;  %v711_v42 = vmax.f32 %v679_v35, 0.0 }
  0xc6   :  { %v415_v31 = vpop.f32.mrf.mxu0 }
  0xc7   :  { %v504_v34 = vpop.f32.mrf.mxu1 }
  0xc8   :  { %v505_v36 = vadd.f32 %v504_v34, %v415_v31 }
  0xca   :  { %v680_v39 = vadd.f32 %v1266_v43, %v505_v36 }
  0xcc   :  { %v712_v45 = vmax.f32 %v680_v39, 0.0  ;;  %v1290_v46 = vpop.f32.mrf.mxu3 }
  0xce   :  { %v418_v48 = vpop.f32.mrf.mxu0  ;;  %v741_v49 = vpack.c.bf16 %v712_v45, %v711_v42 }
  0xcf   :  { %v507_v51 = vpop.f32.mrf.mxu1 }
  0xd0   :  { %837 = vmatmul.bf16.gmra.mxu2 %v741_v49  ;;  %v508_v52 = vadd.f32 %v507_v51, %v418_v48 }
  0xd1   :  { %457 = vmatmul.bf16.gmra.mxu0 %v220_v47 }
  0xd2   :  { %546 = vmatmul.bf16.gmra.mxu1 %v221_v50  ;;  %v681_v56 = vadd.f32 %v1266_v43, %v508_v52 }
  0xd4   :  { %v1292_v53 = vpop.f32.mrf.mxu3  ;;  %v713_v59 = vmax.f32 %v681_v56, 0.0 }
  0xd6   :  { %v420_v54 = vpop.f32.mrf.mxu0 }
  0xd7   :  { %v509_v55 = vpop.f32.mrf.mxu1 }
  0xd8   :  { %v510_v57 = vadd.f32 %v509_v55, %v420_v54 }
  0xda   :  { %v682_v58 = vadd.f32 %v1266_v43, %v510_v57 }
  0xdc   :  { %v714_v61 = vmax.f32 %v682_v58, 0.0  ;;  %v1296_v62 = vpop.f32.mrf.mxu3 }
  0xde   :  { %v423_v63 = vpop.f32.mrf.mxu0  ;;  %v742_v0 = vpack.c.bf16 %v714_v61, %v713_v59 }
  0xdf   :  { %v512_v1 = vpop.f32.mrf.mxu1 }
  0xe0   :  { %842 = vmatmul.bf16.gmra.mxu2 %v742_v0  ;;  %v513_v2 = vadd.f32 %v512_v1, %v423_v63 }
  0xe2   :  { %v683_v7 = vadd.f32 %v1266_v43, %v513_v2 }
  0xe4   :  { %v552_v3 = vpop.f32.mrf.mxu3  ;;  %v715_v11 = vmax.f32 %v683_v7, 0.0 }
  0xe5   :  { %v553_v9 = vadd.f32 %v552_v3, %v1268_v44 }
  0xe6   :  { %v425_v4 = vpop.f32.mrf.mxu0 }
  0xe7   :  { %v514_v6 = vpop.f32.mrf.mxu1  ;;  %v699_v14 = vadd.f32 %v1266_v43, %v553_v9 }
  0xe8   :  { %v515_v8 = vadd.f32 %v514_v6, %v425_v4 }
  0xe9   :  { %v731_v20 = vmax.f32 %v699_v14, 0.0 }
  0xea   :  { %v684_v10 = vadd.f32 %v1266_v43, %v515_v8 }
  0xec   :  { %v716_v12 = vmax.f32 %v684_v10, 0.0  ;;  %v554_v13 = vpop.f32.mrf.mxu3 }
  0xed   :  { %v555_v15 = vadd.f32 %v554_v13, %v1272_v60 }
  0xee   :  { %v428_v16 = vpop.f32.mrf.mxu0  ;;  %v743_v17 = vpack.c.bf16 %v716_v12, %v715_v11 }
  0xef   :  { %v700_v18 = vadd.f32 %v1266_v43, %v555_v15  ;;  %v517_v19 = vpop.f32.mrf.mxu1 }
  0xf0   :  { %847 = vmatmul.bf16.gmra.mxu2 %v743_v17  ;;  %v518_v24 = vadd.f32 %v517_v19, %v428_v16 }
  0xf1   :  { %v732_v22 = vmax.f32 %v700_v18, 0.0 }
  0xf2   :  { %v685_v27 = vadd.f32 %v1266_v43, %v518_v24 }
  0xf3   :  { %v751_v23 = vpack.c.bf16 %v732_v22, %v731_v20 }
  0xf4   :  { %v557_v44 = vpop.f32.mrf.mxu3  ;;  %v717_v31 = vmax.f32 %v685_v27, 0.0 }
  0xf5   :  { %887 = vmatmul.bf16.vlgmr.msra.gmra.mxu3 %v751_v23  ;;  %v558_v30 = vadd.f32 %v557_v44, %v1280_v5 }
  0xf6   :  { %v430_v25 = vpop.f32.mrf.mxu0 }
  0xf7   :  { %v519_v26 = vpop.f32.mrf.mxu1  ;;  %v701_v34 = vadd.f32 %v1266_v43, %v558_v30 }
  0xf8   :  { %v520_v29 = vadd.f32 %v519_v26, %v430_v25 }
  0xf9   :  { %v733_v40 = vmax.f32 %v701_v34, 0.0 }
  0xfa   :  { %v686_v60 = vadd.f32 %v1266_v43, %v520_v29 }
  0xfc   :  { %v718_v32 = vmax.f32 %v686_v60, 0.0  ;;  %v559_v33 = vpop.f32.mrf.mxu3 }
  0xfd   :  { %v560_v35 = vadd.f32 %v559_v33, %v1284_v21 }
  0xfe   :  { %v433_v36 = vpop.f32.mrf.mxu0  ;;  %v744_v37 = vpack.c.bf16 %v718_v32, %v717_v31 }
  0xff   :  { %v702_v38 = vadd.f32 %v1266_v43, %v560_v35  ;;  %v522_v39 = vpop.f32.mrf.mxu1 }
 0x100   :  { %852 = vmatmul.bf16.gmra.mxu2 %v744_v37  ;;  %v523_v45 = vadd.f32 %v522_v39, %v433_v36 }
 0x101   :  { %v734_v41 = vmax.f32 %v702_v38, 0.0 }
 0x102   :  { %v687_v49 = vadd.f32 %v1266_v43, %v523_v45 }
 0x103   :  { %v752_v42 = vpack.c.bf16 %v734_v41, %v733_v40 }
 0x104   :  { %v562_v5 = vpop.f32.mrf.mxu3  ;;  %v719_v52 = vmax.f32 %v687_v49, 0.0 }
 0x105   :  { %892 = vmatmul.bf16.gmra.mxu3 %v752_v42  ;;  %v563_v51 = vadd.f32 %v562_v5, %v1286_v28 }
 0x106   :  { %v435_v47 = vpop.f32.mrf.mxu0 }
 0x107   :  { %v524_v48 = vpop.f32.mrf.mxu1  ;;  %v703_v56 = vadd.f32 %v1266_v43, %v563_v51 }
 0x108   :  { %v525_v50 = vadd.f32 %v524_v48, %v435_v47 }
 0x109   :  { %v735_v0 = vmax.f32 %v703_v56, 0.0 }
 0x10a   :  { %v688_v21 = vadd.f32 %v1266_v43, %v525_v50 }
 0x10c   :  { %v720_v54 = vmax.f32 %v688_v21, 0.0  ;;  %v564_v55 = vpop.f32.mrf.mxu3 }
 0x10d   :  { %v565_v57 = vadd.f32 %v564_v55, %v1290_v46 }
 0x10e   :  { %v438_v58 = vpop.f32.mrf.mxu0  ;;  %v745_v59 = vpack.c.bf16 %v720_v54, %v719_v52 }
 0x10f   :  { %v704_v61 = vadd.f32 %v1266_v43, %v565_v57  ;;  %v527_v63 = vpop.f32.mrf.mxu1 }
 0x110   :  { %857 = vmatmul.bf16.gmra.mxu2 %v745_v59  ;;  %v528_v3 = vadd.f32 %v527_v63, %v438_v58 }
 0x111   :  { %v736_v1 = vmax.f32 %v704_v61, 0.0 }
 0x112   :  { %v689_v7 = vadd.f32 %v1266_v43, %v528_v3 }
 0x113   :  { %v753_v2 = vpack.c.bf16 %v736_v1, %v735_v0 }
 0x114   :  { %v567_v28 = vpop.f32.mrf.mxu3  ;;  %v721_v10 = vmax.f32 %v689_v7, 0.0 }
 0x115   :  { %897 = vmatmul.bf16.gmra.mxu3 %v753_v2  ;;  %v568_v9 = vadd.f32 %v567_v28, %v1292_v53 }
 0x116   :  { %v440_v4 = vpop.f32.mrf.mxu0 }
 0x117   :  { %v529_v6 = vpop.f32.mrf.mxu1  ;;  %v705_v13 = vadd.f32 %v1266_v43, %v568_v9 }
 0x118   :  { %v530_v8 = vadd.f32 %v529_v6, %v440_v4 }
 0x119   :  { %v737_v19 = vmax.f32 %v705_v13, 0.0 }
 0x11a   :  { %v690_v46 = vadd.f32 %v1266_v43, %v530_v8 }
 0x11c   :  { %v722_v11 = vmax.f32 %v690_v46, 0.0  ;;  %v569_v12 = vpop.f32.mrf.mxu3 }
 0x11d   :  { %v570_v14 = vadd.f32 %v569_v12, %v1296_v62 }
 0x11e   :  { %v443_v15 = vpop.f32.mrf.mxu0  ;;  %v746_v16 = vpack.c.bf16 %v722_v11, %v721_v10 }
 0x11f   :  { %v706_v17 = vadd.f32 %v1266_v43, %v570_v14  ;;  %v532_v18 = vpop.f32.mrf.mxu1 }
 0x120   :  { %862 = vmatmul.bf16.gmra.mxu2 %v746_v16  ;;  %v533_v23 = vadd.f32 %v532_v18, %v443_v15 }
 0x121   :  { %v738_v20 = vmax.f32 %v706_v17, 0.0 }
 0x122   :  { %v691_v44 = vadd.f32 %v1266_v43, %v533_v23 }
 0x123   :  { %v754_v22 = vpack.c.bf16 %v738_v20, %v737_v19 }
 0x124   :  { %v723_v27 = vmax.f32 %v691_v44, 0.0 }
 0x125   :  { %902 = vmatmul.bf16.gmra.mxu3 %v754_v22 }
 0x126   :  { %v445_v53 = vpop.f32.mrf.mxu0 }
 0x127   :  { %v534_v24 = vpop.f32.mrf.mxu1 }
 0x128   :  { %v535_v25 = vadd.f32 %v534_v24, %v445_v53 }
 0x12a   :  { %v692_v26 = vadd.f32 %v1266_v43, %v535_v25 }
 0x12c   :  { %v724_v62 = vmax.f32 %v692_v26, 0.0 }
 0x12e   :  { %v448_v29 = vpop.f32.mrf.mxu0  ;;  %v747_v30 = vpack.c.bf16 %v724_v62, %v723_v27 }
 0x12f   :  { %v537_v60 = vpop.f32.mrf.mxu1 }
 0x130   :  { %867 = vmatmul.bf16.gmra.mxu2 %v747_v30  ;;  %v538_v32 = vadd.f32 %v537_v60, %v448_v29 }
 0x132   :  { %v693_v36 = vadd.f32 %v1266_v43, %v538_v32 }
 0x133   :  { %v828_v31 = vpop.f32.mrf.mxu2 }
 0x134   :  { %v908_v33 = vpack.c.bf16 %v828_v31, %v828_v31  ;;  %v725_v40 = vmax.f32 %v693_v36, 0.0 }
 0x136   :  { %941 = vst.msk [vmem:[%s1462_s4] sm:$0xf] %vm940_vm0, %v908_v33  ;;  %v450_v34 = vpop.f32.mrf.mxu0 }
 0x137   :  { %v539_v35 = vpop.f32.mrf.mxu1 }
 0x138   :  { %v540_v37 = vadd.f32 %v539_v35, %v450_v34 }
 0x13a   :  { %v694_v38 = vadd.f32 %v1266_v43, %v540_v37 }
 0x13b   :  { %v830_v39 = vpop.f32.mrf.mxu2 }
 0x13c   :  { %v726_v41 = vmax.f32 %v694_v38, 0.0  ;;  %v909_v42 = vpack.c.bf16 %v830_v39, %v830_v39 }
 0x13e   :  { %942 = vst.msk [vmem:[%s1462_s4 + $0x4] sm:$0xf] %vm940_vm0, %v909_v42  ;;  %v453_v45 = vpop.f32.mrf.mxu0  ;;  %v748_v5 = vpack.c.bf16 %v726_v41, %v725_v40 }
 0x13f   :  { %v542_v47 = vpop.f32.mrf.mxu1 }
 0x140   :  { %872 = vmatmul.bf16.gmra.mxu2 %v748_v5  ;;  %v543_v49 = vadd.f32 %v542_v47, %v453_v45 }
 0x142   :  { %v695_v52 = vadd.f32 %v1266_v43, %v543_v49 }
 0x143   :  { %v833_v48 = vpop.f32.mrf.mxu2 }
 0x144   :  { %v910_v50 = vpack.c.bf16 %v833_v48, %v833_v48  ;;  %v727_v57 = vmax.f32 %v695_v52, 0.0 }
 0x146   :  { %943 = vst.msk [vmem:[%s1462_s4 + $0x8] sm:$0xf] %vm940_vm0, %v910_v50  ;;  %v455_v51 = vpop.f32.mrf.mxu0 }
 0x147   :  { %v544_v21 = vpop.f32.mrf.mxu1 }
 0x148   :  { %v545_v54 = vadd.f32 %v544_v21, %v455_v51 }
 0x14a   :  { %v696_v55 = vadd.f32 %v1266_v43, %v545_v54 }
 0x14b   :  { %v835_v56 = vpop.f32.mrf.mxu2 }
 0x14c   :  { %v728_v58 = vmax.f32 %v696_v55, 0.0  ;;  %v911_v59 = vpack.c.bf16 %v835_v56, %v835_v56 }
 0x14e   :  { %944 = vst.msk [vmem:[%s1462_s4 + $0xc] sm:$0xf] %vm940_vm0, %v911_v59  ;;  %v458_v61 = vpop.f32.mrf.mxu0  ;;  %v749_v63 = vpack.c.bf16 %v728_v58, %v727_v57 }
 0x14f   :  { %v547_v0 = vpop.f32.mrf.mxu1 }
 0x150   :  { %877 = vmatmul.bf16.gmra.mxu2 %v749_v63  ;;  %v548_v2 = vadd.f32 %v547_v0, %v458_v61 }
 0x152   :  { %v697_v6 = vadd.f32 %v1266_v43, %v548_v2 }
 0x153   :  { %v838_v1 = vpop.f32.mrf.mxu2 }
 0x154   :  { %v912_v3 = vpack.c.bf16 %v838_v1, %v838_v1  ;;  %v729_v46 = vmax.f32 %v697_v6, 0.0 }
 0x156   :  { %945 = vst.msk [vmem:[%s1462_s4 + $0x10] sm:$0xf] %vm940_vm0, %v912_v3  ;;  %v460_v28 = vpop.f32.mrf.mxu0 }
 0x157   :  { %v549_v4 = vpop.f32.mrf.mxu1 }
 0x158   :  { %v550_v7 = vadd.f32 %v549_v4, %v460_v28 }
 0x15a   :  { %v698_v8 = vadd.f32 %v1266_v43, %v550_v7 }
 0x15b   :  { %v840_v9 = vpop.f32.mrf.mxu2 }
 0x15c   :  { %v730_v10 = vmax.f32 %v698_v8, 0.0  ;;  %v913_v11 = vpack.c.bf16 %v840_v9, %v840_v9 }
 0x15e   :  { %946 = vst.msk [vmem:[%s1462_s4 + $0x14] sm:$0xf] %vm940_vm0, %v913_v11  ;;  %v750_v12 = vpack.c.bf16 %v730_v10, %v729_v46 }
 0x160   :  { %882 = vmatmul.bf16.gmra.mxu2 %v750_v12 }
 0x163   :  { %v843_v13 = vpop.f32.mrf.mxu2 }
 0x164   :  { %v914_v14 = vpack.c.bf16 %v843_v13, %v843_v13 }
 0x166   :  { %947 = vst.msk [vmem:[%s1462_s4 + $0x18] sm:$0xf] %vm940_vm0, %v914_v14 }
 0x16b   :  { %v845_v15 = vpop.f32.mrf.mxu2 }
 0x16c   :  { %v915_v43 = vpack.c.bf16 %v845_v15, %v845_v15 }
 0x16e   :  { %948 = vst.msk [vmem:[%s1462_s4 + $0x1c] sm:$0xf] %vm940_vm0, %v915_v43 }
 0x173   :  { %v848_v16 = vpop.f32.mrf.mxu2 }
 0x174   :  { %v916_v17 = vpack.c.bf16 %v848_v16, %v848_v16 }
 0x176   :  { %949 = vst.msk [vmem:[%s1462_s4 + $0x20] sm:$0xf] %vm940_vm0, %v916_v17 }
 0x178   :  { %v888_v18 = vpop.f32.mrf.mxu3 }
 0x179   :  { %v932_v19 = vpack.c.bf16 %v888_v18, %v888_v18 }
 0x17b   :  { %965 = vst.msk [vmem:[%s1462_s4 + $0x60] sm:$0xf] %vm940_vm0, %v932_v19  ;;  %v850_v20 = vpop.f32.mrf.mxu2 }
 0x17c   :  { %v917_v22 = vpack.c.bf16 %v850_v20, %v850_v20 }
 0x17e   :  { %950 = vst.msk [vmem:[%s1462_s4 + $0x24] sm:$0xf] %vm940_vm0, %v917_v22 }
 0x180   :  { %v890_v23 = vpop.f32.mrf.mxu3 }
 0x181   :  { %v933_v53 = vpack.c.bf16 %v890_v23, %v890_v23 }
 0x183   :  { %966 = vst.msk [vmem:[%s1462_s4 + $0x64] sm:$0xf] %vm940_vm0, %v933_v53  ;;  %v853_v24 = vpop.f32.mrf.mxu2 }
 0x184   :  { %v918_v44 = vpack.c.bf16 %v853_v24, %v853_v24 }
 0x186   :  { %951 = vst.msk [vmem:[%s1462_s4 + $0x28] sm:$0xf] %vm940_vm0, %v918_v44 }
 0x188   :  { %v893_v25 = vpop.f32.mrf.mxu3 }
 0x189   :  { %v934_v26 = vpack.c.bf16 %v893_v25, %v893_v25 }
 0x18b   :  { %967 = vst.msk [vmem:[%s1462_s4 + $0x68] sm:$0xf] %vm940_vm0, %v934_v26  ;;  %v855_v27 = vpop.f32.mrf.mxu2 }
 0x18c   :  { %v919_v62 = vpack.c.bf16 %v855_v27, %v855_v27 }
 0x18e   :  { %952 = vst.msk [vmem:[%s1462_s4 + $0x2c] sm:$0xf] %vm940_vm0, %v919_v62 }
 0x190   :  { %v895_v29 = vpop.f32.mrf.mxu3 }
 0x191   :  { %v935_v30 = vpack.c.bf16 %v895_v29, %v895_v29 }
 0x193   :  { %968 = vst.msk [vmem:[%s1462_s4 + $0x6c] sm:$0xf] %vm940_vm0, %v935_v30  ;;  %v858_v60 = vpop.f32.mrf.mxu2 }
 0x194   :  { %v920_v31 = vpack.c.bf16 %v858_v60, %v858_v60 }
 0x196   :  { %953 = vst.msk [vmem:[%s1462_s4 + $0x30] sm:$0xf] %vm940_vm0, %v920_v31 }
 0x198   :  { %v898_v32 = vpop.f32.mrf.mxu3 }
 0x199   :  { %v936_v33 = vpack.c.bf16 %v898_v32, %v898_v32 }
 0x19b   :  { %969 = vst.msk [vmem:[%s1462_s4 + $0x70] sm:$0xf] %vm940_vm0, %v936_v33  ;;  %v860_v34 = vpop.f32.mrf.mxu2 }
 0x19c   :  { %v921_v35 = vpack.c.bf16 %v860_v34, %v860_v34 }
 0x19e   :  { %954 = vst.msk [vmem:[%s1462_s4 + $0x34] sm:$0xf] %vm940_vm0, %v921_v35 }
 0x1a0   :  { %v900_v36 = vpop.f32.mrf.mxu3 }
 0x1a1   :  { %v937_v37 = vpack.c.bf16 %v900_v36, %v900_v36 }
 0x1a3   :  { %970 = vst.msk [vmem:[%s1462_s4 + $0x74] sm:$0xf] %vm940_vm0, %v937_v37  ;;  %v863_v38 = vpop.f32.mrf.mxu2 }
 0x1a4   :  { %v922_v39 = vpack.c.bf16 %v863_v38, %v863_v38 }
 0x1a6   :  { %955 = vst.msk [vmem:[%s1462_s4 + $0x38] sm:$0xf] %vm940_vm0, %v922_v39 }
 0x1a8   :  { %v903_v40 = vpop.f32.mrf.mxu3 }
 0x1a9   :  { %v938_v41 = vpack.c.bf16 %v903_v40, %v903_v40 }
 0x1ab   :  { %971 = vst.msk [vmem:[%s1462_s4 + $0x78] sm:$0xf] %vm940_vm0, %v938_v41  ;;  %v865_v42 = vpop.f32.mrf.mxu2 }
 0x1ac   :  { %v923_v45 = vpack.c.bf16 %v865_v42, %v865_v42 }
 0x1ae   :  { %956 = vst.msk [vmem:[%s1462_s4 + $0x3c] sm:$0xf] %vm940_vm0, %v923_v45 }
 0x1b0   :  { %v905_v5 = vpop.f32.mrf.mxu3 }
 0x1b1   :  { %v939_v47 = vpack.c.bf16 %v905_v5, %v905_v5 }
 0x1b3   :  { %972 = vst.msk [vmem:[%s1462_s4 + $0x7c] sm:$0xf] %vm940_vm0, %v939_v47  ;;  %v868_v48 = vpop.f32.mrf.mxu2 }
 0x1b4   :  { %v924_v49 = vpack.c.bf16 %v868_v48, %v868_v48 }
 0x1b6   :  { %957 = vst.msk [vmem:[%s1462_s4 + $0x40] sm:$0xf] %vm940_vm0, %v924_v49 }
 0x1bb   :  { %v870_v50 = vpop.f32.mrf.mxu2 }
 0x1bc   :  { %v925_v51 = vpack.c.bf16 %v870_v50, %v870_v50 }
 0x1be   :  { %958 = vst.msk [vmem:[%s1462_s4 + $0x44] sm:$0xf] %vm940_vm0, %v925_v51 }
 0x1c3   :  { %v873_v21 = vpop.f32.mrf.mxu2 }
 0x1c4   :  { %v926_v52 = vpack.c.bf16 %v873_v21, %v873_v21 }
 0x1c6   :  { %959 = vst.msk [vmem:[%s1462_s4 + $0x48] sm:$0xf] %vm940_vm0, %v926_v52 }
 0x1cb   :  { %v875_v54 = vpop.f32.mrf.mxu2 }
 0x1cc   :  { %v927_v55 = vpack.c.bf16 %v875_v54, %v875_v54 }
 0x1ce   :  { %960 = vst.msk [vmem:[%s1462_s4 + $0x4c] sm:$0xf] %vm940_vm0, %v927_v55 }
 0x1d3   :  { %v878_v56 = vpop.f32.mrf.mxu2 }
 0x1d4   :  { %v928_v57 = vpack.c.bf16 %v878_v56, %v878_v56 }
 0x1d6   :  { %961 = vst.msk [vmem:[%s1462_s4 + $0x50] sm:$0xf] %vm940_vm0, %v928_v57 }
 0x1db   :  { %v880_v58 = vpop.f32.mrf.mxu2 }
 0x1dc   :  { %v929_v59 = vpack.c.bf16 %v880_v58, %v880_v58 }
 0x1de   :  { %962 = vst.msk [vmem:[%s1462_s4 + $0x54] sm:$0xf] %vm940_vm0, %v929_v59 }
 0x1e3   :  { %v883_v61 = vpop.f32.mrf.mxu2 }
 0x1e4   :  { %v930_v63 = vpack.c.bf16 %v883_v61, %v883_v61 }
 0x1e6   :  { %963 = vst.msk [vmem:[%s1462_s4 + $0x58] sm:$0xf] %vm940_vm0, %v930_v63 }
 0x1eb   :  { %v885_v0 = vpop.f32.mrf.mxu2 }
 0x1ec   :  { %v931_v1 = vpack.c.bf16 %v885_v0, %v885_v0 }
 0x1ee   :  { %964 = vst.msk [vmem:[%s1462_s4 + $0x5c] sm:$0xf] %vm940_vm0, %v931_v1 }

</bundles_post_ra>
